<compile_context>
chip_gen: v7x
topology: tpu7x:2x2x1
jax: 0.10.0
libtpu: 0.0.40
codegen_flags: <defaults>
</compile_context>

<pallas_src>
import functools

import jax
import jax.numpy as jnp
from jax.experimental import pallas as pl
from jax.experimental.pallas import tpu as pltpu


# ----------------------------- kernel -------------------------------------- #

def _gemm_bias_act_kernel(p_ref, w_ref, b_ref, o_ref, *, negative_slope, apply_act):
    # Fused: patches @ W (f32 accumulation on the MXU) + bias + LeakyReLU.
    acc = jnp.dot(p_ref[...], w_ref[...], preferred_element_type=jnp.float32)
    y = acc + b_ref[...].astype(jnp.float32)
    if apply_act:
        y = jnp.where(y > 0, y, negative_slope * y)
    o_ref[...] = y.astype(o_ref.dtype)


# ----------------------------- wrappers ------------------------------------ #

def conv_gemm(patches, w2d, bias, *, apply_act, out_dtype,
              negative_slope=0.2, tile_m=512):
    """One conv layer as a tiled GEMM: (M, K) @ (K, N) + bias (+ LeakyReLU)."""
    M, K = patches.shape
    Kw, N = w2d.shape
    assert K == Kw
    tm = min(tile_m, M)
    if M % tm != 0:          # fall back to a single full-M block
        tm = M

    kernel = functools.partial(_gemm_bias_act_kernel,
                               negative_slope=negative_slope,
                               apply_act=apply_act)
    return pl.pallas_call(
        kernel,
        out_shape=jax.ShapeDtypeStruct((M, N), out_dtype),
        grid=(M // tm,),
        in_specs=[pl.BlockSpec((tm, K), lambda i: (i, 0)),   # patch tile (pipelined)
                  pl.BlockSpec((K, N), lambda i: (0, 0)),    # weights resident
                  pl.BlockSpec((1, N), lambda i: (0, 0))],   # bias resident
        out_specs=pl.BlockSpec((tm, N), lambda i: (i, 0)),
        compiler_params=pltpu.CompilerParams(
            dimension_semantics=("parallel",)),
    )(patches, w2d, bias)


def extract_patches(x_nhwc, k, s, p):
    """im2col: (B,H,W,C) -> ((B*Ho*Wo, k*k*C), Ho, Wo).  Wrapper-side layout work."""
    B, H, W, C = x_nhwc.shape
    Ho = (H + 2 * p - k) // s + 1
    Wo = (W + 2 * p - k) // s + 1
    if k == 1 and s == 1 and p == 0:
        return x_nhwc.reshape(B * H * W, C), H, W
    xp = jnp.pad(x_nhwc, ((0, 0), (p, p), (p, p), (0, 0)))
    cols = []
    for kh in range(k):
        for kw in range(k):
            cols.append(xp[:, kh:kh + s * Ho:s, kw:kw + s * Wo:s, :])
    pat = jnp.concatenate(cols, axis=-1)          # (B, Ho, Wo, k*k*C), (kh,kw,c) order
    return pat.reshape(B * Ho * Wo, k * k * C), Ho, Wo


class FaceEmbedNetPallas:
    """Pallas port of FaceEmbedNet: conv(1x1) + 4x conv(4,s2,p1) + conv(4,s1,p0)."""

    def __init__(self, input_channel, channels, output_channel, key):
        # (kernel, stride, pad, cin, cout, apply_leaky_relu)
        self.layer_cfg = [
            (1, 1, 0, input_channel, channels[0], True),
            (4, 2, 1, channels[0], channels[1], True),
            (4, 2, 1, channels[1], channels[2], True),
            (4, 2, 1, channels[2], channels[3], True),
            (4, 2, 1, channels[3], channels[4], True),
            (4, 1, 0, channels[4], output_channel, False),
        ]
        self.params = []
        for cfg, k_layer in zip(self.layer_cfg,
                                jax.random.split(key, len(self.layer_cfg))):
            ksz, _, _, cin, cout, _ = cfg
            kw_, kb_ = jax.random.split(k_layer)
            fan_in = cin * ksz * ksz
            bound = 1.0 / (fan_in ** 0.5)        # PyTorch default conv init
            w = jax.random.uniform(kw_, (ksz, ksz, cin, cout), jnp.float32,
                                   -bound, bound)
            b = jax.random.uniform(kb_, (1, cout), jnp.float32, -bound, bound)
            # matmul operands in bf16 (f32 accumulation in-kernel); bias stays f32.
            self.params.append(
                (w.reshape(ksz * ksz * cin, cout).astype(jnp.bfloat16), b))

    def forward(self, x_nchw):
        # NCHW (PyTorch) -> NHWC so channels sit on the lane axis.
        x = jnp.transpose(x_nchw, (0, 2, 3, 1)).astype(jnp.bfloat16)
        B = x.shape[0]
        n_layers = len(self.layer_cfg)
        for i, (cfg, (w2d, b)) in enumerate(zip(self.layer_cfg, self.params)):
            ksz, s, p, _, cout, act = cfg
            patches, ho, wo = extract_patches(x, ksz, s, p)
            last = i == n_layers - 1
            y = conv_gemm(patches, w2d, b,
                          apply_act=act,
                          out_dtype=jnp.float32 if last else jnp.bfloat16)
            x = y.reshape(B, ho, wo, cout)
        # back to NCHW to match the PyTorch module's output layout
        return jnp.transpose(x, (0, 3, 1, 2))


# ----------------------------- demo ----------------------------------------- #

if __name__ == "__main__":
    key = jax.random.PRNGKey(0)
    k_param, k_x = jax.random.split(key)

    # 64x64 input is the smallest that survives four stride-2 convs plus the
    # final 4x4 valid conv (64 -> 32 -> 16 -> 8 -> 4 -> 1).
    B, C_IN, H, W = 2, 3, 64, 64
    CHANNELS = (16, 32, 64, 64, 64)
    C_OUT = 64

    x = jax.random.normal(k_x, (B, C_IN, H, W), jnp.float32)

    model = FaceEmbedNetPallas(C_IN, CHANNELS, C_OUT, k_param)
    fwd = jax.jit(model.forward)
    out = fwd(x)
    jax.block_until_ready(out)

    assert out.shape == (B, C_OUT, 1, 1), out.shape
    assert out.dtype == jnp.float32
    assert bool(jnp.all(jnp.isfinite(out)))

    print("KERNEL_OK")
</pallas_src>

<mosaic_0001>
module attributes {stable_mosaic.version = 11 : i64} {
  func.func @_gemm_bias_act_kernel(%arg0: i32, %arg1: memref<512x3xbf16, #tpu.memory_space<vmem>>, %arg2: memref<3x16xbf16, #tpu.memory_space<vmem>>, %arg3: memref<1x16xf32, #tpu.memory_space<vmem>>, %arg4: memref<512x16xbf16, #tpu.memory_space<vmem>>) attributes {dimension_semantics = [#tpu.dimension_semantics<parallel>], iteration_bounds = array<i64: 16>, scalar_prefetch = 0 : i64, scratch_operands = 0 : i64, tpu.core_type = #tpu.core_type<tc>, window_params = [{transform_indices = @transform_0, window_bounds = array<i64: 512, 3>}, {pipeline_mode = #tpu.pipeline_mode<synchronous>, transform_indices = @transform_1, window_bounds = array<i64: 3, 16>}, {pipeline_mode = #tpu.pipeline_mode<synchronous>, transform_indices = @transform_2, window_bounds = array<i64: 1, 16>}, {transform_indices = @transform_3, window_bounds = array<i64: 512, 16>}]} {
    %c0 = arith.constant 0 : index
    %c0_0 = arith.constant 0 : index
    %0 = vector.load %arg1[%c0, %c0_0] : memref<512x3xbf16, #tpu.memory_space<vmem>>, vector<512x3xbf16>
    %c0_1 = arith.constant 0 : index
    %c0_2 = arith.constant 0 : index
    %1 = vector.load %arg2[%c0_1, %c0_2] : memref<3x16xbf16, #tpu.memory_space<vmem>>, vector<3x16xbf16>
    %cst = arith.constant dense<0.000000e+00> : vector<512x16xf32>
    %2 = tpu.matmul %0, %1, %cst {dimension_numbers = #tpu.dot_dimension_numbers<[1], [0], [0], [1], [0, 0, 1, 1], [], []>} : vector<512x3xbf16>, vector<3x16xbf16>, vector<512x16xf32> -> vector<512x16xf32>
    %c0_3 = arith.constant 0 : index
    %c0_4 = arith.constant 0 : index
    %3 = vector.load %arg3[%c0_3, %c0_4] : memref<1x16xf32, #tpu.memory_space<vmem>>, vector<1x16xf32>
    %4 = vector.broadcast %3 : vector<1x16xf32> to vector<512x16xf32>
    %5 = arith.addf %2, %4 : vector<512x16xf32>
    %cst_5 = arith.constant 0.000000e+00 : f32
    %6 = vector.broadcast %cst_5 : f32 to vector<512x16xf32>
    %7 = arith.cmpf ogt, %5, %6 : vector<512x16xf32>
    %cst_6 = arith.constant 2.000000e-01 : f32
    %8 = vector.broadcast %cst_6 : f32 to vector<512x16xf32>
    %9 = arith.mulf %8, %5 : vector<512x16xf32>
    %10 = arith.select %7, %5, %9 : vector<512x16xi1>, vector<512x16xf32>
    %11 = arith.truncf %10 : vector<512x16xf32> to vector<512x16xbf16>
    %c0_7 = arith.constant 0 : index
    %c0_8 = arith.constant 0 : index
    %12 = vector.load %arg4[%c0_7, %c0_8] : memref<512x16xbf16, #tpu.memory_space<vmem>>, vector<512x16xbf16>
    tpu.vector_store %arg4[%c0_7, %c0_8], %11 {strides = array<i32>} : memref<512x16xbf16, #tpu.memory_space<vmem>>, vector<512x16xbf16>,
    return
  }
  func.func @transform_0(%arg0: i32) -> (i32, i32) {
    %c0_i32 = arith.constant 0 : i32
    %c0_i32_0 = arith.constant 0 : i32
    return %arg0, %c0_i32 : i32, i32
  }
  func.func @transform_1(%arg0: i32) -> (i32, i32) {
    %c0_i32 = arith.constant 0 : i32
    %c0_i32_0 = arith.constant 0 : i32
    %c0_i32_1 = arith.constant 0 : i32
    return %c0_i32, %c0_i32_0 : i32, i32
  }
  func.func @transform_2(%arg0: i32) -> (i32, i32) {
    %c0_i32 = arith.constant 0 : i32
    %c0_i32_0 = arith.constant 0 : i32
    %c0_i32_1 = arith.constant 0 : i32
    return %c0_i32, %c0_i32_0 : i32, i32
  }
  func.func @transform_3(%arg0: i32) -> (i32, i32) {
    %c0_i32 = arith.constant 0 : i32
    %c0_i32_0 = arith.constant 0 : i32
    return %arg0, %c0_i32 : i32, i32
  }
}

module attributes {stable_mosaic.version = 11 : i64} {
  func.func @_gemm_bias_act_kernel(%arg0: i32, %arg1: memref<512x256xbf16, #tpu.memory_space<vmem>>, %arg2: memref<256x32xbf16, #tpu.memory_space<vmem>>, %arg3: memref<1x32xf32, #tpu.memory_space<vmem>>, %arg4: memref<512x32xbf16, #tpu.memory_space<vmem>>) attributes {dimension_semantics = [#tpu.dimension_semantics<parallel>], iteration_bounds = array<i64: 4>, scalar_prefetch = 0 : i64, scratch_operands = 0 : i64, tpu.core_type = #tpu.core_type<tc>, window_params = [{transform_indices = @transform_0, window_bounds = array<i64: 512, 256>}, {pipeline_mode = #tpu.pipeline_mode<synchronous>, transform_indices = @transform_1, window_bounds = array<i64: 256, 32>}, {pipeline_mode = #tpu.pipeline_mode<synchronous>, transform_indices = @transform_2, window_bounds = array<i64: 1, 32>}, {transform_indices = @transform_3, window_bounds = array<i64: 512, 32>}]} {
    %c0 = arith.constant 0 : index
    %c0_0 = arith.constant 0 : index
    %0 = vector.load %arg1[%c0, %c0_0] : memref<512x256xbf16, #tpu.memory_space<vmem>>, vector<512x256xbf16>
    %c0_1 = arith.constant 0 : index
    %c0_2 = arith.constant 0 : index
    %1 = vector.load %arg2[%c0_1, %c0_2] : memref<256x32xbf16, #tpu.memory_space<vmem>>, vector<256x32xbf16>
    %cst = arith.constant dense<0.000000e+00> : vector<512x32xf32>
    %2 = tpu.matmul %0, %1, %cst {dimension_numbers = #tpu.dot_dimension_numbers<[1], [0], [0], [1], [0, 0, 1, 1], [], []>} : vector<512x256xbf16>, vector<256x32xbf16>, vector<512x32xf32> -> vector<512x32xf32>
    %c0_3 = arith.constant 0 : index
    %c0_4 = arith.constant 0 : index
    %3 = vector.load %arg3[%c0_3, %c0_4] : memref<1x32xf32, #tpu.memory_space<vmem>>, vector<1x32xf32>
    %4 = vector.broadcast %3 : vector<1x32xf32> to vector<512x32xf32>
    %5 = arith.addf %2, %4 : vector<512x32xf32>
    %cst_5 = arith.constant 0.000000e+00 : f32
    %6 = vector.broadcast %cst_5 : f32 to vector<512x32xf32>
    %7 = arith.cmpf ogt, %5, %6 : vector<512x32xf32>
    %cst_6 = arith.constant 2.000000e-01 : f32
    %8 = vector.broadcast %cst_6 : f32 to vector<512x32xf32>
    %9 = arith.mulf %8, %5 : vector<512x32xf32>
    %10 = arith.select %7, %5, %9 : vector<512x32xi1>, vector<512x32xf32>
    %11 = arith.truncf %10 : vector<512x32xf32> to vector<512x32xbf16>
    %c0_7 = arith.constant 0 : index
    %c0_8 = arith.constant 0 : index
    %12 = vector.load %arg4[%c0_7, %c0_8] : memref<512x32xbf16, #tpu.memory_space<vmem>>, vector<512x32xbf16>
    tpu.vector_store %arg4[%c0_7, %c0_8], %11 {strides = array<i32>} : memref<512x32xbf16, #tpu.memory_space<vmem>>, vector<512x32xbf16>,
    return
  }
  func.func @transform_0(%arg0: i32) -> (i32, i32) {
    %c0_i32 = arith.constant 0 : i32
    %c0_i32_0 = arith.constant 0 : i32
    return %arg0, %c0_i32 : i32, i32
  }
  func.func @transform_1(%arg0: i32) -> (i32, i32) {
    %c0_i32 = arith.constant 0 : i32
    %c0_i32_0 = arith.constant 0 : i32
    %c0_i32_1 = arith.constant 0 : i32
    return %c0_i32, %c0_i32_0 : i32, i32
  }
  func.func @transform_2(%arg0: i32) -> (i32, i32) {
    %c0_i32 = arith.constant 0 : i32
    %c0_i32_0 = arith.constant 0 : i32
    %c0_i32_1 = arith.constant 0 : i32
    return %c0_i32, %c0_i32_0 : i32, i32
  }
  func.func @transform_3(%arg0: i32) -> (i32, i32) {
    %c0_i32 = arith.constant 0 : i32
    %c0_i32_0 = arith.constant 0 : i32
    return %arg0, %c0_i32 : i32, i32
  }
}

module attributes {stable_mosaic.version = 11 : i64} {
  func.func @_gemm_bias_act_kernel(%arg0: i32, %arg1: memref<512x512xbf16, #tpu.memory_space<vmem>>, %arg2: memref<512x64xbf16, #tpu.memory_space<vmem>>, %arg3: memref<1x64xf32, #tpu.memory_space<vmem>>, %arg4: memref<512x64xbf16, #tpu.memory_space<vmem>>) attributes {dimension_semantics = [#tpu.dimension_semantics<parallel>], iteration_bounds = array<i64: 1>, scalar_prefetch = 0 : i64, scratch_operands = 0 : i64, tpu.core_type = #tpu.core_type<tc>, window_params = [{transform_indices = @transform_0, window_bounds = array<i64: 512, 512>}, {pipeline_mode = #tpu.pipeline_mode<synchronous>, transform_indices = @transform_1, window_bounds = array<i64: 512, 64>}, {pipeline_mode = #tpu.pipeline_mode<synchronous>, transform_indices = @transform_2, window_bounds = array<i64: 1, 64>}, {transform_indices = @transform_3, window_bounds = array<i64: 512, 64>}]} {
    %c0 = arith.constant 0 : index
    %c0_0 = arith.constant 0 : index
    %0 = vector.load %arg1[%c0, %c0_0] : memref<512x512xbf16, #tpu.memory_space<vmem>>, vector<512x512xbf16>
    %c0_1 = arith.constant 0 : index
    %c0_2 = arith.constant 0 : index
    %1 = vector.load %arg2[%c0_1, %c0_2] : memref<512x64xbf16, #tpu.memory_space<vmem>>, vector<512x64xbf16>
    %cst = arith.constant dense<0.000000e+00> : vector<512x64xf32>
    %2 = tpu.matmul %0, %1, %cst {dimension_numbers = #tpu.dot_dimension_numbers<[1], [0], [0], [1], [0, 0, 1, 1], [], []>} : vector<512x512xbf16>, vector<512x64xbf16>, vector<512x64xf32> -> vector<512x64xf32>
    %c0_3 = arith.constant 0 : index
    %c0_4 = arith.constant 0 : index
    %3 = vector.load %arg3[%c0_3, %c0_4] : memref<1x64xf32, #tpu.memory_space<vmem>>, vector<1x64xf32>
    %4 = vector.broadcast %3 : vector<1x64xf32> to vector<512x64xf32>
    %5 = arith.addf %2, %4 : vector<512x64xf32>
    %cst_5 = arith.constant 0.000000e+00 : f32
    %6 = vector.broadcast %cst_5 : f32 to vector<512x64xf32>
    %7 = arith.cmpf ogt, %5, %6 : vector<512x64xf32>
    %cst_6 = arith.constant 2.000000e-01 : f32
    %8 = vector.broadcast %cst_6 : f32 to vector<512x64xf32>
    %9 = arith.mulf %8, %5 : vector<512x64xf32>
    %10 = arith.select %7, %5, %9 : vector<512x64xi1>, vector<512x64xf32>
    %11 = arith.truncf %10 : vector<512x64xf32> to vector<512x64xbf16>
    %c0_7 = arith.constant 0 : index
    %c0_8 = arith.constant 0 : index
    %12 = vector.load %arg4[%c0_7, %c0_8] : memref<512x64xbf16, #tpu.memory_space<vmem>>, vector<512x64xbf16>
    tpu.vector_store %arg4[%c0_7, %c0_8], %11 {strides = array<i32>} : memref<512x64xbf16, #tpu.memory_space<vmem>>, vector<512x64xbf16>,
    return
  }
  func.func @transform_0(%arg0: i32) -> (i32, i32) {
    %c0_i32 = arith.constant 0 : i32
    %c0_i32_0 = arith.constant 0 : i32
    return %arg0, %c0_i32 : i32, i32
  }
  func.func @transform_1(%arg0: i32) -> (i32, i32) {
    %c0_i32 = arith.constant 0 : i32
    %c0_i32_0 = arith.constant 0 : i32
    %c0_i32_1 = arith.constant 0 : i32
    return %c0_i32, %c0_i32_0 : i32, i32
  }
  func.func @transform_2(%arg0: i32) -> (i32, i32) {
    %c0_i32 = arith.constant 0 : i32
    %c0_i32_0 = arith.constant 0 : i32
    %c0_i32_1 = arith.constant 0 : i32
    return %c0_i32, %c0_i32_0 : i32, i32
  }
  func.func @transform_3(%arg0: i32) -> (i32, i32) {
    %c0_i32 = arith.constant 0 : i32
    %c0_i32_0 = arith.constant 0 : i32
    return %arg0, %c0_i32 : i32, i32
  }
}

module attributes {stable_mosaic.version = 11 : i64} {
  func.func @_gemm_bias_act_kernel(%arg0: i32, %arg1: memref<128x1024xbf16, #tpu.memory_space<vmem>>, %arg2: memref<1024x64xbf16, #tpu.memory_space<vmem>>, %arg3: memref<1x64xf32, #tpu.memory_space<vmem>>, %arg4: memref<128x64xbf16, #tpu.memory_space<vmem>>) attributes {dimension_semantics = [#tpu.dimension_semantics<parallel>], iteration_bounds = array<i64: 1>, scalar_prefetch = 0 : i64, scratch_operands = 0 : i64, tpu.core_type = #tpu.core_type<tc>, window_params = [{transform_indices = @transform_0, window_bounds = array<i64: 128, 1024>}, {pipeline_mode = #tpu.pipeline_mode<synchronous>, transform_indices = @transform_1, window_bounds = array<i64: 1024, 64>}, {pipeline_mode = #tpu.pipeline_mode<synchronous>, transform_indices = @transform_2, window_bounds = array<i64: 1, 64>}, {transform_indices = @transform_3, window_bounds = array<i64: 128, 64>}]} {
    %c0 = arith.constant 0 : index
    %c0_0 = arith.constant 0 : index
    %0 = vector.load %arg1[%c0, %c0_0] : memref<128x1024xbf16, #tpu.memory_space<vmem>>, vector<128x1024xbf16>
    %c0_1 = arith.constant 0 : index
    %c0_2 = arith.constant 0 : index
    %1 = vector.load %arg2[%c0_1, %c0_2] : memref<1024x64xbf16, #tpu.memory_space<vmem>>, vector<1024x64xbf16>
    %cst = arith.constant dense<0.000000e+00> : vector<128x64xf32>
    %2 = tpu.matmul %0, %1, %cst {dimension_numbers = #tpu.dot_dimension_numbers<[1], [0], [0], [1], [0, 0, 1, 1], [], []>} : vector<128x1024xbf16>, vector<1024x64xbf16>, vector<128x64xf32> -> vector<128x64xf32>
    %c0_3 = arith.constant 0 : index
    %c0_4 = arith.constant 0 : index
    %3 = vector.load %arg3[%c0_3, %c0_4] : memref<1x64xf32, #tpu.memory_space<vmem>>, vector<1x64xf32>
    %4 = vector.broadcast %3 : vector<1x64xf32> to vector<128x64xf32>
    %5 = arith.addf %2, %4 : vector<128x64xf32>
    %cst_5 = arith.constant 0.000000e+00 : f32
    %6 = vector.broadcast %cst_5 : f32 to vector<128x64xf32>
    %7 = arith.cmpf ogt, %5, %6 : vector<128x64xf32>
    %cst_6 = arith.constant 2.000000e-01 : f32
    %8 = vector.broadcast %cst_6 : f32 to vector<128x64xf32>
    %9 = arith.mulf %8, %5 : vector<128x64xf32>
    %10 = arith.select %7, %5, %9 : vector<128x64xi1>, vector<128x64xf32>
    %11 = arith.truncf %10 : vector<128x64xf32> to vector<128x64xbf16>
    %c0_7 = arith.constant 0 : index
    %c0_8 = arith.constant 0 : index
    %12 = vector.load %arg4[%c0_7, %c0_8] : memref<128x64xbf16, #tpu.memory_space<vmem>>, vector<128x64xbf16>
    tpu.vector_store %arg4[%c0_7, %c0_8], %11 {strides = array<i32>} : memref<128x64xbf16, #tpu.memory_space<vmem>>, vector<128x64xbf16>,
    return
  }
  func.func @transform_0(%arg0: i32) -> (i32, i32) {
    %c0_i32 = arith.constant 0 : i32
    %c0_i32_0 = arith.constant 0 : i32
    return %arg0, %c0_i32 : i32, i32
  }
  func.func @transform_1(%arg0: i32) -> (i32, i32) {
    %c0_i32 = arith.constant 0 : i32
    %c0_i32_0 = arith.constant 0 : i32
    %c0_i32_1 = arith.constant 0 : i32
    return %c0_i32, %c0_i32_0 : i32, i32
  }
  func.func @transform_2(%arg0: i32) -> (i32, i32) {
    %c0_i32 = arith.constant 0 : i32
    %c0_i32_0 = arith.constant 0 : i32
    %c0_i32_1 = arith.constant 0 : i32
    return %c0_i32, %c0_i32_0 : i32, i32
  }
  func.func @transform_3(%arg0: i32) -> (i32, i32) {
    %c0_i32 = arith.constant 0 : i32
    %c0_i32_0 = arith.constant 0 : i32
    return %arg0, %c0_i32 : i32, i32
  }
}

module attributes {stable_mosaic.version = 11 : i64} {
  func.func @_gemm_bias_act_kernel(%arg0: i32, %arg1: memref<32x1024xbf16, #tpu.memory_space<vmem>>, %arg2: memref<1024x64xbf16, #tpu.memory_space<vmem>>, %arg3: memref<1x64xf32, #tpu.memory_space<vmem>>, %arg4: memref<32x64xbf16, #tpu.memory_space<vmem>>) attributes {dimension_semantics = [#tpu.dimension_semantics<parallel>], iteration_bounds = array<i64: 1>, scalar_prefetch = 0 : i64, scratch_operands = 0 : i64, tpu.core_type = #tpu.core_type<tc>, window_params = [{transform_indices = @transform_0, window_bounds = array<i64: 32, 1024>}, {pipeline_mode = #tpu.pipeline_mode<synchronous>, transform_indices = @transform_1, window_bounds = array<i64: 1024, 64>}, {pipeline_mode = #tpu.pipeline_mode<synchronous>, transform_indices = @transform_2, window_bounds = array<i64: 1, 64>}, {transform_indices = @transform_3, window_bounds = array<i64: 32, 64>}]} {
    %c0 = arith.constant 0 : index
    %c0_0 = arith.constant 0 : index
    %0 = vector.load %arg1[%c0, %c0_0] : memref<32x1024xbf16, #tpu.memory_space<vmem>>, vector<32x1024xbf16>
    %c0_1 = arith.constant 0 : index
    %c0_2 = arith.constant 0 : index
    %1 = vector.load %arg2[%c0_1, %c0_2] : memref<1024x64xbf16, #tpu.memory_space<vmem>>, vector<1024x64xbf16>
    %cst = arith.constant dense<0.000000e+00> : vector<32x64xf32>
    %2 = tpu.matmul %0, %1, %cst {dimension_numbers = #tpu.dot_dimension_numbers<[1], [0], [0], [1], [0, 0, 1, 1], [], []>} : vector<32x1024xbf16>, vector<1024x64xbf16>, vector<32x64xf32> -> vector<32x64xf32>
    %c0_3 = arith.constant 0 : index
    %c0_4 = arith.constant 0 : index
    %3 = vector.load %arg3[%c0_3, %c0_4] : memref<1x64xf32, #tpu.memory_space<vmem>>, vector<1x64xf32>
    %4 = vector.broadcast %3 : vector<1x64xf32> to vector<32x64xf32>
    %5 = arith.addf %2, %4 : vector<32x64xf32>
    %cst_5 = arith.constant 0.000000e+00 : f32
    %6 = vector.broadcast %cst_5 : f32 to vector<32x64xf32>
    %7 = arith.cmpf ogt, %5, %6 : vector<32x64xf32>
    %cst_6 = arith.constant 2.000000e-01 : f32
    %8 = vector.broadcast %cst_6 : f32 to vector<32x64xf32>
    %9 = arith.mulf %8, %5 : vector<32x64xf32>
    %10 = arith.select %7, %5, %9 : vector<32x64xi1>, vector<32x64xf32>
    %11 = arith.truncf %10 : vector<32x64xf32> to vector<32x64xbf16>
    %c0_7 = arith.constant 0 : index
    %c0_8 = arith.constant 0 : index
    %12 = vector.load %arg4[%c0_7, %c0_8] : memref<32x64xbf16, #tpu.memory_space<vmem>>, vector<32x64xbf16>
    tpu.vector_store %arg4[%c0_7, %c0_8], %11 {strides = array<i32>} : memref<32x64xbf16, #tpu.memory_space<vmem>>, vector<32x64xbf16>,
    return
  }
  func.func @transform_0(%arg0: i32) -> (i32, i32) {
    %c0_i32 = arith.constant 0 : i32
    %c0_i32_0 = arith.constant 0 : i32
    return %arg0, %c0_i32 : i32, i32
  }
  func.func @transform_1(%arg0: i32) -> (i32, i32) {
    %c0_i32 = arith.constant 0 : i32
    %c0_i32_0 = arith.constant 0 : i32
    %c0_i32_1 = arith.constant 0 : i32
    return %c0_i32, %c0_i32_0 : i32, i32
  }
  func.func @transform_2(%arg0: i32) -> (i32, i32) {
    %c0_i32 = arith.constant 0 : i32
    %c0_i32_0 = arith.constant 0 : i32
    %c0_i32_1 = arith.constant 0 : i32
    return %c0_i32, %c0_i32_0 : i32, i32
  }
  func.func @transform_3(%arg0: i32) -> (i32, i32) {
    %c0_i32 = arith.constant 0 : i32
    %c0_i32_0 = arith.constant 0 : i32
    return %arg0, %c0_i32 : i32, i32
  }
}

module attributes {stable_mosaic.version = 11 : i64} {
  func.func @_gemm_bias_act_kernel(%arg0: i32, %arg1: memref<2x1024xbf16, #tpu.memory_space<vmem>>, %arg2: memref<1024x64xbf16, #tpu.memory_space<vmem>>, %arg3: memref<1x64xf32, #tpu.memory_space<vmem>>, %arg4: memref<2x64xf32, #tpu.memory_space<vmem>>) attributes {dimension_semantics = [#tpu.dimension_semantics<parallel>], iteration_bounds = array<i64: 1>, scalar_prefetch = 0 : i64, scratch_operands = 0 : i64, tpu.core_type = #tpu.core_type<tc>, window_params = [{transform_indices = @transform_0, window_bounds = array<i64: 2, 1024>}, {pipeline_mode = #tpu.pipeline_mode<synchronous>, transform_indices = @transform_1, window_bounds = array<i64: 1024, 64>}, {pipeline_mode = #tpu.pipeline_mode<synchronous>, transform_indices = @transform_2, window_bounds = array<i64: 1, 64>}, {transform_indices = @transform_3, window_bounds = array<i64: 2, 64>}]} {
    %c0 = arith.constant 0 : index
    %c0_0 = arith.constant 0 : index
    %0 = vector.load %arg1[%c0, %c0_0] : memref<2x1024xbf16, #tpu.memory_space<vmem>>, vector<2x1024xbf16>
    %c0_1 = arith.constant 0 : index
    %c0_2 = arith.constant 0 : index
    %1 = vector.load %arg2[%c0_1, %c0_2] : memref<1024x64xbf16, #tpu.memory_space<vmem>>, vector<1024x64xbf16>
    %cst = arith.constant dense<0.000000e+00> : vector<2x64xf32>
    %2 = tpu.matmul %0, %1, %cst {dimension_numbers = #tpu.dot_dimension_numbers<[1], [0], [0], [1], [0, 0, 1, 1], [], []>} : vector<2x1024xbf16>, vector<1024x64xbf16>, vector<2x64xf32> -> vector<2x64xf32>
    %c0_3 = arith.constant 0 : index
    %c0_4 = arith.constant 0 : index
    %3 = vector.load %arg3[%c0_3, %c0_4] : memref<1x64xf32, #tpu.memory_space<vmem>>, vector<1x64xf32>
    %4 = vector.broadcast %3 : vector<1x64xf32> to vector<2x64xf32>
    %5 = arith.addf %2, %4 : vector<2x64xf32>
    %c0_5 = arith.constant 0 : index
    %c0_6 = arith.constant 0 : index
    %6 = vector.load %arg4[%c0_5, %c0_6] : memref<2x64xf32, #tpu.memory_space<vmem>>, vector<2x64xf32>
    tpu.vector_store %arg4[%c0_5, %c0_6], %5 {strides = array<i32>} : memref<2x64xf32, #tpu.memory_space<vmem>>, vector<2x64xf32>,
    return
  }
  func.func @transform_0(%arg0: i32) -> (i32, i32) {
    %c0_i32 = arith.constant 0 : i32
    %c0_i32_0 = arith.constant 0 : i32
    return %arg0, %c0_i32 : i32, i32
  }
  func.func @transform_1(%arg0: i32) -> (i32, i32) {
    %c0_i32 = arith.constant 0 : i32
    %c0_i32_0 = arith.constant 0 : i32
    %c0_i32_1 = arith.constant 0 : i32
    return %c0_i32, %c0_i32_0 : i32, i32
  }
  func.func @transform_2(%arg0: i32) -> (i32, i32) {
    %c0_i32 = arith.constant 0 : i32
    %c0_i32_0 = arith.constant 0 : i32
    %c0_i32_1 = arith.constant 0 : i32
    return %c0_i32, %c0_i32_0 : i32, i32
  }
  func.func @transform_3(%arg0: i32) -> (i32, i32) {
    %c0_i32 = arith.constant 0 : i32
    %c0_i32_0 = arith.constant 0 : i32
    return %arg0, %c0_i32 : i32, i32
  }
}

</mosaic_0001>

<bundles_post_ra>
// kernel: forward.6
= control target key start
LH: loop header
LB: loop body
LE: loop exit
PB: predicated region body
PF: predicated region fallthrough
CT: control target
= control target key end

     0   :  { %s1744_s12 = smov 0   ;;  %s2101_s0 = inlined_call_operand.vmem [shape: bf16[8192,3], index: 0, kind: input, shape index: {}]   ;;  %s2102_s1 = inlined_call_operand.vmem [shape: bf16[3,16], index: 1, kind: input, shape index: {}]   ;;  %s2103_s2 = inlined_call_operand.vmem [shape: f32[1,16], index: 2, kind: input, shape index: {}]   ;;  %s2104_s3 = inlined_call_operand.vmem [shape: bf16[8192,16], index: 3, kind: output, shape index: {}]  }
   0x1 LB: > { %s1369_s13 = sadd.s32 4294967295, %s1721_s12   ;;  %p1373_p0 = scmp.ge.s32.totalorder %s1721_s12, 1  ;;  %s1721_s12 = sphi %s1744_s12, %s13_s12  }
   0x2   : > { %p138_p1 = scmp.lt.s32.totalorder %s1721_s12, 17 }
   0x4   : > { %p139_p2 = pnand %p1373_p0, %p138_p1 }
   0x5   : > { %v239_v0 = vld [vmem:[%s2102_s1] sm:$0x3] (!%p139_p2)  ;;  %vm504_vm0 = vcmask (!%p139_p2), 1040384   ;;  %vm505_vm1 = vcmask (!%p139_p2), 1041408   ;;  %s1374_s16 = sshll.u32 (!%p139_p2), %s1369_s13, 6  ;;  %v1723_v1 = vmov (!%p139_p2), 65535  }
   0x6   : > { %142 = sbr.rel (%p139_p2) target bundleno = 317 (0x13d), region = 32  ;;  %v506_v2 = vsel (!%p139_p2), %vm504_vm0, 4294967295, %v1723_v1  ;;  %p163_p3 = scmp.lt.s32.totalorder (!%p139_p2), %s1374_s16, 1023  ;;  %vm407_vm2 = vcmask (!%p139_p2), 23552   ;;  %v1832_v37 = vld [vmem:[%s2103_s2] ss:$0 sm:$0xff] (!%p139_p2) }
   0x7   : > { %v507_v3 = vsel (!%p139_p2), %vm505_vm1, %v506_v2, 0  ;;  %vm1248_vm3 = vcmask (!%p139_p2), 125952  }
   0x8   : > { %v509_v4 = vand.u32 (!%p139_p2), %v507_v3, %v239_v0 }
   0xa   : > { %1606 = vmatprep.subr.bf16.mxu0 (!%p139_p2), %v509_v4  ;;  %1672 = vmatprep.subr.bf16.mxu1 (!%p139_p2), %v509_v4 }
   0xb   : > { %1607 = vmatpush3.bf16.msra.mxu0 (!%p139_p2), %v509_v4  ;;  %1673 = vmatpush3.bf16.msra.mxu1 (!%p139_p2), %v509_v4 }
   0xd   : > { %s2106_s16 = smov (!%p163_p3, %s1374_s16), 1023 }
   0xe   : > { %s1375_s17 = sshll.u32 %s2106_s16, 2 }
   0xf   : > { %s1763_s20 = scalar_lea.vmem %s2101_s0, %s1375_s17  ;;  %s1844_s25 = scalar_lea.vmem %s2104_s3, %s1375_s17 }
  0x10   : > { %v1683_v5 = vld [vmem:[%s1763_s20] sm:$0xff]   ;;  %v1685_v7 = vld [vmem:[%s1763_s20 + $0x8] sm:$0xff]   ;;  %v1687_v9 = vld [vmem:[%s1763_s20 + $0x10] sm:$0xff]  }
  0x11   : > { %v1684_v6 = vld [vmem:[%s1763_s20 + $0x80] sm:$0xff]   ;;  %1608 = vmatprep.mubr.msk.bf16.mxu0 %vm407_vm2, %v1683_v5  ;;  %v1686_v8 = vld [vmem:[%s1763_s20 + $0x88] sm:$0xff]   ;;  %v1688_v10 = vld [vmem:[%s1763_s20 + $0x90] sm:$0xff]  }
  0x12   : > { %1640 = vmatprep.mubr.msk.bf16.mxu1 %vm407_vm2, %v1684_v6  ;;  %1609 = vmatmul.mubr.msk.bf16.vlgmr.msra.gmra.mrb[0].mxu0 %vm407_vm2, %v1685_v7  ;;  %v1689_v11 = vld [vmem:[%s1763_s20 + $0x18] sm:$0xff]   ;;  %v1691_v13 = vld [vmem:[%s1763_s20 + $0x20] sm:$0xff]   ;;  %v1693_v15 = vld [vmem:[%s1763_s20 + $0x28] sm:$0xff]  }
  0x13   : > { %1641 = vmatmul.mubr.msk.bf16.vlgmr.msra.gmra.mrb[0].mxu1 %vm407_vm2, %v1686_v8  ;;  %1612 = vmatprep.mubr.msk.bf16.mxu0 %vm407_vm2, %v1687_v9  ;;  %v1690_v12 = vld [vmem:[%s1763_s20 + $0x98] sm:$0xff]   ;;  %v1692_v14 = vld [vmem:[%s1763_s20 + $0xa0] sm:$0xff]   ;;  %v1694_v16 = vld [vmem:[%s1763_s20 + $0xa8] sm:$0xff]  }
  0x14   : > { %1644 = vmatprep.mubr.msk.bf16.mxu1 %vm407_vm2, %v1688_v10  ;;  %v1695_v17 = vld [vmem:[%s1763_s20 + $0x30] sm:$0xff]   ;;  %v1697_v19 = vld [vmem:[%s1763_s20 + $0x38] sm:$0xff]   ;;  %v1699_v21 = vld [vmem:[%s1763_s20 + $0x40] sm:$0xff]  }
  0x15   : > { %v1696_v18 = vld [vmem:[%s1763_s20 + $0xb0] sm:$0xff]   ;;  %v1698_v20 = vld [vmem:[%s1763_s20 + $0xb8] sm:$0xff]   ;;  %v1700_v22 = vld [vmem:[%s1763_s20 + $0xc0] sm:$0xff]  }
  0x16   : > { %v1701_v23 = vld [vmem:[%s1763_s20 + $0x48] sm:$0xff]   ;;  %v1703_v25 = vld [vmem:[%s1763_s20 + $0x50] sm:$0xff]   ;;  %v1705_v27 = vld [vmem:[%s1763_s20 + $0x58] sm:$0xff]  }
  0x17   : > { %v1702_v24 = vld [vmem:[%s1763_s20 + $0xc8] sm:$0xff]   ;;  %v1704_v26 = vld [vmem:[%s1763_s20 + $0xd0] sm:$0xff]   ;;  %v1706_v28 = vld [vmem:[%s1763_s20 + $0xd8] sm:$0xff]  }
  0x18   : > { %v1707_v29 = vld [vmem:[%s1763_s20 + $0x60] sm:$0xff]   ;;  %v1709_v31 = vld [vmem:[%s1763_s20 + $0x68] sm:$0xff]   ;;  %v1711_v33 = vld [vmem:[%s1763_s20 + $0x70] sm:$0xff]  }
  0x19   : > { %v1708_v30 = vld [vmem:[%s1763_s20 + $0xe0] sm:$0xff]   ;;  %v1710_v32 = vld [vmem:[%s1763_s20 + $0xe8] sm:$0xff]   ;;  %v1712_v34 = vld [vmem:[%s1763_s20 + $0xf0] sm:$0xff]  }
  0x1a   : > { %1613 = vmatmul.mubr.msk.bf16.gmra.mrb[4].mxu0 %vm407_vm2, %v1689_v11  ;;  %v1713_v35 = vld [vmem:[%s1763_s20 + $0x78] sm:$0xff]  }
  0x1b   : > { %1645 = vmatmul.mubr.msk.bf16.gmra.mrb[4].mxu1 %vm407_vm2, %v1690_v12  ;;  %1616 = vmatprep.mubr.msk.bf16.mxu0 %vm407_vm2, %v1691_v13  ;;  %v1714_v36 = vld [vmem:[%s1763_s20 + $0xf8] sm:$0xff]  }
  0x1c   : > { %1648 = vmatprep.mubr.msk.bf16.mxu1 %vm407_vm2, %v1692_v14 }
  0x22   : > { %1617 = vmatmul.mubr.msk.bf16.gmra.mrb[8].mxu0 %vm407_vm2, %v1693_v15 }
  0x23   : > { %1649 = vmatmul.mubr.msk.bf16.gmra.mrb[8].mxu1 %vm407_vm2, %v1694_v16  ;;  %1620 = vmatprep.mubr.msk.bf16.mxu0 %vm407_vm2, %v1695_v17 }
  0x24   : > { %1652 = vmatprep.mubr.msk.bf16.mxu1 %vm407_vm2, %v1696_v18 }
  0x2a   : > { %1621 = vmatmul.mubr.msk.bf16.gmra.mrb[12].mxu0 %vm407_vm2, %v1697_v19 }
  0x2b   : > { %1653 = vmatmul.mubr.msk.bf16.gmra.mrb[12].mxu1 %vm407_vm2, %v1698_v20  ;;  %1624 = vmatprep.mubr.msk.bf16.mxu0 %vm407_vm2, %v1699_v21 }
  0x2c   : > { %1656 = vmatprep.mubr.msk.bf16.mxu1 %vm407_vm2, %v1700_v22 }
  0x32   : > { %1625 = vmatmul.mubr.msk.bf16.gmra.mrb[16].mxu0 %vm407_vm2, %v1701_v23 }
  0x33   : > { %1657 = vmatmul.mubr.msk.bf16.gmra.mrb[16].mxu1 %vm407_vm2, %v1702_v24  ;;  %1628 = vmatprep.mubr.msk.bf16.mxu0 %vm407_vm2, %v1703_v25 }
  0x34   : > { %1660 = vmatprep.mubr.msk.bf16.mxu1 %vm407_vm2, %v1704_v26 }
  0x3a   : > { %1629 = vmatmul.mubr.msk.bf16.gmra.mrb[20].mxu0 %vm407_vm2, %v1705_v27 }
  0x3b   : > { %1661 = vmatmul.mubr.msk.bf16.gmra.mrb[20].mxu1 %vm407_vm2, %v1706_v28  ;;  %1632 = vmatprep.mubr.msk.bf16.mxu0 %vm407_vm2, %v1707_v29 }
  0x3c   : > { %1664 = vmatprep.mubr.msk.bf16.mxu1 %vm407_vm2, %v1708_v30 }
  0x42   : > { %1633 = vmatmul.mubr.msk.bf16.gmra.mrb[24].mxu0 %vm407_vm2, %v1709_v31 }
  0x43   : > { %1665 = vmatmul.mubr.msk.bf16.gmra.mrb[24].mxu1 %vm407_vm2, %v1710_v32  ;;  %1636 = vmatprep.mubr.msk.bf16.mxu0 %vm407_vm2, %v1711_v33 }
  0x44   : > { %1668 = vmatprep.mubr.msk.bf16.mxu1 %vm407_vm2, %v1712_v34 }
  0x4a   : > { %1637 = vmatmul.mubr.msk.bf16.gmra.mrb[28].mxu0 %vm407_vm2, %v1713_v35 }
  0x4b   : > { %1669 = vmatmul.mubr.msk.bf16.gmra.mrb[28].mxu1 %vm407_vm2, %v1714_v36 }
  0xe5   : > { %v1610_v38 = vpop.f32.mrb[0].mxu0 }
  0xe6   : > { %v554_v39 = vadd.f32 %v1610_v38, %v1832_v37  ;;  %v1642_v40 = vpop.f32.mrb[0].mxu1  ;;  %v545_v41 = vpop.f32.mrb[1].mxu0 }
  0xe7   : > { %v682_v42 = vadd.f32 %v1642_v40, %v1832_v37  ;;  %v546_v43 = vadd.f32 %v1832_v37, %v545_v41  ;;  %v673_v44 = vpop.f32.mrb[1].mxu1  ;;  %v1611_v45 = vpop.f32.mrb[2].mxu0 }
  0xe8   : > { %vm802_vm4 = vcmp.gt.f32.partialorder %v554_v39, 0.0  ;;  %v866_v46 = vmul.f32 0.2, %v554_v39  ;;  %v674_v47 = vadd.f32 %v1832_v37, %v673_v44  ;;  %v557_v48 = vadd.f32 %v1611_v45, %v1832_v37  ;;  %v1643_v49 = vpop.f32.mrb[2].mxu1  ;;  %v548_v50 = vpop.f32.mrb[3].mxu0 }
  0xe9   : > { %vm834_vm5 = vcmp.gt.f32.partialorder %v682_v42, 0.0  ;;  %v898_v51 = vmul.f32 0.2, %v682_v42  ;;  %vm800_vm6 = vcmp.gt.f32.partialorder %v546_v43, 0.0  ;;  %v864_v52 = vmul.f32 0.2, %v546_v43 }
  0xea   : > { %v930_v53 = vsel %vm802_vm4, %v554_v39, %v866_v46  ;;  %vm832_vm7 = vcmp.gt.f32.partialorder %v674_v47, 0.0  ;;  %v896_v54 = vmul.f32 0.2, %v674_v47  ;;  %vm803_vm8 = vcmp.gt.f32.partialorder %v557_v48, 0.0  ;;  %v676_v55 = vpop.f32.mrb[3].mxu1 }
  0xeb   : > { %v1511_v56 = vpack.c.bf16 %v930_v53, %v930_v53  ;;  %v962_v57 = vsel %vm834_vm5, %v682_v42, %v898_v51  ;;  %v928_v58 = vsel %vm800_vm6, %v546_v43, %v864_v52  ;;  %v867_v59 = vmul.f32 0.2, %v557_v48 }
  0xec   : > { %v1543_v60 = vpack.c.bf16 %v962_v57, %v962_v57  ;;  %v1509_v61 = vpack.c.bf16 %v928_v58, %v928_v58  ;;  %v960_v62 = vsel %vm832_vm7, %v674_v47, %v896_v54  ;;  %v685_v63 = vadd.f32 %v1643_v49, %v1832_v37 }
  0xed   : > { %1251 = vst.msk [vmem:[%s1844_s25 + $0x8] sm:$0xf] %vm1248_vm3, %v1511_v56  ;;  %v1541_v0 = vpack.c.bf16 %v960_v62, %v960_v62  ;;  %v931_v1 = vsel %vm803_vm8, %v557_v48, %v867_v59  ;;  %v549_v2 = vadd.f32 %v1832_v37, %v548_v50  ;;  %v677_v3 = vadd.f32 %v1832_v37, %v676_v55  ;;  %v1614_v4 = vpop.f32.mrb[4].mxu0 }
  0xee   : > { %1283 = vst.msk [vmem:[%s1844_s25 + $0x88] sm:$0xf] %vm1248_vm3, %v1543_v60  ;;  %1249 = vst.msk [vmem:[%s1844_s25] sm:$0xf] %vm1248_vm3, %v1509_v61  ;;  %v1512_v5 = vpack.c.bf16 %v931_v1, %v931_v1  ;;  %vm835_vm9 = vcmp.gt.f32.partialorder %v685_v63, 0.0  ;;  %v570_v7 = vadd.f32 %v1614_v4, %v1832_v37  ;;  %v1646_v8 = vpop.f32.mrb[4].mxu1 }
  0xef   : > { %v899_v6 = vmul.f32 0.2, %v685_v63  ;;  %v561_v9 = vpop.f32.mrb[5].mxu0  ;;  %1281 = vst.msk [vmem:[%s1844_s25 + $0x80] sm:$0xf] %vm1248_vm3, %v1541_v0  ;;  %vm801_vm10 = vcmp.gt.f32.partialorder %v549_v2, 0.0  ;;  %v698_v14 = vadd.f32 %v1646_v8, %v1832_v37 }
  0xf0   : > { %v865_v10 = vmul.f32 0.2, %v549_v2  ;;  %vm833_vm11 = vcmp.gt.f32.partialorder %v677_v3, 0.0  ;;  %v897_v11 = vmul.f32 0.2, %v677_v3  ;;  %vm806_vm12 = vcmp.gt.f32.partialorder %v570_v7, 0.0 }
  0xf1   : > { %1252 = vst.msk [vmem:[%s1844_s25 + $0xc] sm:$0xf] %vm1248_vm3, %v1512_v5  ;;  %v963_v12 = vsel %vm835_vm9, %v685_v63, %v899_v6  ;;  %v870_v13 = vmul.f32 0.2, %v570_v7  ;;  %v689_v15 = vpop.f32.mrb[5].mxu1  ;;  %v1615_v16 = vpop.f32.mrb[6].mxu0  ;;  %v562_v20 = vadd.f32 %v1832_v37, %v561_v9 }
  0xf2   : > { %v1544_v17 = vpack.c.bf16 %v963_v12, %v963_v12  ;;  %v929_v18 = vsel %vm801_vm10, %v549_v2, %v865_v10  ;;  %v961_v19 = vsel %vm833_vm11, %v677_v3, %v897_v11  ;;  %v1647_v21 = vpop.f32.mrb[6].mxu1  ;;  %v564_v22 = vpop.f32.mrb[7].mxu0  ;;  %vm838_vm13 = vcmp.gt.f32.partialorder %v698_v14, 0.0 }
  0xf3   : > { %v1510_v23 = vpack.c.bf16 %v929_v18, %v929_v18  ;;  %v1542_v24 = vpack.c.bf16 %v961_v19, %v961_v19  ;;  %v934_v25 = vsel %vm806_vm12, %v570_v7, %v870_v13  ;;  %v692_v26 = vpop.f32.mrb[7].mxu1  ;;  %v902_v28 = vmul.f32 0.2, %v698_v14 }
  0xf4   : > { %1284 = vst.msk [vmem:[%s1844_s25 + $0x8c] sm:$0xf] %vm1248_vm3, %v1544_v17  ;;  %v1515_v27 = vpack.c.bf16 %v934_v25, %v934_v25  ;;  %vm804_vm14 = vcmp.gt.f32.partialorder %v562_v20, 0.0  ;;  %v868_v29 = vmul.f32 0.2, %v562_v20  ;;  %v690_v30 = vadd.f32 %v1832_v37, %v689_v15 }
  0xf5   : > { %1250 = vst.msk [vmem:[%s1844_s25 + $0x4] sm:$0xf] %vm1248_vm3, %v1510_v23  ;;  %1282 = vst.msk [vmem:[%s1844_s25 + $0x84] sm:$0xf] %vm1248_vm3, %v1542_v24  ;;  %v573_v31 = vadd.f32 %v1615_v16, %v1832_v37  ;;  %v701_v32 = vadd.f32 %v1647_v21, %v1832_v37  ;;  %v565_v33 = vadd.f32 %v1832_v37, %v564_v22  ;;  %v1618_v38 = vpop.f32.mrb[8].mxu0 }
  0xf6   : > { %1255 = vst.msk [vmem:[%s1844_s25 + $0x18] sm:$0xf] %vm1248_vm3, %v1515_v27  ;;  %v966_v34 = vsel %vm838_vm13, %v698_v14, %v902_v28  ;;  %v932_v35 = vsel %vm804_vm14, %v562_v20, %v868_v29  ;;  %v693_v36 = vadd.f32 %v1832_v37, %v692_v26  ;;  %vm836_vm15 = vcmp.gt.f32.partialorder %v690_v30, 0.0  ;;  %v1650_v42 = vpop.f32.mrb[8].mxu1  ;;  %v577_v43 = vpop.f32.mrb[9].mxu0 }
  0xf7   : > { %v1547_v39 = vpack.c.bf16 %v966_v34, %v966_v34  ;;  %v1513_v40 = vpack.c.bf16 %v932_v35, %v932_v35  ;;  %v900_v41 = vmul.f32 0.2, %v690_v30  ;;  %vm807_vm0 = vcmp.gt.f32.partialorder %v573_v31, 0.0  ;;  %v705_v48 = vpop.f32.mrb[9].mxu1  ;;  %v1619_v49 = vpop.f32.mrb[10].mxu0 }
  0xf8   : > { %v871_v44 = vmul.f32 0.2, %v573_v31  ;;  %vm839_vm1 = vcmp.gt.f32.partialorder %v701_v32, 0.0  ;;  %v903_v45 = vmul.f32 0.2, %v701_v32  ;;  %vm805_vm2 = vcmp.gt.f32.partialorder %v565_v33, 0.0 }
  0xf9   : > { %1287 = vst.msk [vmem:[%s1844_s25 + $0x98] sm:$0xf] %vm1248_vm3, %v1547_v39  ;;  %1253 = vst.msk [vmem:[%s1844_s25 + $0x10] sm:$0xf] %vm1248_vm3, %v1513_v40  ;;  %v964_v46 = vsel %vm836_vm15, %v690_v30, %v900_v41  ;;  %v869_v47 = vmul.f32 0.2, %v565_v33  ;;  %v586_v59 = vadd.f32 %v1618_v38, %v1832_v37  ;;  %v714_v63 = vadd.f32 %v1650_v42, %v1832_v37 }
  0xfa   : > { %vm837_vm4 = vcmp.gt.f32.partialorder %v693_v36, 0.0  ;;  %v1545_v50 = vpack.c.bf16 %v964_v46, %v964_v46  ;;  %v935_v51 = vsel %vm807_vm0, %v573_v31, %v871_v44  ;;  %v967_v52 = vsel %vm839_vm1, %v701_v32, %v903_v45  ;;  %v1651_v54 = vpop.f32.mrb[10].mxu1  ;;  %v580_v55 = vpop.f32.mrb[11].mxu0 }
  0xfb   : > { %v901_v53 = vmul.f32 0.2, %v693_v36  ;;  %v1516_v56 = vpack.c.bf16 %v935_v51, %v935_v51  ;;  %v1548_v57 = vpack.c.bf16 %v967_v52, %v967_v52  ;;  %v933_v58 = vsel %vm805_vm2, %v565_v33, %v869_v47  ;;  %v708_v60 = vpop.f32.mrb[11].mxu1 }
  0xfc   : > { %1285 = vst.msk [vmem:[%s1844_s25 + $0x90] sm:$0xf] %vm1248_vm3, %v1545_v50  ;;  %v1514_v61 = vpack.c.bf16 %v933_v58, %v933_v58  ;;  %v578_v0 = vadd.f32 %v1832_v37, %v577_v43  ;;  %vm810_vm5 = vcmp.gt.f32.partialorder %v586_v59, 0.0  ;;  %v874_v2 = vmul.f32 0.2, %v586_v59 }
  0xfd   : > { %v965_v62 = vsel %vm837_vm4, %v693_v36, %v901_v53  ;;  %1256 = vst.msk [vmem:[%s1844_s25 + $0x1c] sm:$0xf] %vm1248_vm3, %v1516_v56  ;;  %1288 = vst.msk [vmem:[%s1844_s25 + $0x9c] sm:$0xf] %vm1248_vm3, %v1548_v57  ;;  %v706_v3 = vadd.f32 %v1832_v37, %v705_v48  ;;  %vm842_vm6 = vcmp.gt.f32.partialorder %v714_v63, 0.0  ;;  %v589_v8 = vadd.f32 %v1619_v49, %v1832_v37  ;;  %v1622_v9 = vpop.f32.mrb[12].mxu0 }
  0xfe   : > { %v1546_v1 = vpack.c.bf16 %v965_v62, %v965_v62  ;;  %1254 = vst.msk [vmem:[%s1844_s25 + $0x14] sm:$0xf] %vm1248_vm3, %v1514_v61  ;;  %v906_v4 = vmul.f32 0.2, %v714_v63  ;;  %vm808_vm7 = vcmp.gt.f32.partialorder %v578_v0, 0.0  ;;  %v938_v6 = vsel %vm810_vm5, %v586_v59, %v874_v2  ;;  %v1654_v10 = vpop.f32.mrb[12].mxu1 }
  0xff   : > { %v872_v5 = vmul.f32 0.2, %v578_v0  ;;  %vm840_vm8 = vcmp.gt.f32.partialorder %v706_v3, 0.0  ;;  %v904_v7 = vmul.f32 0.2, %v706_v3  ;;  %v1519_v11 = vpack.c.bf16 %v938_v6, %v938_v6  ;;  %v593_v15 = vpop.f32.mrb[13].mxu0 }
 0x100   : > { %1286 = vst.msk [vmem:[%s1844_s25 + $0x94] sm:$0xf] %vm1248_vm3, %v1546_v1  ;;  %v970_v12 = vsel %vm842_vm6, %v714_v63, %v906_v4  ;;  %v717_v14 = vadd.f32 %v1651_v54, %v1832_v37  ;;  %v721_v16 = vpop.f32.mrb[13].mxu1  ;;  %vm811_vm9 = vcmp.gt.f32.partialorder %v589_v8, 0.0  ;;  %v1623_v20 = vpop.f32.mrb[14].mxu0  ;;  %v581_v26 = vadd.f32 %v1832_v37, %v580_v55 }
 0x101   : > { %v936_v13 = vsel %vm808_vm7, %v578_v0, %v872_v5  ;;  %v1551_v17 = vpack.c.bf16 %v970_v12, %v970_v12  ;;  %v968_v19 = vsel %vm840_vm8, %v706_v3, %v904_v7  ;;  %v1655_v21 = vpop.f32.mrb[14].mxu1  ;;  %1259 = vst.msk [vmem:[%s1844_s25 + $0x28] sm:$0xf] %vm1248_vm3, %v1519_v11  ;;  %v875_v23 = vmul.f32 0.2, %v589_v8  ;;  %v596_v25 = vpop.f32.mrb[15].mxu0 }
 0x102   : > { %v1517_v18 = vpack.c.bf16 %v936_v13, %v936_v13  ;;  %v1549_v22 = vpack.c.bf16 %v968_v19, %v968_v19  ;;  %vm843_vm10 = vcmp.gt.f32.partialorder %v717_v14, 0.0  ;;  %v907_v24 = vmul.f32 0.2, %v717_v14  ;;  %v724_v30 = vpop.f32.mrb[15].mxu1 }
 0x103   : > { %1291 = vst.msk [vmem:[%s1844_s25 + $0xa8] sm:$0xf] %vm1248_vm3, %v1551_v17  ;;  %v709_v27 = vadd.f32 %v1832_v37, %v708_v60  ;;  %v602_v28 = vadd.f32 %v1622_v9, %v1832_v37  ;;  %v730_v29 = vadd.f32 %v1654_v10, %v1832_v37  ;;  %v939_v31 = vsel %vm811_vm9, %v589_v8, %v875_v23 }
 0x104   : > { %1257 = vst.msk [vmem:[%s1844_s25 + $0x20] sm:$0xf] %vm1248_vm3, %v1517_v18  ;;  %1289 = vst.msk [vmem:[%s1844_s25 + $0xa0] sm:$0xf] %vm1248_vm3, %v1549_v22  ;;  %v971_v32 = vsel %vm843_vm10, %v717_v14, %v907_v24  ;;  %v594_v33 = vadd.f32 %v1832_v37, %v593_v15  ;;  %v722_v34 = vadd.f32 %v1832_v37, %v721_v16  ;;  %vm809_vm11 = vcmp.gt.f32.partialorder %v581_v26, 0.0 }
 0x105   : > { %v1520_v35 = vpack.c.bf16 %v939_v31, %v939_v31  ;;  %v1552_v36 = vpack.c.bf16 %v971_v32, %v971_v32  ;;  %v873_v38 = vmul.f32 0.2, %v581_v26  ;;  %vm841_vm12 = vcmp.gt.f32.partialorder %v709_v27, 0.0  ;;  %v1626_v43 = vpop.f32.mrb[16].mxu0 }
 0x106   : > { %v905_v39 = vmul.f32 0.2, %v709_v27  ;;  %vm814_vm13 = vcmp.gt.f32.partialorder %v602_v28, 0.0  ;;  %v878_v40 = vmul.f32 0.2, %v602_v28  ;;  %vm846_vm14 = vcmp.gt.f32.partialorder %v730_v29, 0.0 }
 0x107   : > { %1260 = vst.msk [vmem:[%s1844_s25 + $0x2c] sm:$0xf] %vm1248_vm3, %v1520_v35  ;;  %1292 = vst.msk [vmem:[%s1844_s25 + $0xac] sm:$0xf] %vm1248_vm3, %v1552_v36  ;;  %v937_v41 = vsel %vm809_vm11, %v581_v26, %v873_v38  ;;  %v910_v42 = vmul.f32 0.2, %v730_v29  ;;  %v605_v59 = vadd.f32 %v1623_v20, %v1832_v37  ;;  %v733_v63 = vadd.f32 %v1655_v21, %v1832_v37 }
 0x108   : > { %vm812_vm15 = vcmp.gt.f32.partialorder %v594_v33, 0.0  ;;  %v1658_v44 = vpop.f32.mrb[16].mxu1  ;;  %v1518_v45 = vpack.c.bf16 %v937_v41, %v937_v41  ;;  %v969_v46 = vsel %vm841_vm12, %v709_v27, %v905_v39  ;;  %v942_v47 = vsel %vm814_vm13, %v602_v28, %v878_v40  ;;  %v609_v49 = vpop.f32.mrb[17].mxu0 }
 0x109   : > { %v876_v48 = vmul.f32 0.2, %v594_v33  ;;  %v737_v50 = vpop.f32.mrb[17].mxu1  ;;  %v1550_v51 = vpack.c.bf16 %v969_v46, %v969_v46  ;;  %v1523_v52 = vpack.c.bf16 %v942_v47, %v942_v47  ;;  %v974_v53 = vsel %vm846_vm14, %v730_v29, %v910_v42  ;;  %v1627_v54 = vpop.f32.mrb[18].mxu0 }
 0x10a   : > { %vm844_vm0 = vcmp.gt.f32.partialorder %v722_v34, 0.0  ;;  %v1659_v55 = vpop.f32.mrb[18].mxu1  ;;  %1258 = vst.msk [vmem:[%s1844_s25 + $0x24] sm:$0xf] %vm1248_vm3, %v1518_v45  ;;  %v1555_v56 = vpack.c.bf16 %v974_v53, %v974_v53  ;;  %v908_v58 = vmul.f32 0.2, %v722_v34  ;;  %v597_v0 = vadd.f32 %v1832_v37, %v596_v25 }
 0x10b   : > { %v940_v57 = vsel %vm812_vm15, %v594_v33, %v876_v48  ;;  %v612_v60 = vpop.f32.mrb[19].mxu0  ;;  %v1919_v61 = vpop.f32.mrb[19].mxu1  ;;  %1290 = vst.msk [vmem:[%s1844_s25 + $0xa4] sm:$0xf] %vm1248_vm3, %v1550_v51  ;;  %1263 = vst.msk [vmem:[%s1844_s25 + $0x38] sm:$0xf] %vm1248_vm3, %v1523_v52  ;;  %v725_v1 = vadd.f32 %v1832_v37, %v724_v30  ;;  %v618_v4 = vadd.f32 %v1626_v43, %v1832_v37 }
 0x10c   : > { %v1521_v62 = vpack.c.bf16 %v940_v57, %v940_v57  ;;  %1295 = vst.msk [vmem:[%s1844_s25 + $0xb8] sm:$0xf] %vm1248_vm3, %v1555_v56  ;;  %v972_v2 = vsel %vm844_vm0, %v722_v34, %v908_v58  ;;  %vm815_vm1 = vcmp.gt.f32.partialorder %v605_v59, 0.0  ;;  %v879_v3 = vmul.f32 0.2, %v605_v59 }
 0x10d   : > { %v1553_v5 = vpack.c.bf16 %v972_v2, %v972_v2  ;;  %vm847_vm2 = vcmp.gt.f32.partialorder %v733_v63, 0.0  ;;  %v911_v6 = vmul.f32 0.2, %v733_v63  ;;  %vm813_vm4 = vcmp.gt.f32.partialorder %v597_v0, 0.0  ;;  %v1630_v10 = vpop.f32.mrb[20].mxu0 }
 0x10e   : > { %1261 = vst.msk [vmem:[%s1844_s25 + $0x30] sm:$0xf] %vm1248_vm3, %v1521_v62  ;;  %v943_v7 = vsel %vm815_vm1, %v605_v59, %v879_v3  ;;  %v877_v8 = vmul.f32 0.2, %v597_v0  ;;  %vm845_vm5 = vcmp.gt.f32.partialorder %v725_v1, 0.0  ;;  %vm818_vm6 = vcmp.gt.f32.partialorder %v618_v4, 0.0 }
 0x10f   : > { %v909_v9 = vmul.f32 0.2, %v725_v1  ;;  %1293 = vst.msk [vmem:[%s1844_s25 + $0xb0] sm:$0xf] %vm1248_vm3, %v1553_v5  ;;  %v1524_v11 = vpack.c.bf16 %v943_v7, %v943_v7  ;;  %v975_v12 = vsel %vm847_vm2, %v733_v63, %v911_v6  ;;  %v882_v13 = vmul.f32 0.2, %v618_v4 }
 0x110   : > { %v1662_v14 = vpop.f32.mrb[20].mxu1  ;;  %v625_v15 = vpop.f32.mrb[21].mxu0  ;;  %v1556_v16 = vpack.c.bf16 %v975_v12, %v975_v12  ;;  %v941_v17 = vsel %vm813_vm4, %v597_v0, %v877_v8  ;;  %v746_v19 = vadd.f32 %v1658_v44, %v1832_v37  ;;  %v610_v25 = vadd.f32 %v1832_v37, %v609_v49 }
 0x111   : > { %v973_v18 = vsel %vm845_vm5, %v725_v1, %v909_v9  ;;  %v1937_v20 = vpop.f32.mrb[21].mxu1  ;;  %v1939_v21 = vpop.f32.mrb[22].mxu0  ;;  %1264 = vst.msk [vmem:[%s1844_s25 + $0x3c] sm:$0xf] %vm1248_vm3, %v1524_v11  ;;  %v1522_v22 = vpack.c.bf16 %v941_v17, %v941_v17  ;;  %v946_v24 = vsel %vm818_vm6, %v618_v4, %v882_v13  ;;  %v738_v30 = vadd.f32 %v1832_v37, %v737_v50 }
 0x112   : > { %v1554_v23 = vpack.c.bf16 %v973_v18, %v973_v18  ;;  %v1944_v26 = vpop.f32.mrb[22].mxu1  ;;  %v1946_v27 = vpop.f32.mrb[23].mxu0  ;;  %1296 = vst.msk [vmem:[%s1844_s25 + $0xbc] sm:$0xf] %vm1248_vm3, %v1556_v16  ;;  %v1527_v28 = vpack.c.bf16 %v946_v24, %v946_v24  ;;  %vm850_vm7 = vcmp.gt.f32.partialorder %v746_v19, 0.0  ;;  %vm816_vm8 = vcmp.gt.f32.partialorder %v610_v25, 0.0 }
 0x113   : > { %v914_v29 = vmul.f32 0.2, %v746_v19  ;;  %v1951_v31 = vpop.f32.mrb[23].mxu1  ;;  %1262 = vst.msk [vmem:[%s1844_s25 + $0x34] sm:$0xf] %vm1248_vm3, %v1522_v22  ;;  %v621_v33 = vadd.f32 %v1627_v54, %v1832_v37  ;;  %v749_v34 = vadd.f32 %v1659_v55, %v1832_v37  ;;  %vm848_vm9 = vcmp.gt.f32.partialorder %v738_v30, 0.0 }
 0x114   : > { %1294 = vst.msk [vmem:[%s1844_s25 + $0xb4] sm:$0xf] %vm1248_vm3, %v1554_v23  ;;  %v880_v32 = vmul.f32 0.2, %v610_v25  ;;  %1267 = vst.msk [vmem:[%s1844_s25 + $0x48] sm:$0xf] %vm1248_vm3, %v1527_v28  ;;  %v613_v38 = vadd.f32 %v1832_v37, %v612_v60  ;;  %v741_v53 = vadd.f32 %v1832_v37, %v1919_v61  ;;  %v634_v54 = vadd.f32 %v1630_v10, %v1832_v37 }
 0x115   : > { %v978_v35 = vsel %vm850_vm7, %v746_v19, %v914_v29  ;;  %v912_v36 = vmul.f32 0.2, %v738_v30  ;;  %vm819_vm10 = vcmp.gt.f32.partialorder %v621_v33, 0.0  ;;  %v883_v41 = vmul.f32 0.2, %v621_v33  ;;  %v1962_v45 = vpop.f32.mrb[24].mxu0 }
 0x116   : > { %v1559_v39 = vpack.c.bf16 %v978_v35, %v978_v35  ;;  %v944_v40 = vsel %vm816_vm8, %v610_v25, %v880_v32  ;;  %vm851_vm11 = vcmp.gt.f32.partialorder %v749_v34, 0.0  ;;  %v915_v44 = vmul.f32 0.2, %v749_v34  ;;  %v1666_v49 = vpop.f32.mrb[24].mxu1  ;;  %v1966_v50 = vpop.f32.mrb[25].mxu0 }
 0x117   : > { %v1525_v42 = vpack.c.bf16 %v944_v40, %v944_v40  ;;  %v976_v43 = vsel %vm848_vm9, %v738_v30, %v912_v36  ;;  %v947_v47 = vsel %vm819_vm10, %v621_v33, %v883_v41  ;;  %vm817_vm12 = vcmp.gt.f32.partialorder %v613_v38, 0.0  ;;  %v1973_v55 = vpop.f32.mrb[25].mxu1  ;;  %v1975_v56 = vpop.f32.mrb[26].mxu0 }
 0x118   : > { %1299 = vst.msk [vmem:[%s1844_s25 + $0xc8] sm:$0xf] %vm1248_vm3, %v1559_v39  ;;  %v1557_v46 = vpack.c.bf16 %v976_v43, %v976_v43  ;;  %v881_v48 = vmul.f32 0.2, %v613_v38  ;;  %v1528_v51 = vpack.c.bf16 %v947_v47, %v947_v47  ;;  %v979_v52 = vsel %vm851_vm11, %v749_v34, %v915_v44  ;;  %v1981_v62 = vpop.f32.mrb[26].mxu1  ;;  %v1983_v63 = vpop.f32.mrb[27].mxu0 }
 0x119   : > { %1265 = vst.msk [vmem:[%s1844_s25 + $0x40] sm:$0xf] %vm1248_vm3, %v1525_v42  ;;  %v1560_v57 = vpack.c.bf16 %v979_v52, %v979_v52  ;;  %v762_v59 = vadd.f32 %v1662_v14, %v1832_v37  ;;  %v626_v60 = vadd.f32 %v1832_v37, %v625_v15  ;;  %vm849_vm13 = vcmp.gt.f32.partialorder %v741_v53, 0.0  ;;  %v1987_v1 = vpop.f32.mrb[27].mxu1 }
 0x11a   : > { %1297 = vst.msk [vmem:[%s1844_s25 + $0xc0] sm:$0xf] %vm1248_vm3, %v1557_v46  ;;  %v945_v58 = vsel %vm817_vm12, %v613_v38, %v881_v48  ;;  %1268 = vst.msk [vmem:[%s1844_s25 + $0x4c] sm:$0xf] %vm1248_vm3, %v1528_v51  ;;  %v913_v0 = vmul.f32 0.2, %v741_v53  ;;  %v754_v6 = vadd.f32 %v1832_v37, %v1937_v20  ;;  %v637_v7 = vadd.f32 %v1939_v21, %v1832_v37 }
 0x11b   : > { %v1526_v61 = vpack.c.bf16 %v945_v58, %v945_v58  ;;  %vm822_vm14 = vcmp.gt.f32.partialorder %v634_v54, 0.0  ;;  %1300 = vst.msk [vmem:[%s1844_s25 + $0xcc] sm:$0xf] %vm1248_vm3, %v1560_v57  ;;  %v886_v2 = vmul.f32 0.2, %v634_v54  ;;  %vm854_vm15 = vcmp.gt.f32.partialorder %v762_v59, 0.0 }
 0x11c   : > { %v918_v3 = vmul.f32 0.2, %v762_v59  ;;  %vm820_vm0 = vcmp.gt.f32.partialorder %v626_v60, 0.0  ;;  %v977_v4 = vsel %vm849_vm13, %v741_v53, %v913_v0  ;;  %v884_v5 = vmul.f32 0.2, %v626_v60 }
 0x11d   : > { %1266 = vst.msk [vmem:[%s1844_s25 + $0x44] sm:$0xf] %vm1248_vm3, %v1526_v61  ;;  %v1558_v8 = vpack.c.bf16 %v977_v4, %v977_v4  ;;  %v950_v9 = vsel %vm822_vm14, %v634_v54, %v886_v2  ;;  %v765_v11 = vadd.f32 %v1944_v26, %v1832_v37  ;;  %vm852_vm1 = vcmp.gt.f32.partialorder %v754_v6, 0.0  ;;  %v1638_v15 = vpop.f32.mrb[28].mxu0 }
 0x11e   : > { %v982_v10 = vsel %vm854_vm15, %v762_v59, %v918_v3  ;;  %v1531_v12 = vpack.c.bf16 %v950_v9, %v950_v9  ;;  %v948_v14 = vsel %vm820_vm0, %v626_v60, %v884_v5  ;;  %v916_v17 = vmul.f32 0.2, %v754_v6  ;;  %v2001_v19 = vpop.f32.mrb[28].mxu1  ;;  %v2011_v23 = vpop.f32.mrb[29].mxu0 }
 0x11f   : > { %v1563_v13 = vpack.c.bf16 %v982_v10, %v982_v10  ;;  %1298 = vst.msk [vmem:[%s1844_s25 + $0xc4] sm:$0xf] %vm1248_vm3, %v1558_v8  ;;  %v1529_v16 = vpack.c.bf16 %v948_v14, %v948_v14  ;;  %vm823_vm2 = vcmp.gt.f32.partialorder %v637_v7, 0.0  ;;  %v887_v18 = vmul.f32 0.2, %v637_v7  ;;  %v2013_v24 = vpop.f32.mrb[29].mxu1 }
 0x120   : > { %1271 = vst.msk [vmem:[%s1844_s25 + $0x58] sm:$0xf] %vm1248_vm3, %v1531_v12  ;;  %vm855_vm4 = vcmp.gt.f32.partialorder %v765_v11, 0.0  ;;  %v919_v20 = vmul.f32 0.2, %v765_v11  ;;  %v629_v21 = vadd.f32 %v1832_v37, %v1946_v27  ;;  %v757_v22 = vadd.f32 %v1832_v37, %v1951_v31  ;;  %v2021_v27 = vpop.f32.mrb[30].mxu0 }
 0x121   : > { %1303 = vst.msk [vmem:[%s1844_s25 + $0xd8] sm:$0xf] %vm1248_vm3, %v1563_v13  ;;  %1269 = vst.msk [vmem:[%s1844_s25 + $0x50] sm:$0xf] %vm1248_vm3, %v1529_v16  ;;  %v980_v25 = vsel %vm852_vm1, %v754_v6, %v916_v17  ;;  %v951_v26 = vsel %vm823_vm2, %v637_v7, %v887_v18  ;;  %v650_v28 = vadd.f32 %v1962_v45, %v1832_v37  ;;  %v2023_v30 = vpop.f32.mrb[30].mxu1  ;;  %v2025_v34 = vpop.f32.mrb[31].mxu0 }
 0x122   : > { %v778_v29 = vadd.f32 %v1666_v49, %v1832_v37  ;;  %v1561_v31 = vpack.c.bf16 %v980_v25, %v980_v25  ;;  %v1532_v32 = vpack.c.bf16 %v951_v26, %v951_v26  ;;  %v983_v33 = vsel %vm855_vm4, %v765_v11, %v919_v20  ;;  %v2027_v35 = vpop.f32.mrb[31].mxu1 }
 0x123   : > { %vm821_vm5 = vcmp.gt.f32.partialorder %v629_v21, 0.0  ;;  %v1564_v36 = vpack.c.bf16 %v983_v33, %v983_v33  ;;  %v885_v38 = vmul.f32 0.2, %v629_v21  ;;  %vm853_vm6 = vcmp.gt.f32.partialorder %v757_v22, 0.0 }
 0x124   : > { %v917_v39 = vmul.f32 0.2, %v757_v22  ;;  %1301 = vst.msk [vmem:[%s1844_s25 + $0xd0] sm:$0xf] %vm1248_vm3, %v1561_v31  ;;  %1272 = vst.msk [vmem:[%s1844_s25 + $0x5c] sm:$0xf] %vm1248_vm3, %v1532_v32  ;;  %v642_v44 = vadd.f32 %v1832_v37, %v1966_v50  ;;  %v770_v45 = vadd.f32 %v1832_v37, %v1973_v55  ;;  %v653_v50 = vadd.f32 %v1975_v56, %v1832_v37 }
 0x125   : > { %vm826_vm7 = vcmp.gt.f32.partialorder %v650_v28, 0.0  ;;  %v890_v40 = vmul.f32 0.2, %v650_v28  ;;  %vm858_vm8 = vcmp.gt.f32.partialorder %v778_v29, 0.0  ;;  %v922_v41 = vmul.f32 0.2, %v778_v29 }
 0x126   : > { %1304 = vst.msk [vmem:[%s1844_s25 + $0xdc] sm:$0xf] %vm1248_vm3, %v1564_v36  ;;  %v949_v42 = vsel %vm821_vm5, %v629_v21, %v885_v38  ;;  %v981_v43 = vsel %vm853_vm6, %v757_v22, %v917_v39  ;;  %vm824_vm9 = vcmp.gt.f32.partialorder %v642_v44, 0.0  ;;  %v888_v53 = vmul.f32 0.2, %v642_v44 }
 0x127   : > { %v1530_v46 = vpack.c.bf16 %v949_v42, %v949_v42  ;;  %v1562_v47 = vpack.c.bf16 %v981_v43, %v981_v43  ;;  %v954_v48 = vsel %vm826_vm7, %v650_v28, %v890_v40  ;;  %v986_v49 = vsel %vm858_vm8, %v778_v29, %v922_v41 }
 0x128   : > { %v1535_v51 = vpack.c.bf16 %v954_v48, %v954_v48  ;;  %v1567_v52 = vpack.c.bf16 %v986_v49, %v986_v49  ;;  %vm856_vm10 = vcmp.gt.f32.partialorder %v770_v45, 0.0  ;;  %v920_v54 = vmul.f32 0.2, %v770_v45 }
 0x129   : > { %1270 = vst.msk [vmem:[%s1844_s25 + $0x54] sm:$0xf] %vm1248_vm3, %v1530_v46  ;;  %1302 = vst.msk [vmem:[%s1844_s25 + $0xd4] sm:$0xf] %vm1248_vm3, %v1562_v47  ;;  %v781_v55 = vadd.f32 %v1981_v62, %v1832_v37  ;;  %v952_v57 = vsel %vm824_vm9, %v642_v44, %v888_v53  ;;  %v645_v58 = vadd.f32 %v1832_v37, %v1983_v63  ;;  %vm827_vm11 = vcmp.gt.f32.partialorder %v653_v50, 0.0 }
 0x12a   : > { %1275 = vst.msk [vmem:[%s1844_s25 + $0x68] sm:$0xf] %vm1248_vm3, %v1535_v51  ;;  %1307 = vst.msk [vmem:[%s1844_s25 + $0xe8] sm:$0xf] %vm1248_vm3, %v1567_v52  ;;  %v773_v59 = vadd.f32 %v1832_v37, %v1987_v1  ;;  %v666_v60 = vadd.f32 %v1638_v15, %v1832_v37  ;;  %v1533_v61 = vpack.c.bf16 %v952_v57, %v952_v57  ;;  %v891_v0 = vmul.f32 0.2, %v653_v50 }
 0x12b   : > { %v984_v56 = vsel %vm856_vm10, %v770_v45, %v920_v54  ;;  %vm859_vm12 = vcmp.gt.f32.partialorder %v781_v55, 0.0  ;;  %v923_v62 = vmul.f32 0.2, %v781_v55  ;;  %vm825_vm13 = vcmp.gt.f32.partialorder %v645_v58, 0.0 }
 0x12c   : > { %v1565_v2 = vpack.c.bf16 %v984_v56, %v984_v56  ;;  %1273 = vst.msk [vmem:[%s1844_s25 + $0x60] sm:$0xf] %vm1248_vm3, %v1533_v61  ;;  %v955_v3 = vsel %vm827_vm11, %v653_v50, %v891_v0  ;;  %v889_v4 = vmul.f32 0.2, %v645_v58  ;;  %vm857_vm14 = vcmp.gt.f32.partialorder %v773_v59, 0.0 }
 0x12d   : > { %v921_v63 = vmul.f32 0.2, %v773_v59  ;;  %v1536_v1 = vpack.c.bf16 %v955_v3, %v955_v3  ;;  %v987_v5 = vsel %vm859_vm12, %v781_v55, %v923_v62  ;;  %vm830_vm15 = vcmp.gt.f32.partialorder %v666_v60, 0.0 }
 0x12e   : > { %1305 = vst.msk [vmem:[%s1844_s25 + $0xe0] sm:$0xf] %vm1248_vm3, %v1565_v2  ;;  %v894_v6 = vmul.f32 0.2, %v666_v60  ;;  %v1568_v7 = vpack.c.bf16 %v987_v5, %v987_v5  ;;  %v953_v8 = vsel %vm825_vm13, %v645_v58, %v889_v4  ;;  %v794_v10 = vadd.f32 %v2001_v19, %v1832_v37 }
 0x12f   : > { %v985_v9 = vsel %vm857_vm14, %v773_v59, %v921_v63  ;;  %1276 = vst.msk [vmem:[%s1844_s25 + $0x6c] sm:$0xf] %vm1248_vm3, %v1536_v1  ;;  %v1534_v11 = vpack.c.bf16 %v953_v8, %v953_v8  ;;  %v658_v14 = vadd.f32 %v1832_v37, %v2011_v23  ;;  %v786_v17 = vadd.f32 %v1832_v37, %v2013_v24 }
 0x130   : > { %v1566_v12 = vpack.c.bf16 %v985_v9, %v985_v9  ;;  %v958_v13 = vsel %vm830_vm15, %v666_v60, %v894_v6  ;;  %1308 = vst.msk [vmem:[%s1844_s25 + $0xec] sm:$0xf] %vm1248_vm3, %v1568_v7  ;;  %vm862_vm0 = vcmp.gt.f32.partialorder %v794_v10, 0.0  ;;  %v926_v16 = vmul.f32 0.2, %v794_v10 }
 0x131   : > { %v1539_v15 = vpack.c.bf16 %v958_v13, %v958_v13  ;;  %1274 = vst.msk [vmem:[%s1844_s25 + $0x64] sm:$0xf] %vm1248_vm3, %v1534_v11  ;;  %vm828_vm1 = vcmp.gt.f32.partialorder %v658_v14, 0.0  ;;  %v892_v18 = vmul.f32 0.2, %v658_v14  ;;  %v669_v19 = vadd.f32 %v2021_v27, %v1832_v37 }
 0x132   : > { %1306 = vst.msk [vmem:[%s1844_s25 + $0xe4] sm:$0xf] %vm1248_vm3, %v1566_v12  ;;  %v797_v20 = vadd.f32 %v2023_v30, %v1832_v37  ;;  %v990_v21 = vsel %vm862_vm0, %v794_v10, %v926_v16  ;;  %vm860_vm2 = vcmp.gt.f32.partialorder %v786_v17, 0.0  ;;  %v924_v22 = vmul.f32 0.2, %v786_v17 }
 0x133   : > { %1279 = vst.msk [vmem:[%s1844_s25 + $0x78] sm:$0xf] %vm1248_vm3, %v1539_v15  ;;  %v661_v23 = vadd.f32 %v1832_v37, %v2025_v34  ;;  %v1571_v24 = vpack.c.bf16 %v990_v21, %v990_v21  ;;  %v956_v25 = vsel %vm828_vm1, %v658_v14, %v892_v18  ;;  %vm831_vm4 = vcmp.gt.f32.partialorder %v669_v19, 0.0 }
 0x134   : > { %v895_v26 = vmul.f32 0.2, %v669_v19  ;;  %v1537_v28 = vpack.c.bf16 %v956_v25, %v956_v25  ;;  %v988_v29 = vsel %vm860_vm2, %v786_v17, %v924_v22  ;;  %vm863_vm5 = vcmp.gt.f32.partialorder %v797_v20, 0.0 }
 0x135   : > { %v927_v27 = vmul.f32 0.2, %v797_v20  ;;  %1311 = vst.msk [vmem:[%s1844_s25 + $0xf8] sm:$0xf] %vm1248_vm3, %v1571_v24  ;;  %v1569_v30 = vpack.c.bf16 %v988_v29, %v988_v29  ;;  %vm829_vm6 = vcmp.gt.f32.partialorder %v661_v23, 0.0  ;;  %v789_v36 = vadd.f32 %v1832_v37, %v2027_v35 }
 0x136   : > { %v959_v31 = vsel %vm831_vm4, %v669_v19, %v895_v26  ;;  %v893_v32 = vmul.f32 0.2, %v661_v23  ;;  %1277 = vst.msk [vmem:[%s1844_s25 + $0x70] sm:$0xf] %vm1248_vm3, %v1537_v28 }
 0x137   : > { %v1540_v33 = vpack.c.bf16 %v959_v31, %v959_v31  ;;  %v991_v34 = vsel %vm863_vm5, %v797_v20, %v927_v27  ;;  %1309 = vst.msk [vmem:[%s1844_s25 + $0xf0] sm:$0xf] %vm1248_vm3, %v1569_v30  ;;  %vm861_vm7 = vcmp.gt.f32.partialorder %v789_v36, 0.0  ;;  %v925_v41 = vmul.f32 0.2, %v789_v36 }
 0x138   : > { %v1572_v38 = vpack.c.bf16 %v991_v34, %v991_v34  ;;  %v957_v39 = vsel %vm829_vm6, %v661_v23, %v893_v32 }
 0x139   : > { %1280 = vst.msk [vmem:[%s1844_s25 + $0x7c] sm:$0xf] %vm1248_vm3, %v1540_v33  ;;  %v1538_v40 = vpack.c.bf16 %v957_v39, %v957_v39  ;;  %v989_v42 = vsel %vm861_vm7, %v789_v36, %v925_v41 }
 0x13a   : > { %1312 = vst.msk [vmem:[%s1844_s25 + $0xfc] sm:$0xf] %vm1248_vm3, %v1572_v38  ;;  %v1570_v43 = vpack.c.bf16 %v989_v42, %v989_v42 }
 0x13b   : > { %1278 = vst.msk [vmem:[%s1844_s25 + $0x74] sm:$0xf] %vm1248_vm3, %v1538_v40 }
 0x13c   : > { %1310 = vst.msk [vmem:[%s1844_s25 + $0xf4] sm:$0xf] %vm1248_vm3, %v1570_v43 }
 0x13d PF: > { %s13_s12 = sadd.s32 1, %s1721_s12  }
 0x13e   : > { %p10_p4 = scmp.ge.s32.totalorder %s13_s12, 18  }
 0x140   :  { %12 = sbr.rel (!%p10_p4) target bundleno = 1 (0x1), region = 62 }

// kernel: forward.7
= control target key start
LH: loop header
LB: loop body
LE: loop exit
PB: predicated region body
PF: predicated region fallthrough
CT: control target
= control target key end

     0   :  { %s1959_s12 = smov 0   ;;  %s2325_s0 = inlined_call_operand.vmem [shape: bf16[2048,256], index: 0, kind: input, shape index: {}]   ;;  %s2326_s1 = inlined_call_operand.vmem [shape: bf16[256,32], index: 1, kind: input, shape index: {}]   ;;  %s2327_s2 = inlined_call_operand.vmem [shape: f32[1,32], index: 2, kind: input, shape index: {}]   ;;  %s2328_s3 = inlined_call_operand.vmem [shape: bf16[2048,32], index: 3, kind: output, shape index: {}]  }
   0x1 LB: > { %s1555_s13 = sadd.s32 4294967295, %s1936_s12   ;;  %p1559_p0 = scmp.ge.s32.totalorder %s1936_s12, 1  ;;  %s1936_s12 = sphi %s1959_s12, %s13_s12  }
   0x2   : > { %p139_p1 = scmp.lt.s32.totalorder %s1936_s12, 5 }
   0x4   : > { %p140_p2 = pnand %p1559_p0, %p139_p1 }
   0x5   : > { %v1818_v0 = vld [vmem:[%s2326_s1] sm:$0xff] (!%p140_p2)   ;;  %v1938_v1 = vmov (!%p140_p2), 0   ;;  %s1560_s16 = sshll.u32 (!%p140_p2), %s1555_s13, 6  ;;  %v1819_v2 = vld [vmem:[%s2326_s1 + $0x8] sm:$0xff] (!%p140_p2)   ;;  %v1820_v3 = vld [vmem:[%s2326_s1 + $0x10] sm:$0xff] (!%p140_p2)   ;;  %vm1434_vm2 = vcmask (!%p140_p2), 257024  }
   0x6   : > { %143 = sbr.rel (%p140_p2) target bundleno = 413 (0x19d), region = 32  ;;  %697 = vmatprep.subr.bf16.mxu0 (!%p140_p2), %v1938_v1  ;;  %1777 = vmatprep.subr.bf16.mxu1 (!%p140_p2), %v1938_v1  ;;  %p165_p3 = scmp.lt.s32.totalorder (!%p140_p2), %s1560_s16, 255  ;;  %v1821_v4 = vld [vmem:[%s2326_s1 + $0x18] sm:$0xff] (!%p140_p2)   ;;  %v1822_v5 = vld [vmem:[%s2326_s1 + $0x20] sm:$0xff] (!%p140_p2)   ;;  %v1823_v7 = vld [vmem:[%s2326_s1 + $0x28] sm:$0xff] (!%p140_p2)  }
   0x7   : > { %698 = vmatpush1.bf16.msra.mxu0 (!%p140_p2), %v1818_v0  ;;  %1793 = vmatpush1.bf16.msra.mxu1 (!%p140_p2), %v1818_v0  ;;  %v1824_v9 = vld [vmem:[%s2326_s1 + $0x30] sm:$0xff] (!%p140_p2)   ;;  %v1825_v10 = vld [vmem:[%s2326_s1 + $0x38] sm:$0xff] (!%p140_p2)   ;;  %v1826_v11 = vld [vmem:[%s2326_s1 + $0x40] sm:$0xff] (!%p140_p2)  }
   0x8   : > { %699 = vmatprep.subr.bf16.mxu0 (!%p140_p2), %v1938_v1  ;;  %1778 = vmatprep.subr.bf16.mxu1 (!%p140_p2), %v1938_v1  ;;  %v1827_v12 = vld [vmem:[%s2326_s1 + $0x48] sm:$0xff] (!%p140_p2)   ;;  %v1828_v13 = vld [vmem:[%s2326_s1 + $0x50] sm:$0xff] (!%p140_p2)   ;;  %v1829_v14 = vld [vmem:[%s2326_s1 + $0x58] sm:$0xff] (!%p140_p2)  }
   0x9   : > { %v1830_v15 = vld [vmem:[%s2326_s1 + $0x60] sm:$0xff] (!%p140_p2)   ;;  %v1831_v16 = vld [vmem:[%s2326_s1 + $0x68] sm:$0xff] (!%p140_p2)   ;;  %v1832_v17 = vld [vmem:[%s2326_s1 + $0x70] sm:$0xff] (!%p140_p2)  }
   0xa   : > { %v1833_v18 = vld [vmem:[%s2326_s1 + $0x78] sm:$0xff] (!%p140_p2)  }
   0xb   : > { %700 = vmatpush1.bf16.msra.mxu0 (!%p140_p2), %v1819_v2  ;;  %1794 = vmatpush1.bf16.msra.mxu1 (!%p140_p2), %v1819_v2 }
   0xc   : > { %701 = vmatprep.subr.bf16.mxu0 (!%p140_p2), %v1938_v1  ;;  %1779 = vmatprep.subr.bf16.mxu1 (!%p140_p2), %v1938_v1 }
   0xd   : > { %s2330_s16 = smov (!%p165_p3, %s1560_s16), 255 }
   0xe   : > { %s1712_s23 = sshll.u32 %s2330_s16, 3  ;;  %s1564_s29 = sshll.u32 %s2330_s16, 2 }
   0xf   : > { %702 = vmatpush1.bf16.msra.mxu0 %v1820_v3  ;;  %1795 = vmatpush1.bf16.msra.mxu1 %v1820_v3  ;;  %s1996_s28 = scalar_lea.vmem %s2325_s0, %s1712_s23  ;;  %s2132_s4 = scalar_lea.vmem %s2328_s3, %s1564_s29 }
  0x10   : > { %703 = vmatprep.subr.bf16.mxu0 %v1938_v1  ;;  %1780 = vmatprep.subr.bf16.mxu1 %v1938_v1  ;;  %v1836_v6 = vld [vmem:[%s1996_s28 + $0x4] ss:$8 sps:$4 sm:$0xff]   ;;  %v1834_v19 = vld [vmem:[%s1996_s28] ss:$8 sps:$4 sm:$0xff]   ;;  %v1840_v21 = vld [vmem:[%s1996_s28 + $0x14] ss:$8 sps:$4 sm:$0xff]  }
  0x11   : > { %v1839_v8 = vld [vmem:[%s1996_s28 + $0x104] ss:$8 sps:$4 sm:$0xff]   ;;  %729 = vmatprep.mubr.bf16.mxu0 %v1836_v6  ;;  %v1837_v20 = vld [vmem:[%s1996_s28 + $0x100] ss:$8 sps:$4 sm:$0xff]   ;;  %v1842_v22 = vld [vmem:[%s1996_s28 + $0x114] ss:$8 sps:$4 sm:$0xff]  }
  0x12   : > { %857 = vmatprep.mubr.bf16.mxu1 %v1839_v8  ;;  %v1844_v23 = vld [vmem:[%s1996_s28 + $0x10] ss:$8 sps:$4 sm:$0xff]   ;;  %v1846_v25 = vld [vmem:[%s1996_s28 + $0x24] ss:$8 sps:$4 sm:$0xff]   ;;  %v1850_v27 = vld [vmem:[%s1996_s28 + $0x20] ss:$8 sps:$4 sm:$0xff]  }
  0x13   : > { %704 = vmatpush1.bf16.msra.mxu0 %v1821_v4  ;;  %1796 = vmatpush1.bf16.msra.mxu1 %v1821_v4  ;;  %v1845_v24 = vld [vmem:[%s1996_s28 + $0x110] ss:$8 sps:$4 sm:$0xff]   ;;  %v1848_v26 = vld [vmem:[%s1996_s28 + $0x124] ss:$8 sps:$4 sm:$0xff]   ;;  %v1851_v28 = vld [vmem:[%s1996_s28 + $0x120] ss:$8 sps:$4 sm:$0xff]  }
  0x14   : > { %705 = vmatprep.subr.bf16.mxu0 %v1938_v1  ;;  %1781 = vmatprep.subr.bf16.mxu1 %v1938_v1  ;;  %v1852_v29 = vld [vmem:[%s1996_s28 + $0x34] ss:$8 sps:$4 sm:$0xff]   ;;  %v1856_v31 = vld [vmem:[%s1996_s28 + $0x30] ss:$8 sps:$4 sm:$0xff]   ;;  %v1858_v33 = vld [vmem:[%s1996_s28 + $0x44] ss:$8 sps:$4 sm:$0xff]  }
  0x15   : > { %v1854_v30 = vld [vmem:[%s1996_s28 + $0x134] ss:$8 sps:$4 sm:$0xff]   ;;  %v1857_v32 = vld [vmem:[%s1996_s28 + $0x130] ss:$8 sps:$4 sm:$0xff]   ;;  %v1860_v34 = vld [vmem:[%s1996_s28 + $0x144] ss:$8 sps:$4 sm:$0xff]  }
  0x16   : > { %v1862_v35 = vld [vmem:[%s1996_s28 + $0x40] ss:$8 sps:$4 sm:$0xff]   ;;  %v1864_v37 = vld [vmem:[%s1996_s28 + $0x54] ss:$8 sps:$4 sm:$0xff]   ;;  %v1868_v39 = vld [vmem:[%s1996_s28 + $0x50] ss:$8 sps:$4 sm:$0xff]  }
  0x17   : > { %706 = vmatpush1.bf16.msra.mxu0 %v1822_v5  ;;  %1797 = vmatpush1.bf16.msra.mxu1 %v1822_v5  ;;  %v1863_v36 = vld [vmem:[%s1996_s28 + $0x140] ss:$8 sps:$4 sm:$0xff]   ;;  %v1866_v38 = vld [vmem:[%s1996_s28 + $0x154] ss:$8 sps:$4 sm:$0xff]   ;;  %v1869_v40 = vld [vmem:[%s1996_s28 + $0x150] ss:$8 sps:$4 sm:$0xff]  }
  0x18   : > { %707 = vmatprep.subr.bf16.mxu0 %v1938_v1  ;;  %1782 = vmatprep.subr.bf16.mxu1 %v1938_v1  ;;  %v1870_v41 = vld [vmem:[%s1996_s28 + $0x64] ss:$8 sps:$4 sm:$0xff]   ;;  %v1874_v43 = vld [vmem:[%s1996_s28 + $0x60] ss:$8 sps:$4 sm:$0xff]   ;;  %v1876_v45 = vld [vmem:[%s1996_s28 + $0x74] ss:$8 sps:$4 sm:$0xff]  }
  0x19   : > { %v1872_v42 = vld [vmem:[%s1996_s28 + $0x164] ss:$8 sps:$4 sm:$0xff]   ;;  %v1875_v44 = vld [vmem:[%s1996_s28 + $0x160] ss:$8 sps:$4 sm:$0xff]   ;;  %v1878_v46 = vld [vmem:[%s1996_s28 + $0x174] ss:$8 sps:$4 sm:$0xff]  }
  0x1a   : > { %v1880_v47 = vld [vmem:[%s1996_s28 + $0x70] ss:$8 sps:$4 sm:$0xff]   ;;  %v1882_v49 = vld [vmem:[%s1996_s28 + $0x84] ss:$8 sps:$4 sm:$0xff]   ;;  %v1886_v51 = vld [vmem:[%s1996_s28 + $0x80] ss:$8 sps:$4 sm:$0xff]  }
  0x1b   : > { %708 = vmatpush1.bf16.msra.mxu0 %v1823_v7  ;;  %1798 = vmatpush1.bf16.msra.mxu1 %v1823_v7  ;;  %v1881_v48 = vld [vmem:[%s1996_s28 + $0x170] ss:$8 sps:$4 sm:$0xff]   ;;  %v1884_v50 = vld [vmem:[%s1996_s28 + $0x184] ss:$8 sps:$4 sm:$0xff]   ;;  %v1887_v52 = vld [vmem:[%s1996_s28 + $0x180] ss:$8 sps:$4 sm:$0xff]  }
  0x1c   : > { %709 = vmatprep.subr.bf16.mxu0 %v1938_v1  ;;  %1783 = vmatprep.subr.bf16.mxu1 %v1938_v1  ;;  %v1888_v53 = vld [vmem:[%s1996_s28 + $0x94] ss:$8 sps:$4 sm:$0xff]   ;;  %v1892_v55 = vld [vmem:[%s1996_s28 + $0x90] ss:$8 sps:$4 sm:$0xff]   ;;  %v1894_v57 = vld [vmem:[%s1996_s28 + $0xa4] ss:$8 sps:$4 sm:$0xff]  }
  0x1d   : > { %v1890_v54 = vld [vmem:[%s1996_s28 + $0x194] ss:$8 sps:$4 sm:$0xff]   ;;  %v1893_v56 = vld [vmem:[%s1996_s28 + $0x190] ss:$8 sps:$4 sm:$0xff]   ;;  %v1896_v58 = vld [vmem:[%s1996_s28 + $0x1a4] ss:$8 sps:$4 sm:$0xff]  }
  0x1e   : > { %v1898_v59 = vld [vmem:[%s1996_s28 + $0xa0] ss:$8 sps:$4 sm:$0xff]   ;;  %v1900_v61 = vld [vmem:[%s1996_s28 + $0xb4] ss:$8 sps:$4 sm:$0xff]   ;;  %v1904_v63 = vld [vmem:[%s1996_s28 + $0xb0] ss:$8 sps:$4 sm:$0xff]  }
  0x1f   : > { %710 = vmatpush1.bf16.msra.mxu0 %v1824_v9  ;;  %1799 = vmatpush1.bf16.msra.mxu1 %v1824_v9  ;;  %v1899_v60 = vld [vmem:[%s1996_s28 + $0x1a0] ss:$8 sps:$4 sm:$0xff]   ;;  %v1902_v62 = vld [vmem:[%s1996_s28 + $0x1b4] ss:$8 sps:$4 sm:$0xff]   ;;  %v1905_v0 = vld [vmem:[%s1996_s28 + $0x1b0] ss:$8 sps:$4 sm:$0xff]  }
  0x20   : > { %711 = vmatprep.subr.bf16.mxu0 %v1938_v1  ;;  %1784 = vmatprep.subr.bf16.mxu1 %v1938_v1  ;;  %v1908_v2 = vld [vmem:[%s1996_s28 + $0x1c4] ss:$8 sps:$4 sm:$0xff]   ;;  %v1910_v3 = vld [vmem:[%s1996_s28 + $0xc0] ss:$8 sps:$4 sm:$0xff]   ;;  %v1912_v5 = vld [vmem:[%s1996_s28 + $0xd4] ss:$8 sps:$4 sm:$0xff]  }
  0x21   : > { %v1911_v4 = vld [vmem:[%s1996_s28 + $0x1c0] ss:$8 sps:$4 sm:$0xff]   ;;  %v1914_v6 = vld [vmem:[%s1996_s28 + $0x1d4] ss:$8 sps:$4 sm:$0xff]   ;;  %v1916_v7 = vld [vmem:[%s1996_s28 + $0xd0] ss:$8 sps:$4 sm:$0xff]  }
  0x22   : > { %v1917_v8 = vld [vmem:[%s1996_s28 + $0x1d0] ss:$8 sps:$4 sm:$0xff]   ;;  %v1918_v9 = vld [vmem:[%s1996_s28 + $0xe4] ss:$8 sps:$4 sm:$0xff]  }
  0x23   : > { %712 = vmatpush1.bf16.msra.mxu0 %v1825_v10  ;;  %1800 = vmatpush1.bf16.msra.mxu1 %v1825_v10  ;;  %v1920_v10 = vld [vmem:[%s1996_s28 + $0x1e4] ss:$8 sps:$4 sm:$0xff]  }
  0x24   : > { %713 = vmatprep.subr.bf16.mxu0 %v1938_v1  ;;  %1785 = vmatprep.subr.bf16.mxu1 %v1938_v1 }
  0x27   : > { %714 = vmatpush1.bf16.msra.mxu0 %v1826_v11  ;;  %1801 = vmatpush1.bf16.msra.mxu1 %v1826_v11  ;;  %v1922_v11 = vld [vmem:[%s1996_s28 + $0xe0] ss:$8 sps:$4 sm:$0xff]  }
  0x28   : > { %715 = vmatprep.subr.bf16.mxu0 %v1938_v1  ;;  %1786 = vmatprep.subr.bf16.mxu1 %v1938_v1 }
  0x2b   : > { %716 = vmatpush1.bf16.msra.mxu0 %v1827_v12  ;;  %1802 = vmatpush1.bf16.msra.mxu1 %v1827_v12  ;;  %v1923_v12 = vld [vmem:[%s1996_s28 + $0x1e0] ss:$8 sps:$4 sm:$0xff]  }
  0x2c   : > { %717 = vmatprep.subr.bf16.mxu0 %v1938_v1  ;;  %1787 = vmatprep.subr.bf16.mxu1 %v1938_v1 }
  0x2f   : > { %718 = vmatpush1.bf16.msra.mxu0 %v1828_v13  ;;  %1803 = vmatpush1.bf16.msra.mxu1 %v1828_v13  ;;  %v1924_v13 = vld [vmem:[%s1996_s28 + $0xf4] ss:$8 sps:$4 sm:$0xff]  }
  0x30   : > { %719 = vmatprep.subr.bf16.mxu0 %v1938_v1  ;;  %1788 = vmatprep.subr.bf16.mxu1 %v1938_v1 }
  0x33   : > { %720 = vmatpush1.bf16.msra.mxu0 %v1829_v14  ;;  %1804 = vmatpush1.bf16.msra.mxu1 %v1829_v14  ;;  %v1926_v14 = vld [vmem:[%s1996_s28 + $0x1f4] ss:$8 sps:$4 sm:$0xff]  }
  0x34   : > { %721 = vmatprep.subr.bf16.mxu0 %v1938_v1  ;;  %1789 = vmatprep.subr.bf16.mxu1 %v1938_v1 }
  0x37   : > { %722 = vmatpush1.bf16.msra.mxu0 %v1830_v15  ;;  %1805 = vmatpush1.bf16.msra.mxu1 %v1830_v15  ;;  %v1928_v15 = vld [vmem:[%s1996_s28 + $0xf0] ss:$8 sps:$4 sm:$0xff]  }
  0x38   : > { %723 = vmatprep.subr.bf16.mxu0 %v1938_v1  ;;  %1790 = vmatprep.subr.bf16.mxu1 %v1938_v1 }
  0x3b   : > { %724 = vmatpush1.bf16.msra.mxu0 %v1831_v16  ;;  %1806 = vmatpush1.bf16.msra.mxu1 %v1831_v16  ;;  %v1929_v16 = vld [vmem:[%s1996_s28 + $0x1f0] ss:$8 sps:$4 sm:$0xff]  }
  0x3c   : > { %725 = vmatprep.subr.bf16.mxu0 %v1938_v1  ;;  %1791 = vmatprep.subr.bf16.mxu1 %v1938_v1 }
  0x3f   : > { %726 = vmatpush1.bf16.msra.mxu0 %v1832_v17  ;;  %1807 = vmatpush1.bf16.msra.mxu1 %v1832_v17  ;;  %v2122_v17 = vld [vmem:[%s2327_s2] ss:$0 sm:$0xff] }
  0x40   : > { %727 = vmatprep.subr.bf16.mxu0 %v1938_v1  ;;  %1792 = vmatprep.subr.bf16.mxu1 %v1938_v1  ;;  %v1906_v1 = vld [vmem:[%s1996_s28 + $0xc4] ss:$8 sps:$4 sm:$0xff]  }
  0x43   : > { %728 = vmatpush1.bf16.msra.mxu0 %v1833_v18  ;;  %1808 = vmatpush1.bf16.msra.mxu1 %v1833_v18 }
  0x46   : > { %730 = vmatmul.mubr.bf16.vlgmr.msra.gmra.mrb[0].mxu0 %v1834_v19  ;;  %858 = vmatmul.mubr.bf16.vlgmr.msra.gmra.mrb[0].mxu1 %v1837_v20 }
  0x47   : > { %737 = vmatprep.mubr.bf16.mxu0 %v1840_v21  ;;  %865 = vmatprep.mubr.bf16.mxu1 %v1842_v22 }
  0x4e   : > { %738 = vmatmul.mubr.bf16.gmra.mrb[4].mxu0 %v1844_v23  ;;  %866 = vmatmul.mubr.bf16.gmra.mrb[4].mxu1 %v1845_v24 }
  0x4f   : > { %745 = vmatprep.mubr.bf16.mxu0 %v1846_v25  ;;  %873 = vmatprep.mubr.bf16.mxu1 %v1848_v26 }
  0x56   : > { %746 = vmatmul.mubr.bf16.gmra.mrb[8].mxu0 %v1850_v27  ;;  %874 = vmatmul.mubr.bf16.gmra.mrb[8].mxu1 %v1851_v28 }
  0x57   : > { %753 = vmatprep.mubr.bf16.mxu0 %v1852_v29  ;;  %881 = vmatprep.mubr.bf16.mxu1 %v1854_v30 }
  0x5e   : > { %754 = vmatmul.mubr.bf16.gmra.mrb[12].mxu0 %v1856_v31  ;;  %882 = vmatmul.mubr.bf16.gmra.mrb[12].mxu1 %v1857_v32 }
  0x5f   : > { %761 = vmatprep.mubr.bf16.mxu0 %v1858_v33  ;;  %889 = vmatprep.mubr.bf16.mxu1 %v1860_v34 }
  0x66   : > { %762 = vmatmul.mubr.bf16.gmra.mrb[16].mxu0 %v1862_v35  ;;  %890 = vmatmul.mubr.bf16.gmra.mrb[16].mxu1 %v1863_v36 }
  0x67   : > { %769 = vmatprep.mubr.bf16.mxu0 %v1864_v37  ;;  %897 = vmatprep.mubr.bf16.mxu1 %v1866_v38 }
  0x6e   : > { %770 = vmatmul.mubr.bf16.gmra.mrb[20].mxu0 %v1868_v39  ;;  %898 = vmatmul.mubr.bf16.gmra.mrb[20].mxu1 %v1869_v40 }
  0x6f   : > { %777 = vmatprep.mubr.bf16.mxu0 %v1870_v41  ;;  %905 = vmatprep.mubr.bf16.mxu1 %v1872_v42 }
  0x76   : > { %778 = vmatmul.mubr.bf16.gmra.mrb[24].mxu0 %v1874_v43  ;;  %906 = vmatmul.mubr.bf16.gmra.mrb[24].mxu1 %v1875_v44 }
  0x77   : > { %785 = vmatprep.mubr.bf16.mxu0 %v1876_v45  ;;  %913 = vmatprep.mubr.bf16.mxu1 %v1878_v46 }
  0x7e   : > { %786 = vmatmul.mubr.bf16.gmra.mrb[28].mxu0 %v1880_v47  ;;  %914 = vmatmul.mubr.bf16.gmra.mrb[28].mxu1 %v1881_v48 }
  0x7f   : > { %793 = vmatprep.mubr.bf16.mxu0 %v1882_v49  ;;  %921 = vmatprep.mubr.bf16.mxu1 %v1884_v50 }
  0x86   : > { %794 = vmatmul.mubr.bf16.gmra.mrb[32].mxu0 %v1886_v51  ;;  %922 = vmatmul.mubr.bf16.gmra.mrb[32].mxu1 %v1887_v52 }
  0x87   : > { %801 = vmatprep.mubr.bf16.mxu0 %v1888_v53  ;;  %929 = vmatprep.mubr.bf16.mxu1 %v1890_v54 }
  0x8e   : > { %802 = vmatmul.mubr.bf16.gmra.mrb[36].mxu0 %v1892_v55  ;;  %930 = vmatmul.mubr.bf16.gmra.mrb[36].mxu1 %v1893_v56 }
  0x8f   : > { %809 = vmatprep.mubr.bf16.mxu0 %v1894_v57  ;;  %937 = vmatprep.mubr.bf16.mxu1 %v1896_v58 }
  0x96   : > { %810 = vmatmul.mubr.bf16.gmra.mrb[40].mxu0 %v1898_v59  ;;  %938 = vmatmul.mubr.bf16.gmra.mrb[40].mxu1 %v1899_v60 }
  0x97   : > { %817 = vmatprep.mubr.bf16.mxu0 %v1900_v61  ;;  %945 = vmatprep.mubr.bf16.mxu1 %v1902_v62 }
  0x9e   : > { %818 = vmatmul.mubr.bf16.gmra.mrb[44].mxu0 %v1904_v63  ;;  %946 = vmatmul.mubr.bf16.gmra.mrb[44].mxu1 %v1905_v0 }
  0x9f   : > { %825 = vmatprep.mubr.bf16.mxu0 %v1906_v1  ;;  %953 = vmatprep.mubr.bf16.mxu1 %v1908_v2 }
  0xa6   : > { %826 = vmatmul.mubr.bf16.gmra.mrb[48].mxu0 %v1910_v3  ;;  %954 = vmatmul.mubr.bf16.gmra.mrb[48].mxu1 %v1911_v4 }
  0xa7   : > { %833 = vmatprep.mubr.bf16.mxu0 %v1912_v5  ;;  %961 = vmatprep.mubr.bf16.mxu1 %v1914_v6 }
  0xae   : > { %834 = vmatmul.mubr.bf16.gmra.mrb[52].mxu0 %v1916_v7  ;;  %962 = vmatmul.mubr.bf16.gmra.mrb[52].mxu1 %v1917_v8 }
  0xaf   : > { %841 = vmatprep.mubr.bf16.mxu0 %v1918_v9  ;;  %969 = vmatprep.mubr.bf16.mxu1 %v1920_v10 }
  0xb6   : > { %842 = vmatmul.mubr.bf16.gmra.mrb[56].mxu0 %v1922_v11  ;;  %970 = vmatmul.mubr.bf16.gmra.mrb[56].mxu1 %v1923_v12 }
  0xb7   : > { %849 = vmatprep.mubr.bf16.mxu0 %v1924_v13  ;;  %977 = vmatprep.mubr.bf16.mxu1 %v1926_v14 }
  0xbe   : > { %850 = vmatmul.mubr.bf16.gmra.mrb[60].mxu0 %v1928_v15  ;;  %978 = vmatmul.mubr.bf16.gmra.mrb[60].mxu1 %v1929_v16 }
 0x119   : > { %v731_v18 = vpop.f32.mrb[0].mxu0  ;;  %v859_v19 = vpop.f32.mrb[0].mxu1 }
 0x11a   : > { %v732_v20 = vadd.f32 %v2122_v17, %v731_v18  ;;  %v860_v21 = vadd.f32 %v2122_v17, %v859_v19  ;;  %v733_v22 = vpop.f32.mrb[1].mxu0  ;;  %v861_v23 = vpop.f32.mrb[1].mxu1 }
 0x11b   : > { %v734_v24 = vpop.f32.mrb[2].mxu0  ;;  %v862_v25 = vpop.f32.mrb[2].mxu1 }
 0x11c   : > { %vm986_vm0 = vcmp.gt.f32.partialorder %v732_v20, 0.0  ;;  %v1050_v26 = vmul.f32 0.2, %v732_v20  ;;  %vm1018_vm1 = vcmp.gt.f32.partialorder %v860_v21, 0.0  ;;  %v1082_v27 = vmul.f32 0.2, %v860_v21 }
 0x11d   : > { %v735_v28 = vadd.f32 %v2122_v17, %v734_v24  ;;  %v863_v29 = vadd.f32 %v2122_v17, %v862_v25  ;;  %v736_v30 = vpop.f32.mrb[3].mxu0  ;;  %v864_v31 = vpop.f32.mrb[3].mxu1 }
 0x11e   : > { %v1114_v32 = vsel %vm986_vm0, %v732_v20, %v1050_v26  ;;  %v1146_v33 = vsel %vm1018_vm1, %v860_v21, %v1082_v27 }
 0x11f   : > { %v1713_v34 = vpack.c.bf16 %v1114_v32, %v1114_v32  ;;  %v1745_v35 = vpack.c.bf16 %v1146_v33, %v1146_v33  ;;  %vm987_vm3 = vcmp.gt.f32.partialorder %v735_v28, 0.0  ;;  %v1051_v36 = vmul.f32 0.2, %v735_v28 }
 0x120   : > { %vm1019_vm4 = vcmp.gt.f32.partialorder %v863_v29, 0.0  ;;  %v1083_v37 = vmul.f32 0.2, %v863_v29 }
 0x121   : > { %1435 = vst.msk [vmem:[%s2132_s4] sm:$0xf] %vm1434_vm2, %v1713_v34  ;;  %1467 = vst.msk [vmem:[%s2132_s4 + $0x80] sm:$0xf] %vm1434_vm2, %v1745_v35  ;;  %v1115_v38 = vsel %vm987_vm3, %v735_v28, %v1051_v36  ;;  %v739_v39 = vpop.f32.mrb[4].mxu0  ;;  %v867_v40 = vpop.f32.mrb[4].mxu1 }
 0x122   : > { %v1714_v41 = vpack.c.bf16 %v1115_v38, %v1115_v38  ;;  %v1147_v42 = vsel %vm1019_vm4, %v863_v29, %v1083_v37  ;;  %v740_v43 = vadd.f32 %v2122_v17, %v739_v39  ;;  %v868_v44 = vadd.f32 %v2122_v17, %v867_v40  ;;  %v741_v45 = vpop.f32.mrb[5].mxu0  ;;  %v869_v46 = vpop.f32.mrb[5].mxu1 }
 0x123   : > { %v1746_v47 = vpack.c.bf16 %v1147_v42, %v1147_v42  ;;  %v742_v48 = vpop.f32.mrb[6].mxu0  ;;  %v870_v49 = vpop.f32.mrb[6].mxu1 }
 0x124   : > { %1436 = vst.msk [vmem:[%s2132_s4 + $0x4] sm:$0xf] %vm1434_vm2, %v1714_v41  ;;  %vm988_vm5 = vcmp.gt.f32.partialorder %v740_v43, 0.0  ;;  %v1052_v50 = vmul.f32 0.2, %v740_v43  ;;  %vm1020_vm6 = vcmp.gt.f32.partialorder %v868_v44, 0.0  ;;  %v743_v52 = vadd.f32 %v2122_v17, %v742_v48 }
 0x125   : > { %v1084_v51 = vmul.f32 0.2, %v868_v44  ;;  %1468 = vst.msk [vmem:[%s2132_s4 + $0x84] sm:$0xf] %vm1434_vm2, %v1746_v47  ;;  %v871_v53 = vadd.f32 %v2122_v17, %v870_v49  ;;  %v744_v54 = vpop.f32.mrb[7].mxu0  ;;  %v872_v55 = vpop.f32.mrb[7].mxu1 }
 0x126   : > { %v1116_v56 = vsel %vm988_vm5, %v740_v43, %v1052_v50  ;;  %vm989_vm7 = vcmp.gt.f32.partialorder %v743_v52, 0.0  ;;  %v1053_v60 = vmul.f32 0.2, %v743_v52 }
 0x127   : > { %v1148_v57 = vsel %vm1020_vm6, %v868_v44, %v1084_v51  ;;  %v1715_v58 = vpack.c.bf16 %v1116_v56, %v1116_v56  ;;  %vm1021_vm8 = vcmp.gt.f32.partialorder %v871_v53, 0.0  ;;  %v1085_v61 = vmul.f32 0.2, %v871_v53 }
 0x128   : > { %v1747_v59 = vpack.c.bf16 %v1148_v57, %v1148_v57  ;;  %v1117_v62 = vsel %vm989_vm7, %v743_v52, %v1053_v60 }
 0x129   : > { %1437 = vst.msk [vmem:[%s2132_s4 + $0x8] sm:$0xf] %vm1434_vm2, %v1715_v58  ;;  %v747_v63 = vpop.f32.mrb[8].mxu0  ;;  %v875_v0 = vpop.f32.mrb[8].mxu1  ;;  %v1716_v1 = vpack.c.bf16 %v1117_v62, %v1117_v62  ;;  %v1149_v2 = vsel %vm1021_vm8, %v871_v53, %v1085_v61 }
 0x12a   : > { %1469 = vst.msk [vmem:[%s2132_s4 + $0x88] sm:$0xf] %vm1434_vm2, %v1747_v59  ;;  %v748_v3 = vadd.f32 %v2122_v17, %v747_v63  ;;  %v876_v4 = vadd.f32 %v2122_v17, %v875_v0  ;;  %v749_v5 = vpop.f32.mrb[9].mxu0  ;;  %v877_v6 = vpop.f32.mrb[9].mxu1  ;;  %v1748_v7 = vpack.c.bf16 %v1149_v2, %v1149_v2 }
 0x12b   : > { %v750_v8 = vpop.f32.mrb[10].mxu0  ;;  %v878_v9 = vpop.f32.mrb[10].mxu1  ;;  %1438 = vst.msk [vmem:[%s2132_s4 + $0xc] sm:$0xf] %vm1434_vm2, %v1716_v1 }
 0x12c   : > { %vm990_vm9 = vcmp.gt.f32.partialorder %v748_v3, 0.0  ;;  %v1054_v10 = vmul.f32 0.2, %v748_v3  ;;  %vm1022_vm10 = vcmp.gt.f32.partialorder %v876_v4, 0.0  ;;  %v1086_v11 = vmul.f32 0.2, %v876_v4 }
 0x12d   : > { %1470 = vst.msk [vmem:[%s2132_s4 + $0x8c] sm:$0xf] %vm1434_vm2, %v1748_v7  ;;  %v751_v12 = vadd.f32 %v2122_v17, %v750_v8  ;;  %v879_v13 = vadd.f32 %v2122_v17, %v878_v9  ;;  %v752_v14 = vpop.f32.mrb[11].mxu0  ;;  %v880_v15 = vpop.f32.mrb[11].mxu1 }
 0x12e   : > { %v1118_v16 = vsel %vm990_vm9, %v748_v3, %v1054_v10  ;;  %v1150_v18 = vsel %vm1022_vm10, %v876_v4, %v1086_v11 }
 0x12f   : > { %v1717_v19 = vpack.c.bf16 %v1118_v16, %v1118_v16  ;;  %v1749_v20 = vpack.c.bf16 %v1150_v18, %v1150_v18  ;;  %vm991_vm11 = vcmp.gt.f32.partialorder %v751_v12, 0.0  ;;  %v1055_v21 = vmul.f32 0.2, %v751_v12 }
 0x130   : > { %vm1023_vm12 = vcmp.gt.f32.partialorder %v879_v13, 0.0  ;;  %v1087_v22 = vmul.f32 0.2, %v879_v13 }
 0x131   : > { %1439 = vst.msk [vmem:[%s2132_s4 + $0x10] sm:$0xf] %vm1434_vm2, %v1717_v19  ;;  %1471 = vst.msk [vmem:[%s2132_s4 + $0x90] sm:$0xf] %vm1434_vm2, %v1749_v20  ;;  %v1119_v23 = vsel %vm991_vm11, %v751_v12, %v1055_v21  ;;  %v755_v24 = vpop.f32.mrb[12].mxu0  ;;  %v883_v25 = vpop.f32.mrb[12].mxu1 }
 0x132   : > { %v1718_v26 = vpack.c.bf16 %v1119_v23, %v1119_v23  ;;  %v1151_v27 = vsel %vm1023_vm12, %v879_v13, %v1087_v22  ;;  %v756_v28 = vadd.f32 %v2122_v17, %v755_v24  ;;  %v884_v29 = vadd.f32 %v2122_v17, %v883_v25  ;;  %v757_v30 = vpop.f32.mrb[13].mxu0  ;;  %v885_v31 = vpop.f32.mrb[13].mxu1 }
 0x133   : > { %v1750_v32 = vpack.c.bf16 %v1151_v27, %v1151_v27  ;;  %v758_v33 = vpop.f32.mrb[14].mxu0  ;;  %v886_v34 = vpop.f32.mrb[14].mxu1 }
 0x134   : > { %1440 = vst.msk [vmem:[%s2132_s4 + $0x14] sm:$0xf] %vm1434_vm2, %v1718_v26  ;;  %vm992_vm13 = vcmp.gt.f32.partialorder %v756_v28, 0.0  ;;  %v1056_v35 = vmul.f32 0.2, %v756_v28  ;;  %vm1024_vm14 = vcmp.gt.f32.partialorder %v884_v29, 0.0  ;;  %v759_v37 = vadd.f32 %v2122_v17, %v758_v33 }
 0x135   : > { %v1088_v36 = vmul.f32 0.2, %v884_v29  ;;  %1472 = vst.msk [vmem:[%s2132_s4 + $0x94] sm:$0xf] %vm1434_vm2, %v1750_v32  ;;  %v887_v38 = vadd.f32 %v2122_v17, %v886_v34  ;;  %v760_v39 = vpop.f32.mrb[15].mxu0  ;;  %v888_v40 = vpop.f32.mrb[15].mxu1 }
 0x136   : > { %v1120_v41 = vsel %vm992_vm13, %v756_v28, %v1056_v35  ;;  %vm993_vm15 = vcmp.gt.f32.partialorder %v759_v37, 0.0  ;;  %v1057_v45 = vmul.f32 0.2, %v759_v37 }
 0x137   : > { %v1152_v42 = vsel %vm1024_vm14, %v884_v29, %v1088_v36  ;;  %v1719_v43 = vpack.c.bf16 %v1120_v41, %v1120_v41  ;;  %vm1025_vm0 = vcmp.gt.f32.partialorder %v887_v38, 0.0  ;;  %v1089_v46 = vmul.f32 0.2, %v887_v38 }
 0x138   : > { %v1751_v44 = vpack.c.bf16 %v1152_v42, %v1152_v42  ;;  %v1121_v47 = vsel %vm993_vm15, %v759_v37, %v1057_v45 }
 0x139   : > { %1441 = vst.msk [vmem:[%s2132_s4 + $0x18] sm:$0xf] %vm1434_vm2, %v1719_v43  ;;  %v763_v48 = vpop.f32.mrb[16].mxu0  ;;  %v891_v49 = vpop.f32.mrb[16].mxu1  ;;  %v1720_v50 = vpack.c.bf16 %v1121_v47, %v1121_v47  ;;  %v1153_v51 = vsel %vm1025_vm0, %v887_v38, %v1089_v46 }
 0x13a   : > { %1473 = vst.msk [vmem:[%s2132_s4 + $0x98] sm:$0xf] %vm1434_vm2, %v1751_v44  ;;  %v764_v52 = vadd.f32 %v2122_v17, %v763_v48  ;;  %v892_v53 = vadd.f32 %v2122_v17, %v891_v49  ;;  %v765_v54 = vpop.f32.mrb[17].mxu0  ;;  %v893_v55 = vpop.f32.mrb[17].mxu1  ;;  %v1752_v56 = vpack.c.bf16 %v1153_v51, %v1153_v51 }
 0x13b   : > { %v766_v57 = vpop.f32.mrb[18].mxu0  ;;  %v894_v58 = vpop.f32.mrb[18].mxu1  ;;  %1442 = vst.msk [vmem:[%s2132_s4 + $0x1c] sm:$0xf] %vm1434_vm2, %v1720_v50 }
 0x13c   : > { %vm994_vm1 = vcmp.gt.f32.partialorder %v764_v52, 0.0  ;;  %v1058_v59 = vmul.f32 0.2, %v764_v52  ;;  %vm1026_vm3 = vcmp.gt.f32.partialorder %v892_v53, 0.0  ;;  %v1090_v60 = vmul.f32 0.2, %v892_v53 }
 0x13d   : > { %1474 = vst.msk [vmem:[%s2132_s4 + $0x9c] sm:$0xf] %vm1434_vm2, %v1752_v56  ;;  %v767_v61 = vadd.f32 %v2122_v17, %v766_v57  ;;  %v895_v62 = vadd.f32 %v2122_v17, %v894_v58  ;;  %v768_v63 = vpop.f32.mrb[19].mxu0  ;;  %v896_v0 = vpop.f32.mrb[19].mxu1 }
 0x13e   : > { %v1122_v1 = vsel %vm994_vm1, %v764_v52, %v1058_v59  ;;  %v1154_v2 = vsel %vm1026_vm3, %v892_v53, %v1090_v60 }
 0x13f   : > { %v1721_v3 = vpack.c.bf16 %v1122_v1, %v1122_v1  ;;  %v1753_v4 = vpack.c.bf16 %v1154_v2, %v1154_v2  ;;  %vm995_vm4 = vcmp.gt.f32.partialorder %v767_v61, 0.0  ;;  %v1059_v5 = vmul.f32 0.2, %v767_v61 }
 0x140   : > { %vm1027_vm5 = vcmp.gt.f32.partialorder %v895_v62, 0.0  ;;  %v1091_v6 = vmul.f32 0.2, %v895_v62 }
 0x141   : > { %1443 = vst.msk [vmem:[%s2132_s4 + $0x20] sm:$0xf] %vm1434_vm2, %v1721_v3  ;;  %1475 = vst.msk [vmem:[%s2132_s4 + $0xa0] sm:$0xf] %vm1434_vm2, %v1753_v4  ;;  %v1123_v7 = vsel %vm995_vm4, %v767_v61, %v1059_v5  ;;  %v771_v8 = vpop.f32.mrb[20].mxu0  ;;  %v899_v9 = vpop.f32.mrb[20].mxu1 }
 0x142   : > { %v1722_v10 = vpack.c.bf16 %v1123_v7, %v1123_v7  ;;  %v1155_v11 = vsel %vm1027_vm5, %v895_v62, %v1091_v6  ;;  %v772_v12 = vadd.f32 %v2122_v17, %v771_v8  ;;  %v900_v13 = vadd.f32 %v2122_v17, %v899_v9  ;;  %v773_v14 = vpop.f32.mrb[21].mxu0  ;;  %v901_v15 = vpop.f32.mrb[21].mxu1 }
 0x143   : > { %v1754_v16 = vpack.c.bf16 %v1155_v11, %v1155_v11  ;;  %v774_v18 = vpop.f32.mrb[22].mxu0  ;;  %v902_v19 = vpop.f32.mrb[22].mxu1 }
 0x144   : > { %1444 = vst.msk [vmem:[%s2132_s4 + $0x24] sm:$0xf] %vm1434_vm2, %v1722_v10  ;;  %vm996_vm6 = vcmp.gt.f32.partialorder %v772_v12, 0.0  ;;  %v1060_v20 = vmul.f32 0.2, %v772_v12  ;;  %vm1028_vm7 = vcmp.gt.f32.partialorder %v900_v13, 0.0  ;;  %v775_v22 = vadd.f32 %v2122_v17, %v774_v18 }
 0x145   : > { %v1092_v21 = vmul.f32 0.2, %v900_v13  ;;  %1476 = vst.msk [vmem:[%s2132_s4 + $0xa4] sm:$0xf] %vm1434_vm2, %v1754_v16  ;;  %v903_v23 = vadd.f32 %v2122_v17, %v902_v19  ;;  %v776_v24 = vpop.f32.mrb[23].mxu0  ;;  %v904_v25 = vpop.f32.mrb[23].mxu1 }
 0x146   : > { %v1124_v26 = vsel %vm996_vm6, %v772_v12, %v1060_v20  ;;  %vm997_vm8 = vcmp.gt.f32.partialorder %v775_v22, 0.0  ;;  %v1061_v30 = vmul.f32 0.2, %v775_v22 }
 0x147   : > { %v1156_v27 = vsel %vm1028_vm7, %v900_v13, %v1092_v21  ;;  %v1723_v28 = vpack.c.bf16 %v1124_v26, %v1124_v26  ;;  %vm1029_vm9 = vcmp.gt.f32.partialorder %v903_v23, 0.0  ;;  %v1093_v31 = vmul.f32 0.2, %v903_v23 }
 0x148   : > { %v1755_v29 = vpack.c.bf16 %v1156_v27, %v1156_v27  ;;  %v1125_v32 = vsel %vm997_vm8, %v775_v22, %v1061_v30 }
 0x149   : > { %1445 = vst.msk [vmem:[%s2132_s4 + $0x28] sm:$0xf] %vm1434_vm2, %v1723_v28  ;;  %v779_v33 = vpop.f32.mrb[24].mxu0  ;;  %v907_v34 = vpop.f32.mrb[24].mxu1  ;;  %v1724_v35 = vpack.c.bf16 %v1125_v32, %v1125_v32  ;;  %v1157_v36 = vsel %vm1029_vm9, %v903_v23, %v1093_v31 }
 0x14a   : > { %1477 = vst.msk [vmem:[%s2132_s4 + $0xa8] sm:$0xf] %vm1434_vm2, %v1755_v29  ;;  %v780_v37 = vadd.f32 %v2122_v17, %v779_v33  ;;  %v908_v38 = vadd.f32 %v2122_v17, %v907_v34  ;;  %v781_v39 = vpop.f32.mrb[25].mxu0  ;;  %v909_v40 = vpop.f32.mrb[25].mxu1  ;;  %v1756_v41 = vpack.c.bf16 %v1157_v36, %v1157_v36 }
 0x14b   : > { %v782_v42 = vpop.f32.mrb[26].mxu0  ;;  %v910_v43 = vpop.f32.mrb[26].mxu1  ;;  %1446 = vst.msk [vmem:[%s2132_s4 + $0x2c] sm:$0xf] %vm1434_vm2, %v1724_v35 }
 0x14c   : > { %vm998_vm10 = vcmp.gt.f32.partialorder %v780_v37, 0.0  ;;  %v1062_v44 = vmul.f32 0.2, %v780_v37  ;;  %vm1030_vm11 = vcmp.gt.f32.partialorder %v908_v38, 0.0  ;;  %v1094_v45 = vmul.f32 0.2, %v908_v38 }
 0x14d   : > { %1478 = vst.msk [vmem:[%s2132_s4 + $0xac] sm:$0xf] %vm1434_vm2, %v1756_v41  ;;  %v783_v46 = vadd.f32 %v2122_v17, %v782_v42  ;;  %v911_v47 = vadd.f32 %v2122_v17, %v910_v43  ;;  %v784_v48 = vpop.f32.mrb[27].mxu0  ;;  %v912_v49 = vpop.f32.mrb[27].mxu1 }
 0x14e   : > { %v1126_v50 = vsel %vm998_vm10, %v780_v37, %v1062_v44  ;;  %v1158_v51 = vsel %vm1030_vm11, %v908_v38, %v1094_v45 }
 0x14f   : > { %v1725_v52 = vpack.c.bf16 %v1126_v50, %v1126_v50  ;;  %v1757_v53 = vpack.c.bf16 %v1158_v51, %v1158_v51  ;;  %vm999_vm12 = vcmp.gt.f32.partialorder %v783_v46, 0.0  ;;  %v1063_v54 = vmul.f32 0.2, %v783_v46 }
 0x150   : > { %vm1031_vm13 = vcmp.gt.f32.partialorder %v911_v47, 0.0  ;;  %v1095_v55 = vmul.f32 0.2, %v911_v47 }
 0x151   : > { %1447 = vst.msk [vmem:[%s2132_s4 + $0x30] sm:$0xf] %vm1434_vm2, %v1725_v52  ;;  %1479 = vst.msk [vmem:[%s2132_s4 + $0xb0] sm:$0xf] %vm1434_vm2, %v1757_v53  ;;  %v1127_v56 = vsel %vm999_vm12, %v783_v46, %v1063_v54  ;;  %v787_v57 = vpop.f32.mrb[28].mxu0  ;;  %v915_v58 = vpop.f32.mrb[28].mxu1 }
 0x152   : > { %v1726_v59 = vpack.c.bf16 %v1127_v56, %v1127_v56  ;;  %v1159_v60 = vsel %vm1031_vm13, %v911_v47, %v1095_v55  ;;  %v788_v61 = vadd.f32 %v2122_v17, %v787_v57  ;;  %v916_v62 = vadd.f32 %v2122_v17, %v915_v58  ;;  %v789_v63 = vpop.f32.mrb[29].mxu0  ;;  %v917_v0 = vpop.f32.mrb[29].mxu1 }
 0x153   : > { %v1758_v1 = vpack.c.bf16 %v1159_v60, %v1159_v60  ;;  %v790_v2 = vpop.f32.mrb[30].mxu0  ;;  %v918_v3 = vpop.f32.mrb[30].mxu1 }
 0x154   : > { %1448 = vst.msk [vmem:[%s2132_s4 + $0x34] sm:$0xf] %vm1434_vm2, %v1726_v59  ;;  %vm1000_vm14 = vcmp.gt.f32.partialorder %v788_v61, 0.0  ;;  %v1064_v4 = vmul.f32 0.2, %v788_v61  ;;  %vm1032_vm15 = vcmp.gt.f32.partialorder %v916_v62, 0.0  ;;  %v791_v6 = vadd.f32 %v2122_v17, %v790_v2 }
 0x155   : > { %v1096_v5 = vmul.f32 0.2, %v916_v62  ;;  %1480 = vst.msk [vmem:[%s2132_s4 + $0xb4] sm:$0xf] %vm1434_vm2, %v1758_v1  ;;  %v919_v7 = vadd.f32 %v2122_v17, %v918_v3  ;;  %v792_v8 = vpop.f32.mrb[31].mxu0  ;;  %v920_v9 = vpop.f32.mrb[31].mxu1 }
 0x156   : > { %v1128_v10 = vsel %vm1000_vm14, %v788_v61, %v1064_v4  ;;  %vm1001_vm0 = vcmp.gt.f32.partialorder %v791_v6, 0.0  ;;  %v1065_v14 = vmul.f32 0.2, %v791_v6 }
 0x157   : > { %v1160_v11 = vsel %vm1032_vm15, %v916_v62, %v1096_v5  ;;  %v1727_v12 = vpack.c.bf16 %v1128_v10, %v1128_v10  ;;  %vm1033_vm1 = vcmp.gt.f32.partialorder %v919_v7, 0.0  ;;  %v1097_v15 = vmul.f32 0.2, %v919_v7 }
 0x158   : > { %v1759_v13 = vpack.c.bf16 %v1160_v11, %v1160_v11  ;;  %v1129_v16 = vsel %vm1001_vm0, %v791_v6, %v1065_v14 }
 0x159   : > { %1449 = vst.msk [vmem:[%s2132_s4 + $0x38] sm:$0xf] %vm1434_vm2, %v1727_v12  ;;  %v795_v18 = vpop.f32.mrb[32].mxu0  ;;  %v923_v19 = vpop.f32.mrb[32].mxu1  ;;  %v1728_v20 = vpack.c.bf16 %v1129_v16, %v1129_v16  ;;  %v1161_v21 = vsel %vm1033_vm1, %v919_v7, %v1097_v15 }
 0x15a   : > { %1481 = vst.msk [vmem:[%s2132_s4 + $0xb8] sm:$0xf] %vm1434_vm2, %v1759_v13  ;;  %v796_v22 = vadd.f32 %v2122_v17, %v795_v18  ;;  %v924_v23 = vadd.f32 %v2122_v17, %v923_v19  ;;  %v797_v24 = vpop.f32.mrb[33].mxu0  ;;  %v925_v25 = vpop.f32.mrb[33].mxu1  ;;  %v1760_v26 = vpack.c.bf16 %v1161_v21, %v1161_v21 }
 0x15b   : > { %v798_v27 = vpop.f32.mrb[34].mxu0  ;;  %v926_v28 = vpop.f32.mrb[34].mxu1  ;;  %1450 = vst.msk [vmem:[%s2132_s4 + $0x3c] sm:$0xf] %vm1434_vm2, %v1728_v20 }
 0x15c   : > { %vm1002_vm3 = vcmp.gt.f32.partialorder %v796_v22, 0.0  ;;  %v1066_v29 = vmul.f32 0.2, %v796_v22  ;;  %vm1034_vm4 = vcmp.gt.f32.partialorder %v924_v23, 0.0  ;;  %v1098_v30 = vmul.f32 0.2, %v924_v23 }
 0x15d   : > { %1482 = vst.msk [vmem:[%s2132_s4 + $0xbc] sm:$0xf] %vm1434_vm2, %v1760_v26  ;;  %v799_v31 = vadd.f32 %v2122_v17, %v798_v27  ;;  %v927_v32 = vadd.f32 %v2122_v17, %v926_v28  ;;  %v800_v33 = vpop.f32.mrb[35].mxu0  ;;  %v928_v34 = vpop.f32.mrb[35].mxu1 }
 0x15e   : > { %v1130_v35 = vsel %vm1002_vm3, %v796_v22, %v1066_v29  ;;  %v1162_v36 = vsel %vm1034_vm4, %v924_v23, %v1098_v30 }
 0x15f   : > { %v1729_v37 = vpack.c.bf16 %v1130_v35, %v1130_v35  ;;  %v1761_v38 = vpack.c.bf16 %v1162_v36, %v1162_v36  ;;  %vm1003_vm5 = vcmp.gt.f32.partialorder %v799_v31, 0.0  ;;  %v1067_v39 = vmul.f32 0.2, %v799_v31 }
 0x160   : > { %vm1035_vm6 = vcmp.gt.f32.partialorder %v927_v32, 0.0  ;;  %v1099_v40 = vmul.f32 0.2, %v927_v32 }
 0x161   : > { %1451 = vst.msk [vmem:[%s2132_s4 + $0x40] sm:$0xf] %vm1434_vm2, %v1729_v37  ;;  %1483 = vst.msk [vmem:[%s2132_s4 + $0xc0] sm:$0xf] %vm1434_vm2, %v1761_v38  ;;  %v1131_v41 = vsel %vm1003_vm5, %v799_v31, %v1067_v39  ;;  %v803_v42 = vpop.f32.mrb[36].mxu0  ;;  %v931_v43 = vpop.f32.mrb[36].mxu1 }
 0x162   : > { %v1730_v44 = vpack.c.bf16 %v1131_v41, %v1131_v41  ;;  %v1163_v45 = vsel %vm1035_vm6, %v927_v32, %v1099_v40  ;;  %v804_v46 = vadd.f32 %v2122_v17, %v803_v42  ;;  %v932_v47 = vadd.f32 %v2122_v17, %v931_v43  ;;  %v805_v48 = vpop.f32.mrb[37].mxu0  ;;  %v933_v49 = vpop.f32.mrb[37].mxu1 }
 0x163   : > { %v1762_v50 = vpack.c.bf16 %v1163_v45, %v1163_v45  ;;  %v806_v51 = vpop.f32.mrb[38].mxu0  ;;  %v934_v52 = vpop.f32.mrb[38].mxu1 }
 0x164   : > { %1452 = vst.msk [vmem:[%s2132_s4 + $0x44] sm:$0xf] %vm1434_vm2, %v1730_v44  ;;  %vm1004_vm7 = vcmp.gt.f32.partialorder %v804_v46, 0.0  ;;  %v1068_v53 = vmul.f32 0.2, %v804_v46  ;;  %vm1036_vm8 = vcmp.gt.f32.partialorder %v932_v47, 0.0  ;;  %v807_v55 = vadd.f32 %v2122_v17, %v806_v51 }
 0x165   : > { %v1100_v54 = vmul.f32 0.2, %v932_v47  ;;  %1484 = vst.msk [vmem:[%s2132_s4 + $0xc4] sm:$0xf] %vm1434_vm2, %v1762_v50  ;;  %v935_v56 = vadd.f32 %v2122_v17, %v934_v52  ;;  %v808_v57 = vpop.f32.mrb[39].mxu0  ;;  %v936_v58 = vpop.f32.mrb[39].mxu1 }
 0x166   : > { %v1132_v59 = vsel %vm1004_vm7, %v804_v46, %v1068_v53  ;;  %vm1005_vm9 = vcmp.gt.f32.partialorder %v807_v55, 0.0  ;;  %v1069_v63 = vmul.f32 0.2, %v807_v55 }
 0x167   : > { %v1164_v60 = vsel %vm1036_vm8, %v932_v47, %v1100_v54  ;;  %v1731_v61 = vpack.c.bf16 %v1132_v59, %v1132_v59  ;;  %vm1037_vm10 = vcmp.gt.f32.partialorder %v935_v56, 0.0  ;;  %v1101_v0 = vmul.f32 0.2, %v935_v56 }
 0x168   : > { %v1763_v62 = vpack.c.bf16 %v1164_v60, %v1164_v60  ;;  %v1133_v1 = vsel %vm1005_vm9, %v807_v55, %v1069_v63 }
 0x169   : > { %1453 = vst.msk [vmem:[%s2132_s4 + $0x48] sm:$0xf] %vm1434_vm2, %v1731_v61  ;;  %v811_v2 = vpop.f32.mrb[40].mxu0  ;;  %v939_v3 = vpop.f32.mrb[40].mxu1  ;;  %v1732_v4 = vpack.c.bf16 %v1133_v1, %v1133_v1  ;;  %v1165_v5 = vsel %vm1037_vm10, %v935_v56, %v1101_v0 }
 0x16a   : > { %1485 = vst.msk [vmem:[%s2132_s4 + $0xc8] sm:$0xf] %vm1434_vm2, %v1763_v62  ;;  %v812_v6 = vadd.f32 %v2122_v17, %v811_v2  ;;  %v940_v7 = vadd.f32 %v2122_v17, %v939_v3  ;;  %v813_v8 = vpop.f32.mrb[41].mxu0  ;;  %v941_v9 = vpop.f32.mrb[41].mxu1  ;;  %v1764_v10 = vpack.c.bf16 %v1165_v5, %v1165_v5 }
 0x16b   : > { %v814_v11 = vpop.f32.mrb[42].mxu0  ;;  %v942_v12 = vpop.f32.mrb[42].mxu1  ;;  %1454 = vst.msk [vmem:[%s2132_s4 + $0x4c] sm:$0xf] %vm1434_vm2, %v1732_v4 }
 0x16c   : > { %vm1006_vm11 = vcmp.gt.f32.partialorder %v812_v6, 0.0  ;;  %v1070_v13 = vmul.f32 0.2, %v812_v6  ;;  %vm1038_vm12 = vcmp.gt.f32.partialorder %v940_v7, 0.0  ;;  %v1102_v14 = vmul.f32 0.2, %v940_v7 }
 0x16d   : > { %1486 = vst.msk [vmem:[%s2132_s4 + $0xcc] sm:$0xf] %vm1434_vm2, %v1764_v10  ;;  %v815_v15 = vadd.f32 %v2122_v17, %v814_v11  ;;  %v943_v16 = vadd.f32 %v2122_v17, %v942_v12  ;;  %v816_v18 = vpop.f32.mrb[43].mxu0  ;;  %v944_v19 = vpop.f32.mrb[43].mxu1 }
 0x16e   : > { %v1134_v20 = vsel %vm1006_vm11, %v812_v6, %v1070_v13  ;;  %v1166_v21 = vsel %vm1038_vm12, %v940_v7, %v1102_v14 }
 0x16f   : > { %v1733_v22 = vpack.c.bf16 %v1134_v20, %v1134_v20  ;;  %v1765_v23 = vpack.c.bf16 %v1166_v21, %v1166_v21  ;;  %vm1007_vm13 = vcmp.gt.f32.partialorder %v815_v15, 0.0  ;;  %v1071_v24 = vmul.f32 0.2, %v815_v15 }
 0x170   : > { %vm1039_vm14 = vcmp.gt.f32.partialorder %v943_v16, 0.0  ;;  %v1103_v25 = vmul.f32 0.2, %v943_v16 }
 0x171   : > { %1455 = vst.msk [vmem:[%s2132_s4 + $0x50] sm:$0xf] %vm1434_vm2, %v1733_v22  ;;  %1487 = vst.msk [vmem:[%s2132_s4 + $0xd0] sm:$0xf] %vm1434_vm2, %v1765_v23  ;;  %v1135_v26 = vsel %vm1007_vm13, %v815_v15, %v1071_v24  ;;  %v819_v27 = vpop.f32.mrb[44].mxu0  ;;  %v947_v28 = vpop.f32.mrb[44].mxu1 }
 0x172   : > { %v1734_v29 = vpack.c.bf16 %v1135_v26, %v1135_v26  ;;  %v1167_v30 = vsel %vm1039_vm14, %v943_v16, %v1103_v25  ;;  %v820_v31 = vadd.f32 %v2122_v17, %v819_v27  ;;  %v948_v32 = vadd.f32 %v2122_v17, %v947_v28  ;;  %v821_v33 = vpop.f32.mrb[45].mxu0  ;;  %v949_v34 = vpop.f32.mrb[45].mxu1 }
 0x173   : > { %v1766_v35 = vpack.c.bf16 %v1167_v30, %v1167_v30  ;;  %v822_v36 = vpop.f32.mrb[46].mxu0  ;;  %v950_v37 = vpop.f32.mrb[46].mxu1 }
 0x174   : > { %1456 = vst.msk [vmem:[%s2132_s4 + $0x54] sm:$0xf] %vm1434_vm2, %v1734_v29  ;;  %vm1008_vm15 = vcmp.gt.f32.partialorder %v820_v31, 0.0  ;;  %v1072_v38 = vmul.f32 0.2, %v820_v31  ;;  %vm1040_vm0 = vcmp.gt.f32.partialorder %v948_v32, 0.0  ;;  %v823_v40 = vadd.f32 %v2122_v17, %v822_v36 }
 0x175   : > { %v1104_v39 = vmul.f32 0.2, %v948_v32  ;;  %1488 = vst.msk [vmem:[%s2132_s4 + $0xd4] sm:$0xf] %vm1434_vm2, %v1766_v35  ;;  %v951_v41 = vadd.f32 %v2122_v17, %v950_v37  ;;  %v824_v42 = vpop.f32.mrb[47].mxu0  ;;  %v952_v43 = vpop.f32.mrb[47].mxu1 }
 0x176   : > { %v1136_v44 = vsel %vm1008_vm15, %v820_v31, %v1072_v38  ;;  %vm1009_vm1 = vcmp.gt.f32.partialorder %v823_v40, 0.0  ;;  %v1073_v48 = vmul.f32 0.2, %v823_v40 }
 0x177   : > { %v1168_v45 = vsel %vm1040_vm0, %v948_v32, %v1104_v39  ;;  %v1735_v46 = vpack.c.bf16 %v1136_v44, %v1136_v44  ;;  %vm1041_vm3 = vcmp.gt.f32.partialorder %v951_v41, 0.0  ;;  %v1105_v49 = vmul.f32 0.2, %v951_v41 }
 0x178   : > { %v1767_v47 = vpack.c.bf16 %v1168_v45, %v1168_v45  ;;  %v1137_v50 = vsel %vm1009_vm1, %v823_v40, %v1073_v48 }
 0x179   : > { %1457 = vst.msk [vmem:[%s2132_s4 + $0x58] sm:$0xf] %vm1434_vm2, %v1735_v46  ;;  %v827_v51 = vpop.f32.mrb[48].mxu0  ;;  %v955_v52 = vpop.f32.mrb[48].mxu1  ;;  %v1736_v53 = vpack.c.bf16 %v1137_v50, %v1137_v50  ;;  %v1169_v54 = vsel %vm1041_vm3, %v951_v41, %v1105_v49 }
 0x17a   : > { %1489 = vst.msk [vmem:[%s2132_s4 + $0xd8] sm:$0xf] %vm1434_vm2, %v1767_v47  ;;  %v828_v55 = vadd.f32 %v2122_v17, %v827_v51  ;;  %v956_v56 = vadd.f32 %v2122_v17, %v955_v52  ;;  %v829_v57 = vpop.f32.mrb[49].mxu0  ;;  %v957_v58 = vpop.f32.mrb[49].mxu1  ;;  %v1768_v59 = vpack.c.bf16 %v1169_v54, %v1169_v54 }
 0x17b   : > { %v830_v60 = vpop.f32.mrb[50].mxu0  ;;  %v958_v61 = vpop.f32.mrb[50].mxu1  ;;  %1458 = vst.msk [vmem:[%s2132_s4 + $0x5c] sm:$0xf] %vm1434_vm2, %v1736_v53 }
 0x17c   : > { %vm1010_vm4 = vcmp.gt.f32.partialorder %v828_v55, 0.0  ;;  %v1074_v62 = vmul.f32 0.2, %v828_v55  ;;  %vm1042_vm5 = vcmp.gt.f32.partialorder %v956_v56, 0.0  ;;  %v1106_v63 = vmul.f32 0.2, %v956_v56 }
 0x17d   : > { %1490 = vst.msk [vmem:[%s2132_s4 + $0xdc] sm:$0xf] %vm1434_vm2, %v1768_v59  ;;  %v831_v0 = vadd.f32 %v2122_v17, %v830_v60  ;;  %v959_v1 = vadd.f32 %v2122_v17, %v958_v61  ;;  %v832_v2 = vpop.f32.mrb[51].mxu0  ;;  %v960_v3 = vpop.f32.mrb[51].mxu1 }
 0x17e   : > { %v1138_v4 = vsel %vm1010_vm4, %v828_v55, %v1074_v62  ;;  %v1170_v5 = vsel %vm1042_vm5, %v956_v56, %v1106_v63 }
 0x17f   : > { %v1737_v6 = vpack.c.bf16 %v1138_v4, %v1138_v4  ;;  %v1769_v7 = vpack.c.bf16 %v1170_v5, %v1170_v5  ;;  %vm1011_vm6 = vcmp.gt.f32.partialorder %v831_v0, 0.0  ;;  %v1075_v8 = vmul.f32 0.2, %v831_v0 }
 0x180   : > { %vm1043_vm7 = vcmp.gt.f32.partialorder %v959_v1, 0.0  ;;  %v1107_v9 = vmul.f32 0.2, %v959_v1 }
 0x181   : > { %1459 = vst.msk [vmem:[%s2132_s4 + $0x60] sm:$0xf] %vm1434_vm2, %v1737_v6  ;;  %1491 = vst.msk [vmem:[%s2132_s4 + $0xe0] sm:$0xf] %vm1434_vm2, %v1769_v7  ;;  %v1139_v10 = vsel %vm1011_vm6, %v831_v0, %v1075_v8  ;;  %v835_v11 = vpop.f32.mrb[52].mxu0  ;;  %v963_v12 = vpop.f32.mrb[52].mxu1 }
 0x182   : > { %v1738_v13 = vpack.c.bf16 %v1139_v10, %v1139_v10  ;;  %v1171_v14 = vsel %vm1043_vm7, %v959_v1, %v1107_v9  ;;  %v836_v15 = vadd.f32 %v2122_v17, %v835_v11  ;;  %v964_v16 = vadd.f32 %v2122_v17, %v963_v12  ;;  %v837_v18 = vpop.f32.mrb[53].mxu0  ;;  %v965_v19 = vpop.f32.mrb[53].mxu1 }
 0x183   : > { %v1770_v20 = vpack.c.bf16 %v1171_v14, %v1171_v14  ;;  %v838_v21 = vpop.f32.mrb[54].mxu0  ;;  %v966_v22 = vpop.f32.mrb[54].mxu1 }
 0x184   : > { %1460 = vst.msk [vmem:[%s2132_s4 + $0x64] sm:$0xf] %vm1434_vm2, %v1738_v13  ;;  %vm1012_vm8 = vcmp.gt.f32.partialorder %v836_v15, 0.0  ;;  %v1076_v23 = vmul.f32 0.2, %v836_v15  ;;  %vm1044_vm9 = vcmp.gt.f32.partialorder %v964_v16, 0.0  ;;  %v839_v25 = vadd.f32 %v2122_v17, %v838_v21 }
 0x185   : > { %v1108_v24 = vmul.f32 0.2, %v964_v16  ;;  %1492 = vst.msk [vmem:[%s2132_s4 + $0xe4] sm:$0xf] %vm1434_vm2, %v1770_v20  ;;  %v967_v26 = vadd.f32 %v2122_v17, %v966_v22  ;;  %v840_v27 = vpop.f32.mrb[55].mxu0  ;;  %v968_v28 = vpop.f32.mrb[55].mxu1 }
 0x186   : > { %v1140_v29 = vsel %vm1012_vm8, %v836_v15, %v1076_v23  ;;  %vm1013_vm10 = vcmp.gt.f32.partialorder %v839_v25, 0.0  ;;  %v1077_v33 = vmul.f32 0.2, %v839_v25 }
 0x187   : > { %v1172_v30 = vsel %vm1044_vm9, %v964_v16, %v1108_v24  ;;  %v1739_v31 = vpack.c.bf16 %v1140_v29, %v1140_v29  ;;  %vm1045_vm11 = vcmp.gt.f32.partialorder %v967_v26, 0.0  ;;  %v1109_v34 = vmul.f32 0.2, %v967_v26 }
 0x188   : > { %v1771_v32 = vpack.c.bf16 %v1172_v30, %v1172_v30  ;;  %v1141_v35 = vsel %vm1013_vm10, %v839_v25, %v1077_v33 }
 0x189   : > { %1461 = vst.msk [vmem:[%s2132_s4 + $0x68] sm:$0xf] %vm1434_vm2, %v1739_v31  ;;  %v843_v36 = vpop.f32.mrb[56].mxu0  ;;  %v971_v37 = vpop.f32.mrb[56].mxu1  ;;  %v1740_v38 = vpack.c.bf16 %v1141_v35, %v1141_v35  ;;  %v1173_v39 = vsel %vm1045_vm11, %v967_v26, %v1109_v34 }
 0x18a   : > { %1493 = vst.msk [vmem:[%s2132_s4 + $0xe8] sm:$0xf] %vm1434_vm2, %v1771_v32  ;;  %v844_v40 = vadd.f32 %v2122_v17, %v843_v36  ;;  %v972_v41 = vadd.f32 %v2122_v17, %v971_v37  ;;  %v845_v42 = vpop.f32.mrb[57].mxu0  ;;  %v973_v43 = vpop.f32.mrb[57].mxu1  ;;  %v1772_v44 = vpack.c.bf16 %v1173_v39, %v1173_v39 }
 0x18b   : > { %v846_v45 = vpop.f32.mrb[58].mxu0  ;;  %v974_v46 = vpop.f32.mrb[58].mxu1  ;;  %1462 = vst.msk [vmem:[%s2132_s4 + $0x6c] sm:$0xf] %vm1434_vm2, %v1740_v38 }
 0x18c   : > { %vm1014_vm12 = vcmp.gt.f32.partialorder %v844_v40, 0.0  ;;  %v1078_v47 = vmul.f32 0.2, %v844_v40  ;;  %vm1046_vm13 = vcmp.gt.f32.partialorder %v972_v41, 0.0  ;;  %v1110_v48 = vmul.f32 0.2, %v972_v41 }
 0x18d   : > { %1494 = vst.msk [vmem:[%s2132_s4 + $0xec] sm:$0xf] %vm1434_vm2, %v1772_v44  ;;  %v847_v49 = vadd.f32 %v2122_v17, %v846_v45  ;;  %v975_v50 = vadd.f32 %v2122_v17, %v974_v46  ;;  %v848_v51 = vpop.f32.mrb[59].mxu0  ;;  %v976_v52 = vpop.f32.mrb[59].mxu1 }
 0x18e   : > { %v1142_v53 = vsel %vm1014_vm12, %v844_v40, %v1078_v47  ;;  %v1174_v54 = vsel %vm1046_vm13, %v972_v41, %v1110_v48 }
 0x18f   : > { %v1741_v55 = vpack.c.bf16 %v1142_v53, %v1142_v53  ;;  %v1773_v56 = vpack.c.bf16 %v1174_v54, %v1174_v54  ;;  %vm1015_vm14 = vcmp.gt.f32.partialorder %v847_v49, 0.0  ;;  %v1079_v57 = vmul.f32 0.2, %v847_v49 }
 0x190   : > { %vm1047_vm15 = vcmp.gt.f32.partialorder %v975_v50, 0.0  ;;  %v1111_v58 = vmul.f32 0.2, %v975_v50 }
 0x191   : > { %1463 = vst.msk [vmem:[%s2132_s4 + $0x70] sm:$0xf] %vm1434_vm2, %v1741_v55  ;;  %1495 = vst.msk [vmem:[%s2132_s4 + $0xf0] sm:$0xf] %vm1434_vm2, %v1773_v56  ;;  %v1143_v59 = vsel %vm1015_vm14, %v847_v49, %v1079_v57  ;;  %v851_v60 = vpop.f32.mrb[60].mxu0  ;;  %v979_v61 = vpop.f32.mrb[60].mxu1 }
 0x192   : > { %v1742_v62 = vpack.c.bf16 %v1143_v59, %v1143_v59  ;;  %v1175_v63 = vsel %vm1047_vm15, %v975_v50, %v1111_v58  ;;  %v852_v0 = vadd.f32 %v2122_v17, %v851_v60  ;;  %v980_v1 = vadd.f32 %v2122_v17, %v979_v61  ;;  %v853_v2 = vpop.f32.mrb[61].mxu0  ;;  %v981_v3 = vpop.f32.mrb[61].mxu1 }
 0x193   : > { %v1774_v4 = vpack.c.bf16 %v1175_v63, %v1175_v63  ;;  %v854_v5 = vpop.f32.mrb[62].mxu0  ;;  %v982_v6 = vpop.f32.mrb[62].mxu1 }
 0x194   : > { %1464 = vst.msk [vmem:[%s2132_s4 + $0x74] sm:$0xf] %vm1434_vm2, %v1742_v62  ;;  %vm1016_vm0 = vcmp.gt.f32.partialorder %v852_v0, 0.0  ;;  %v1080_v7 = vmul.f32 0.2, %v852_v0  ;;  %vm1048_vm1 = vcmp.gt.f32.partialorder %v980_v1, 0.0  ;;  %v855_v9 = vadd.f32 %v2122_v17, %v854_v5 }
 0x195   : > { %v1112_v8 = vmul.f32 0.2, %v980_v1  ;;  %1496 = vst.msk [vmem:[%s2132_s4 + $0xf4] sm:$0xf] %vm1434_vm2, %v1774_v4  ;;  %v983_v10 = vadd.f32 %v2122_v17, %v982_v6  ;;  %v856_v11 = vpop.f32.mrb[63].mxu0  ;;  %v984_v12 = vpop.f32.mrb[63].mxu1 }
 0x196   : > { %v1144_v13 = vsel %vm1016_vm0, %v852_v0, %v1080_v7  ;;  %vm1017_vm3 = vcmp.gt.f32.partialorder %v855_v9, 0.0  ;;  %v1081_v18 = vmul.f32 0.2, %v855_v9 }
 0x197   : > { %v1176_v14 = vsel %vm1048_vm1, %v980_v1, %v1112_v8  ;;  %v1743_v15 = vpack.c.bf16 %v1144_v13, %v1144_v13  ;;  %vm1049_vm4 = vcmp.gt.f32.partialorder %v983_v10, 0.0  ;;  %v1113_v19 = vmul.f32 0.2, %v983_v10 }
 0x198   : > { %v1775_v16 = vpack.c.bf16 %v1176_v14, %v1176_v14  ;;  %v1145_v20 = vsel %vm1017_vm3, %v855_v9, %v1081_v18 }
 0x199   : > { %1465 = vst.msk [vmem:[%s2132_s4 + $0x78] sm:$0xf] %vm1434_vm2, %v1743_v15  ;;  %v1744_v21 = vpack.c.bf16 %v1145_v20, %v1145_v20  ;;  %v1177_v22 = vsel %vm1049_vm4, %v983_v10, %v1113_v19 }
 0x19a   : > { %1497 = vst.msk [vmem:[%s2132_s4 + $0xf8] sm:$0xf] %vm1434_vm2, %v1775_v16  ;;  %v1776_v17 = vpack.c.bf16 %v1177_v22, %v1177_v22 }
 0x19b   : > { %1466 = vst.msk [vmem:[%s2132_s4 + $0x7c] sm:$0xf] %vm1434_vm2, %v1744_v21 }
 0x19c   : > { %1498 = vst.msk [vmem:[%s2132_s4 + $0xfc] sm:$0xf] %vm1434_vm2, %v1776_v17 }
 0x19d PF: > { %s13_s12 = sadd.s32 1, %s1936_s12  }
 0x19e   : > { %p10_p4 = scmp.ge.s32.totalorder %s13_s12, 6  }
 0x1a0   :  { %12 = sbr.rel (!%p10_p4) target bundleno = 1 (0x1), region = 62 }

// kernel: forward.8
= control target key start
LH: loop header
LB: loop body
LE: loop exit
PB: predicated region body
PF: predicated region fallthrough
CT: control target
= control target key end

     0   :  { %v2784_v0 = vmov 0   ;;  %vm2072_vm1 = vcmask 519168   ;;  %s3647_s1 = inlined_call_operand.vmem [shape: bf16[512,64], index: 1, kind: input, shape index: {}]   ;;  %s3648_s0 = inlined_call_operand.vmem [shape: bf16[512,512], index: 0, kind: input, shape index: {}]   ;;  %s3649_s2 = inlined_call_operand.vmem [shape: f32[1,64], index: 2, kind: input, shape index: {}]   ;;  %s3650_s3 = inlined_call_operand.vmem [shape: bf16[512,64], index: 3, kind: output, shape index: {}]  }
   0x1   :  { %1046 = vmatprep.subr.bf16.mxu1 %v2784_v0  ;;  %1335 = vmatprep.subr.bf16.mxu0 %v2784_v0  ;;  %v2559_v1 = vld [vmem:[%s3647_s1] sm:$0xff]   ;;  %v2561_v3 = vld [vmem:[%s3647_s1 + $0x8] sm:$0xff]   ;;  %v2563_v5 = vld [vmem:[%s3647_s1 + $0x10] sm:$0xff]  }
   0x2   :  { %v2560_v2 = vld [vmem:[%s3647_s1 + $0x80] sm:$0xff]   ;;  %1047 = vmatpush1.bf16.msra.mxu1 %v2559_v1  ;;  %v2562_v4 = vld [vmem:[%s3647_s1 + $0x88] sm:$0xff]   ;;  %v2564_v6 = vld [vmem:[%s3647_s1 + $0x90] sm:$0xff]  }
   0x3   :  { %1336 = vmatpush1.bf16.msra.mxu0 %v2560_v2  ;;  %1048 = vmatprep.subr.bf16.mxu1 %v2784_v0  ;;  %v2565_v7 = vld [vmem:[%s3647_s1 + $0x18] sm:$0xff]   ;;  %v2567_v9 = vld [vmem:[%s3647_s1 + $0x20] sm:$0xff]   ;;  %v2569_v11 = vld [vmem:[%s3647_s1 + $0x28] sm:$0xff]  }
   0x4   :  { %1337 = vmatprep.subr.bf16.mxu0 %v2784_v0  ;;  %v2566_v8 = vld [vmem:[%s3647_s1 + $0x98] sm:$0xff]   ;;  %v2568_v10 = vld [vmem:[%s3647_s1 + $0xa0] sm:$0xff]   ;;  %v2570_v12 = vld [vmem:[%s3647_s1 + $0xa8] sm:$0xff]  }
   0x5   :  { %v2571_v13 = vld [vmem:[%s3647_s1 + $0x30] sm:$0xff]   ;;  %v2573_v15 = vld [vmem:[%s3647_s1 + $0x38] sm:$0xff]   ;;  %v2575_v17 = vld [vmem:[%s3647_s1 + $0x40] sm:$0xff]  }
   0x6   :  { %1049 = vmatpush1.bf16.msra.mxu1 %v2561_v3  ;;  %v2572_v14 = vld [vmem:[%s3647_s1 + $0xb0] sm:$0xff]   ;;  %v2574_v16 = vld [vmem:[%s3647_s1 + $0xb8] sm:$0xff]   ;;  %v2576_v18 = vld [vmem:[%s3647_s1 + $0xc0] sm:$0xff]  }
   0x7   :  { %1338 = vmatpush1.bf16.msra.mxu0 %v2562_v4  ;;  %1050 = vmatprep.subr.bf16.mxu1 %v2784_v0  ;;  %v2593_v19 = vld [vmem:[%s3648_s0 + $0x4] ss:$16 sps:$4 sm:$0xff]   ;;  %v2577_v20 = vld [vmem:[%s3647_s1 + $0x48] sm:$0xff]   ;;  %v2581_v25 = vld [vmem:[%s3647_s1 + $0x58] sm:$0xff]  }
   0x8   :  { %1339 = vmatprep.subr.bf16.mxu0 %v2784_v0  ;;  %v2596_v21 = vld [vmem:[%s3648_s0 + $0xc] ss:$16 sps:$4 sm:$0xff]   ;;  %1078 = vmatprep.mubr.bf16.mxu1 %v2593_v19  ;;  %v2579_v23 = vld [vmem:[%s3647_s1 + $0x50] sm:$0xff]   ;;  %v2583_v27 = vld [vmem:[%s3647_s1 + $0x60] sm:$0xff]  }
   0x9   :  { %v2578_v22 = vld [vmem:[%s3647_s1 + $0xc8] sm:$0xff]   ;;  %1367 = vmatprep.mubr.bf16.mxu0 %v2596_v21  ;;  %v2580_v24 = vld [vmem:[%s3647_s1 + $0xd0] sm:$0xff]   ;;  %v2582_v26 = vld [vmem:[%s3647_s1 + $0xd8] sm:$0xff]  }
   0xa   :  { %1051 = vmatpush1.bf16.msra.mxu1 %v2563_v5  ;;  %v2584_v28 = vld [vmem:[%s3647_s1 + $0xe0] sm:$0xff]   ;;  %v2585_v29 = vld [vmem:[%s3647_s1 + $0x68] sm:$0xff]   ;;  %v2587_v31 = vld [vmem:[%s3647_s1 + $0x70] sm:$0xff]  }
   0xb   :  { %1340 = vmatpush1.bf16.msra.mxu0 %v2564_v6  ;;  %1052 = vmatprep.subr.bf16.mxu1 %v2784_v0  ;;  %v2586_v30 = vld [vmem:[%s3647_s1 + $0xe8] sm:$0xff]   ;;  %v2588_v32 = vld [vmem:[%s3647_s1 + $0xf0] sm:$0xff]   ;;  %v2589_v33 = vld [vmem:[%s3647_s1 + $0x78] sm:$0xff]  }
   0xc   :  { %1341 = vmatprep.subr.bf16.mxu0 %v2784_v0  ;;  %v2590_v34 = vld [vmem:[%s3647_s1 + $0xf8] sm:$0xff]   ;;  %v2591_v35 = vld [vmem:[%s3648_s0] ss:$16 sps:$4 sm:$0xff]   ;;  %v2597_v37 = vld [vmem:[%s3648_s0 + $0x24] ss:$16 sps:$4 sm:$0xff]  }
   0xd   :  { %v2594_v36 = vld [vmem:[%s3648_s0 + $0x8] ss:$16 sps:$4 sm:$0xff]   ;;  %v2599_v38 = vld [vmem:[%s3648_s0 + $0x2c] ss:$16 sps:$4 sm:$0xff]   ;;  %v2601_v39 = vld [vmem:[%s3648_s0 + $0x20] ss:$16 sps:$4 sm:$0xff]  }
   0xe   :  { %1053 = vmatpush1.bf16.msra.mxu1 %v2565_v7  ;;  %v2602_v40 = vld [vmem:[%s3648_s0 + $0x28] ss:$16 sps:$4 sm:$0xff]   ;;  %v2603_v41 = vld [vmem:[%s3648_s0 + $0x44] ss:$16 sps:$4 sm:$0xff]   ;;  %v2605_v42 = vld [vmem:[%s3648_s0 + $0x4c] ss:$16 sps:$4 sm:$0xff]  }
   0xf   :  { %1342 = vmatpush1.bf16.msra.mxu0 %v2566_v8  ;;  %1054 = vmatprep.subr.bf16.mxu1 %v2784_v0  ;;  %v2607_v43 = vld [vmem:[%s3648_s0 + $0x40] ss:$16 sps:$4 sm:$0xff]   ;;  %v2608_v44 = vld [vmem:[%s3648_s0 + $0x48] ss:$16 sps:$4 sm:$0xff]   ;;  %v2609_v45 = vld [vmem:[%s3648_s0 + $0x64] ss:$16 sps:$4 sm:$0xff]  }
  0x10   :  { %1343 = vmatprep.subr.bf16.mxu0 %v2784_v0  ;;  %v2611_v46 = vld [vmem:[%s3648_s0 + $0x6c] ss:$16 sps:$4 sm:$0xff]   ;;  %v2613_v47 = vld [vmem:[%s3648_s0 + $0x60] ss:$16 sps:$4 sm:$0xff]   ;;  %v2614_v48 = vld [vmem:[%s3648_s0 + $0x68] ss:$16 sps:$4 sm:$0xff]  }
  0x11   :  { %v2615_v49 = vld [vmem:[%s3648_s0 + $0x84] ss:$16 sps:$4 sm:$0xff]   ;;  %v2617_v50 = vld [vmem:[%s3648_s0 + $0x8c] ss:$16 sps:$4 sm:$0xff]   ;;  %v2619_v51 = vld [vmem:[%s3648_s0 + $0x80] ss:$16 sps:$4 sm:$0xff]  }
  0x12   :  { %1055 = vmatpush1.bf16.msra.mxu1 %v2567_v9  ;;  %v2620_v52 = vld [vmem:[%s3648_s0 + $0x88] ss:$16 sps:$4 sm:$0xff]   ;;  %v2621_v53 = vld [vmem:[%s3648_s0 + $0xa4] ss:$16 sps:$4 sm:$0xff]   ;;  %v2623_v54 = vld [vmem:[%s3648_s0 + $0xac] ss:$16 sps:$4 sm:$0xff]  }
  0x13   :  { %1344 = vmatpush1.bf16.msra.mxu0 %v2568_v10  ;;  %1056 = vmatprep.subr.bf16.mxu1 %v2784_v0  ;;  %v2625_v55 = vld [vmem:[%s3648_s0 + $0xa0] ss:$16 sps:$4 sm:$0xff]   ;;  %v2626_v56 = vld [vmem:[%s3648_s0 + $0xa8] ss:$16 sps:$4 sm:$0xff]   ;;  %v2627_v57 = vld [vmem:[%s3648_s0 + $0xc4] ss:$16 sps:$4 sm:$0xff]  }
  0x14   :  { %1345 = vmatprep.subr.bf16.mxu0 %v2784_v0  ;;  %v2629_v58 = vld [vmem:[%s3648_s0 + $0xcc] ss:$16 sps:$4 sm:$0xff]   ;;  %v2631_v59 = vld [vmem:[%s3648_s0 + $0xc0] ss:$16 sps:$4 sm:$0xff]   ;;  %v2632_v60 = vld [vmem:[%s3648_s0 + $0xc8] ss:$16 sps:$4 sm:$0xff]  }
  0x15   :  { %v2633_v61 = vld [vmem:[%s3648_s0 + $0xe4] ss:$16 sps:$4 sm:$0xff]   ;;  %v2635_v62 = vld [vmem:[%s3648_s0 + $0xec] ss:$16 sps:$4 sm:$0xff]   ;;  %v2637_v63 = vld [vmem:[%s3648_s0 + $0xe0] ss:$16 sps:$4 sm:$0xff]  }
  0x16   :  { %1057 = vmatpush1.bf16.msra.mxu1 %v2569_v11  ;;  %v2639_v1 = vld [vmem:[%s3648_s0 + $0x104] ss:$16 sps:$4 sm:$0xff]   ;;  %v2641_v2 = vld [vmem:[%s3648_s0 + $0x10c] ss:$16 sps:$4 sm:$0xff]   ;;  %v2643_v3 = vld [vmem:[%s3648_s0 + $0x100] ss:$16 sps:$4 sm:$0xff]  }
  0x17   :  { %1346 = vmatpush1.bf16.msra.mxu0 %v2570_v12  ;;  %1058 = vmatprep.subr.bf16.mxu1 %v2784_v0  ;;  %v2644_v4 = vld [vmem:[%s3648_s0 + $0x108] ss:$16 sps:$4 sm:$0xff]   ;;  %v2645_v5 = vld [vmem:[%s3648_s0 + $0x124] ss:$16 sps:$4 sm:$0xff]   ;;  %v2647_v6 = vld [vmem:[%s3648_s0 + $0x12c] ss:$16 sps:$4 sm:$0xff]  }
  0x18   :  { %1347 = vmatprep.subr.bf16.mxu0 %v2784_v0  ;;  %v2649_v7 = vld [vmem:[%s3648_s0 + $0x120] ss:$16 sps:$4 sm:$0xff]   ;;  %v2650_v8 = vld [vmem:[%s3648_s0 + $0x128] ss:$16 sps:$4 sm:$0xff]   ;;  %v2651_v9 = vld [vmem:[%s3648_s0 + $0x144] ss:$16 sps:$4 sm:$0xff]  }
  0x19   :  { %v2653_v10 = vld [vmem:[%s3648_s0 + $0x14c] ss:$16 sps:$4 sm:$0xff]   ;;  %v2655_v11 = vld [vmem:[%s3648_s0 + $0x140] ss:$16 sps:$4 sm:$0xff]   ;;  %v2656_v12 = vld [vmem:[%s3648_s0 + $0x148] ss:$16 sps:$4 sm:$0xff]  }
  0x1a   :  { %1059 = vmatpush1.bf16.msra.mxu1 %v2571_v13  ;;  %v2657_v13 = vld [vmem:[%s3648_s0 + $0x164] ss:$16 sps:$4 sm:$0xff]   ;;  %v2667_v19 = vld [vmem:[%s3648_s0 + $0x180] ss:$16 sps:$4 sm:$0xff]  }
  0x1b   :  { %1348 = vmatpush1.bf16.msra.mxu0 %v2572_v14  ;;  %1060 = vmatprep.subr.bf16.mxu1 %v2784_v0  ;;  %v2659_v14 = vld [vmem:[%s3648_s0 + $0x16c] ss:$16 sps:$4 sm:$0xff]   ;;  %v2669_v21 = vld [vmem:[%s3648_s0 + $0x1a4] ss:$16 sps:$4 sm:$0xff]  }
  0x1c   :  { %1349 = vmatprep.subr.bf16.mxu0 %v2784_v0 }
  0x1e   :  { %1061 = vmatpush1.bf16.msra.mxu1 %v2573_v15  ;;  %v2661_v15 = vld [vmem:[%s3648_s0 + $0x160] ss:$16 sps:$4 sm:$0xff]  }
  0x1f   :  { %1350 = vmatpush1.bf16.msra.mxu0 %v2574_v16  ;;  %1062 = vmatprep.subr.bf16.mxu1 %v2784_v0  ;;  %v2662_v16 = vld [vmem:[%s3648_s0 + $0x168] ss:$16 sps:$4 sm:$0xff]  }
  0x20   :  { %1351 = vmatprep.subr.bf16.mxu0 %v2784_v0 }
  0x22   :  { %1063 = vmatpush1.bf16.msra.mxu1 %v2575_v17  ;;  %v2663_v17 = vld [vmem:[%s3648_s0 + $0x184] ss:$16 sps:$4 sm:$0xff]  }
  0x23   :  { %1352 = vmatpush1.bf16.msra.mxu0 %v2576_v18  ;;  %1064 = vmatprep.subr.bf16.mxu1 %v2784_v0  ;;  %v2665_v18 = vld [vmem:[%s3648_s0 + $0x18c] ss:$16 sps:$4 sm:$0xff]  }
  0x24   :  { %1353 = vmatprep.subr.bf16.mxu0 %v2784_v0 }
  0x26   :  { %1065 = vmatpush1.bf16.msra.mxu1 %v2577_v20  ;;  %v2668_v20 = vld [vmem:[%s3648_s0 + $0x188] ss:$16 sps:$4 sm:$0xff]  }
  0x27   :  { %1354 = vmatpush1.bf16.msra.mxu0 %v2578_v22  ;;  %1066 = vmatprep.subr.bf16.mxu1 %v2784_v0  ;;  %v2671_v22 = vld [vmem:[%s3648_s0 + $0x1ac] ss:$16 sps:$4 sm:$0xff]  }
  0x28   :  { %1355 = vmatprep.subr.bf16.mxu0 %v2784_v0 }
  0x2a   :  { %1067 = vmatpush1.bf16.msra.mxu1 %v2579_v23  ;;  %v2673_v23 = vld [vmem:[%s3648_s0 + $0x1a0] ss:$16 sps:$4 sm:$0xff]  }
  0x2b   :  { %1356 = vmatpush1.bf16.msra.mxu0 %v2580_v24  ;;  %1068 = vmatprep.subr.bf16.mxu1 %v2784_v0  ;;  %v2674_v24 = vld [vmem:[%s3648_s0 + $0x1a8] ss:$16 sps:$4 sm:$0xff]  }
  0x2c   :  { %1357 = vmatprep.subr.bf16.mxu0 %v2784_v0 }
  0x2e   :  { %1069 = vmatpush1.bf16.msra.mxu1 %v2581_v25  ;;  %v2675_v25 = vld [vmem:[%s3648_s0 + $0x1c4] ss:$16 sps:$4 sm:$0xff]  }
  0x2f   :  { %1358 = vmatpush1.bf16.msra.mxu0 %v2582_v26  ;;  %1070 = vmatprep.subr.bf16.mxu1 %v2784_v0  ;;  %v2677_v26 = vld [vmem:[%s3648_s0 + $0x1cc] ss:$16 sps:$4 sm:$0xff]  }
  0x30   :  { %1359 = vmatprep.subr.bf16.mxu0 %v2784_v0 }
  0x32   :  { %1071 = vmatpush1.bf16.msra.mxu1 %v2583_v27  ;;  %v2679_v27 = vld [vmem:[%s3648_s0 + $0x1c0] ss:$16 sps:$4 sm:$0xff]  }
  0x33   :  { %1360 = vmatpush1.bf16.msra.mxu0 %v2584_v28  ;;  %1072 = vmatprep.subr.bf16.mxu1 %v2784_v0  ;;  %v2680_v28 = vld [vmem:[%s3648_s0 + $0x1c8] ss:$16 sps:$4 sm:$0xff]  }
  0x34   :  { %1361 = vmatprep.subr.bf16.mxu0 %v2784_v0 }
  0x36   :  { %1073 = vmatpush1.bf16.msra.mxu1 %v2585_v29  ;;  %v2681_v29 = vld [vmem:[%s3648_s0 + $0x1e4] ss:$16 sps:$4 sm:$0xff]  }
  0x37   :  { %1362 = vmatpush1.bf16.msra.mxu0 %v2586_v30  ;;  %1074 = vmatprep.subr.bf16.mxu1 %v2784_v0  ;;  %v2683_v30 = vld [vmem:[%s3648_s0 + $0x1ec] ss:$16 sps:$4 sm:$0xff]  }
  0x38   :  { %1363 = vmatprep.subr.bf16.mxu0 %v2784_v0 }
  0x3a   :  { %1075 = vmatpush1.bf16.msra.mxu1 %v2587_v31  ;;  %v2685_v31 = vld [vmem:[%s3648_s0 + $0x1e0] ss:$16 sps:$4 sm:$0xff]  }
  0x3b   :  { %1364 = vmatpush1.bf16.msra.mxu0 %v2588_v32  ;;  %1076 = vmatprep.subr.bf16.mxu1 %v2784_v0  ;;  %v2686_v32 = vld [vmem:[%s3648_s0 + $0x1e8] ss:$16 sps:$4 sm:$0xff]  }
  0x3c   :  { %1365 = vmatprep.subr.bf16.mxu0 %v2784_v0  ;;  %v2638_v0 = vld [vmem:[%s3648_s0 + $0xe8] ss:$16 sps:$4 sm:$0xff]  }
  0x3e   :  { %1077 = vmatpush1.bf16.msra.mxu1 %v2589_v33  ;;  %v2687_v33 = vld [vmem:[%s3648_s0 + $0x204] ss:$16 sps:$4 sm:$0xff]  }
  0x3f   :  { %1366 = vmatpush1.bf16.msra.mxu0 %v2590_v34  ;;  %v2689_v34 = vld [vmem:[%s3648_s0 + $0x20c] ss:$16 sps:$4 sm:$0xff]  }
  0x41   :  { %1079 = vmatmul.mubr.bf16.vlgmr.msra.gmra.mrb[0].mxu1 %v2591_v35  ;;  %v2691_v35 = vld [vmem:[%s3648_s0 + $0x200] ss:$16 sps:$4 sm:$0xff]  }
  0x42   :  { %1368 = vmatmul.mubr.bf16.vlgmr.msra.gmra.mrb[0].mxu0 %v2594_v36  ;;  %1086 = vmatprep.mubr.bf16.mxu1 %v2597_v37  ;;  %v2692_v36 = vld [vmem:[%s3648_s0 + $0x208] ss:$16 sps:$4 sm:$0xff]   ;;  %v2693_v37 = vld [vmem:[%s3648_s0 + $0x224] ss:$16 sps:$4 sm:$0xff]  }
  0x43   :  { %1375 = vmatprep.mubr.bf16.mxu0 %v2599_v38  ;;  %v2695_v38 = vld [vmem:[%s3648_s0 + $0x22c] ss:$16 sps:$4 sm:$0xff]  }
  0x49   :  { %1087 = vmatmul.mubr.bf16.gmra.mrb[4].mxu1 %v2601_v39  ;;  %v2697_v39 = vld [vmem:[%s3648_s0 + $0x220] ss:$16 sps:$4 sm:$0xff]  }
  0x4a   :  { %1376 = vmatmul.mubr.bf16.gmra.mrb[4].mxu0 %v2602_v40  ;;  %1094 = vmatprep.mubr.bf16.mxu1 %v2603_v41  ;;  %v2698_v40 = vld [vmem:[%s3648_s0 + $0x228] ss:$16 sps:$4 sm:$0xff]   ;;  %v2699_v41 = vld [vmem:[%s3648_s0 + $0x244] ss:$16 sps:$4 sm:$0xff]  }
  0x4b   :  { %1383 = vmatprep.mubr.bf16.mxu0 %v2605_v42  ;;  %v2701_v42 = vld [vmem:[%s3648_s0 + $0x24c] ss:$16 sps:$4 sm:$0xff]  }
  0x51   :  { %1095 = vmatmul.mubr.bf16.gmra.mrb[8].mxu1 %v2607_v43  ;;  %v2703_v43 = vld [vmem:[%s3648_s0 + $0x240] ss:$16 sps:$4 sm:$0xff]  }
  0x52   :  { %1384 = vmatmul.mubr.bf16.gmra.mrb[8].mxu0 %v2608_v44  ;;  %1102 = vmatprep.mubr.bf16.mxu1 %v2609_v45  ;;  %v2704_v44 = vld [vmem:[%s3648_s0 + $0x248] ss:$16 sps:$4 sm:$0xff]   ;;  %v2705_v45 = vld [vmem:[%s3648_s0 + $0x264] ss:$16 sps:$4 sm:$0xff]  }
  0x53   :  { %1391 = vmatprep.mubr.bf16.mxu0 %v2611_v46  ;;  %v2707_v46 = vld [vmem:[%s3648_s0 + $0x26c] ss:$16 sps:$4 sm:$0xff]  }
  0x59   :  { %1103 = vmatmul.mubr.bf16.gmra.mrb[12].mxu1 %v2613_v47  ;;  %v2709_v47 = vld [vmem:[%s3648_s0 + $0x260] ss:$16 sps:$4 sm:$0xff]  }
  0x5a   :  { %1392 = vmatmul.mubr.bf16.gmra.mrb[12].mxu0 %v2614_v48  ;;  %1110 = vmatprep.mubr.bf16.mxu1 %v2615_v49  ;;  %v2710_v48 = vld [vmem:[%s3648_s0 + $0x268] ss:$16 sps:$4 sm:$0xff]   ;;  %v2711_v49 = vld [vmem:[%s3648_s0 + $0x284] ss:$16 sps:$4 sm:$0xff]  }
  0x5b   :  { %1399 = vmatprep.mubr.bf16.mxu0 %v2617_v50  ;;  %v2713_v50 = vld [vmem:[%s3648_s0 + $0x28c] ss:$16 sps:$4 sm:$0xff]  }
  0x61   :  { %1111 = vmatmul.mubr.bf16.gmra.mrb[16].mxu1 %v2619_v51  ;;  %v2715_v51 = vld [vmem:[%s3648_s0 + $0x280] ss:$16 sps:$4 sm:$0xff]  }
  0x62   :  { %1400 = vmatmul.mubr.bf16.gmra.mrb[16].mxu0 %v2620_v52  ;;  %1118 = vmatprep.mubr.bf16.mxu1 %v2621_v53  ;;  %v2716_v52 = vld [vmem:[%s3648_s0 + $0x288] ss:$16 sps:$4 sm:$0xff]   ;;  %v2717_v53 = vld [vmem:[%s3648_s0 + $0x2a4] ss:$16 sps:$4 sm:$0xff]  }
  0x63   :  { %1407 = vmatprep.mubr.bf16.mxu0 %v2623_v54  ;;  %v2719_v54 = vld [vmem:[%s3648_s0 + $0x2ac] ss:$16 sps:$4 sm:$0xff]  }
  0x69   :  { %1119 = vmatmul.mubr.bf16.gmra.mrb[20].mxu1 %v2625_v55  ;;  %v2721_v55 = vld [vmem:[%s3648_s0 + $0x2a0] ss:$16 sps:$4 sm:$0xff]  }
  0x6a   :  { %1408 = vmatmul.mubr.bf16.gmra.mrb[20].mxu0 %v2626_v56  ;;  %1126 = vmatprep.mubr.bf16.mxu1 %v2627_v57  ;;  %v2722_v56 = vld [vmem:[%s3648_s0 + $0x2a8] ss:$16 sps:$4 sm:$0xff]   ;;  %v2723_v57 = vld [vmem:[%s3648_s0 + $0x2c4] ss:$16 sps:$4 sm:$0xff]  }
  0x6b   :  { %1415 = vmatprep.mubr.bf16.mxu0 %v2629_v58  ;;  %v2725_v58 = vld [vmem:[%s3648_s0 + $0x2cc] ss:$16 sps:$4 sm:$0xff]  }
  0x71   :  { %1127 = vmatmul.mubr.bf16.gmra.mrb[24].mxu1 %v2631_v59  ;;  %v2727_v59 = vld [vmem:[%s3648_s0 + $0x2c0] ss:$16 sps:$4 sm:$0xff]  }
  0x72   :  { %1416 = vmatmul.mubr.bf16.gmra.mrb[24].mxu0 %v2632_v60  ;;  %1134 = vmatprep.mubr.bf16.mxu1 %v2633_v61  ;;  %v2728_v60 = vld [vmem:[%s3648_s0 + $0x2c8] ss:$16 sps:$4 sm:$0xff]   ;;  %v2729_v61 = vld [vmem:[%s3648_s0 + $0x2e4] ss:$16 sps:$4 sm:$0xff]  }
  0x73   :  { %1423 = vmatprep.mubr.bf16.mxu0 %v2635_v62  ;;  %v2731_v62 = vld [vmem:[%s3648_s0 + $0x2ec] ss:$16 sps:$4 sm:$0xff]  }
  0x79   :  { %1135 = vmatmul.mubr.bf16.gmra.mrb[28].mxu1 %v2637_v63  ;;  %v2733_v63 = vld [vmem:[%s3648_s0 + $0x2e0] ss:$16 sps:$4 sm:$0xff]  }
  0x7a   :  { %1424 = vmatmul.mubr.bf16.gmra.mrb[28].mxu0 %v2638_v0  ;;  %1142 = vmatprep.mubr.bf16.mxu1 %v2639_v1  ;;  %v2734_v0 = vld [vmem:[%s3648_s0 + $0x2e8] ss:$16 sps:$4 sm:$0xff]   ;;  %v2735_v1 = vld [vmem:[%s3648_s0 + $0x304] ss:$16 sps:$4 sm:$0xff]  }
  0x7b   :  { %1431 = vmatprep.mubr.bf16.mxu0 %v2641_v2  ;;  %v2737_v2 = vld [vmem:[%s3648_s0 + $0x30c] ss:$16 sps:$4 sm:$0xff]  }
  0x81   :  { %1143 = vmatmul.mubr.bf16.gmra.mrb[32].mxu1 %v2643_v3  ;;  %v2739_v3 = vld [vmem:[%s3648_s0 + $0x300] ss:$16 sps:$4 sm:$0xff]  }
  0x82   :  { %1432 = vmatmul.mubr.bf16.gmra.mrb[32].mxu0 %v2644_v4  ;;  %1150 = vmatprep.mubr.bf16.mxu1 %v2645_v5  ;;  %v2740_v4 = vld [vmem:[%s3648_s0 + $0x308] ss:$16 sps:$4 sm:$0xff]   ;;  %v2741_v5 = vld [vmem:[%s3648_s0 + $0x324] ss:$16 sps:$4 sm:$0xff]  }
  0x83   :  { %1439 = vmatprep.mubr.bf16.mxu0 %v2647_v6  ;;  %v2743_v6 = vld [vmem:[%s3648_s0 + $0x32c] ss:$16 sps:$4 sm:$0xff]  }
  0x89   :  { %1151 = vmatmul.mubr.bf16.gmra.mrb[36].mxu1 %v2649_v7  ;;  %v2745_v7 = vld [vmem:[%s3648_s0 + $0x320] ss:$16 sps:$4 sm:$0xff]  }
  0x8a   :  { %1440 = vmatmul.mubr.bf16.gmra.mrb[36].mxu0 %v2650_v8  ;;  %1158 = vmatprep.mubr.bf16.mxu1 %v2651_v9  ;;  %v2746_v8 = vld [vmem:[%s3648_s0 + $0x328] ss:$16 sps:$4 sm:$0xff]   ;;  %v2747_v9 = vld [vmem:[%s3648_s0 + $0x344] ss:$16 sps:$4 sm:$0xff]  }
  0x8b   :  { %1447 = vmatprep.mubr.bf16.mxu0 %v2653_v10  ;;  %v2749_v10 = vld [vmem:[%s3648_s0 + $0x34c] ss:$16 sps:$4 sm:$0xff]  }
  0x91   :  { %1159 = vmatmul.mubr.bf16.gmra.mrb[40].mxu1 %v2655_v11  ;;  %v2751_v11 = vld [vmem:[%s3648_s0 + $0x340] ss:$16 sps:$4 sm:$0xff]  }
  0x92   :  { %1448 = vmatmul.mubr.bf16.gmra.mrb[40].mxu0 %v2656_v12  ;;  %1166 = vmatprep.mubr.bf16.mxu1 %v2657_v13  ;;  %v2752_v12 = vld [vmem:[%s3648_s0 + $0x348] ss:$16 sps:$4 sm:$0xff]   ;;  %v2753_v13 = vld [vmem:[%s3648_s0 + $0x364] ss:$16 sps:$4 sm:$0xff]  }
  0x93   :  { %1455 = vmatprep.mubr.bf16.mxu0 %v2659_v14  ;;  %v2755_v14 = vld [vmem:[%s3648_s0 + $0x36c] ss:$16 sps:$4 sm:$0xff]  }
  0x99   :  { %1167 = vmatmul.mubr.bf16.gmra.mrb[44].mxu1 %v2661_v15  ;;  %v3266_v15 = vld [vmem:[%s3649_s2] ss:$0 sm:$0xff] }
  0x9a   :  { %1456 = vmatmul.mubr.bf16.gmra.mrb[44].mxu0 %v2662_v16  ;;  %1174 = vmatprep.mubr.bf16.mxu1 %v2663_v17 }
  0x9b   :  { %1463 = vmatprep.mubr.bf16.mxu0 %v2665_v18 }
  0xa1   :  { %1175 = vmatmul.mubr.bf16.gmra.mrb[48].mxu1 %v2667_v19 }
  0xa2   :  { %1464 = vmatmul.mubr.bf16.gmra.mrb[48].mxu0 %v2668_v20  ;;  %1182 = vmatprep.mubr.bf16.mxu1 %v2669_v21  ;;  %v2757_v20 = vld [vmem:[%s3648_s0 + $0x360] ss:$16 sps:$4 sm:$0xff]  }
  0xa3   :  { %1471 = vmatprep.mubr.bf16.mxu0 %v2671_v22 }
  0xa9   :  { %1183 = vmatmul.mubr.bf16.gmra.mrb[52].mxu1 %v2673_v23  ;;  %v2758_v23 = vld [vmem:[%s3648_s0 + $0x368] ss:$16 sps:$4 sm:$0xff]  }
  0xaa   :  { %1472 = vmatmul.mubr.bf16.gmra.mrb[52].mxu0 %v2674_v24  ;;  %1190 = vmatprep.mubr.bf16.mxu1 %v2675_v25  ;;  %v2759_v24 = vld [vmem:[%s3648_s0 + $0x384] ss:$16 sps:$4 sm:$0xff]  }
  0xab   :  { %1479 = vmatprep.mubr.bf16.mxu0 %v2677_v26 }
  0xb1   :  { %1191 = vmatmul.mubr.bf16.gmra.mrb[56].mxu1 %v2679_v27 }
  0xb2   :  { %1480 = vmatmul.mubr.bf16.gmra.mrb[56].mxu0 %v2680_v28  ;;  %1198 = vmatprep.mubr.bf16.mxu1 %v2681_v29  ;;  %v2761_v29 = vld [vmem:[%s3648_s0 + $0x38c] ss:$16 sps:$4 sm:$0xff]  }
  0xb3   :  { %1487 = vmatprep.mubr.bf16.mxu0 %v2683_v30 }
  0xb9   :  { %1199 = vmatmul.mubr.bf16.gmra.mrb[60].mxu1 %v2685_v31 }
  0xba   :  { %1488 = vmatmul.mubr.bf16.gmra.mrb[60].mxu0 %v2686_v32  ;;  %1206 = vmatprep.mubr.bf16.mxu1 %v2687_v33 }
  0xbb   :  { %1495 = vmatprep.mubr.bf16.mxu0 %v2689_v34 }
  0xc1   :  { %1207 = vmatmul.mubr.bf16.gmra.mrb[64].mxu1 %v2691_v35 }
  0xc2   :  { %1496 = vmatmul.mubr.bf16.gmra.mrb[64].mxu0 %v2692_v36  ;;  %1214 = vmatprep.mubr.bf16.mxu1 %v2693_v37 }
  0xc3   :  { %1503 = vmatprep.mubr.bf16.mxu0 %v2695_v38 }
  0xc9   :  { %1215 = vmatmul.mubr.bf16.gmra.mrb[68].mxu1 %v2697_v39 }
  0xca   :  { %1504 = vmatmul.mubr.bf16.gmra.mrb[68].mxu0 %v2698_v40  ;;  %1222 = vmatprep.mubr.bf16.mxu1 %v2699_v41  ;;  %v2763_v41 = vld [vmem:[%s3648_s0 + $0x380] ss:$16 sps:$4 sm:$0xff]  }
  0xcb   :  { %1511 = vmatprep.mubr.bf16.mxu0 %v2701_v42 }
  0xd1   :  { %1223 = vmatmul.mubr.bf16.gmra.mrb[72].mxu1 %v2703_v43 }
  0xd2   :  { %1512 = vmatmul.mubr.bf16.gmra.mrb[72].mxu0 %v2704_v44  ;;  %1230 = vmatprep.mubr.bf16.mxu1 %v2705_v45  ;;  %v2764_v45 = vld [vmem:[%s3648_s0 + $0x388] ss:$16 sps:$4 sm:$0xff]  }
  0xd3   :  { %1519 = vmatprep.mubr.bf16.mxu0 %v2707_v46  ;;  %v2765_v46 = vld [vmem:[%s3648_s0 + $0x3a4] ss:$16 sps:$4 sm:$0xff]  }
  0xd9   :  { %1231 = vmatmul.mubr.bf16.gmra.mrb[76].mxu1 %v2709_v47 }
  0xda   :  { %1520 = vmatmul.mubr.bf16.gmra.mrb[76].mxu0 %v2710_v48  ;;  %1238 = vmatprep.mubr.bf16.mxu1 %v2711_v49 }
  0xdb   :  { %1527 = vmatprep.mubr.bf16.mxu0 %v2713_v50 }
  0xe1   :  { %1239 = vmatmul.mubr.bf16.gmra.mrb[80].mxu1 %v2715_v51  ;;  %v2767_v51 = vld [vmem:[%s3648_s0 + $0x3ac] ss:$16 sps:$4 sm:$0xff]  }
  0xe2   :  { %1528 = vmatmul.mubr.bf16.gmra.mrb[80].mxu0 %v2716_v52  ;;  %1246 = vmatprep.mubr.bf16.mxu1 %v2717_v53 }
  0xe3   :  { %1535 = vmatprep.mubr.bf16.mxu0 %v2719_v54 }
  0xe9   :  { %1247 = vmatmul.mubr.bf16.gmra.mrb[84].mxu1 %v2721_v55 }
  0xea   :  { %1536 = vmatmul.mubr.bf16.gmra.mrb[84].mxu0 %v2722_v56  ;;  %1254 = vmatprep.mubr.bf16.mxu1 %v2723_v57 }
  0xeb   :  { %1543 = vmatprep.mubr.bf16.mxu0 %v2725_v58 }
  0xf1   :  { %1255 = vmatmul.mubr.bf16.gmra.mrb[88].mxu1 %v2727_v59 }
  0xf2   :  { %1544 = vmatmul.mubr.bf16.gmra.mrb[88].mxu0 %v2728_v60  ;;  %1262 = vmatprep.mubr.bf16.mxu1 %v2729_v61 }
  0xf3   :  { %1551 = vmatprep.mubr.bf16.mxu0 %v2731_v62 }
  0xf9   :  { %1263 = vmatmul.mubr.bf16.gmra.mrb[92].mxu1 %v2733_v63  ;;  %v2769_v63 = vld [vmem:[%s3648_s0 + $0x3a0] ss:$16 sps:$4 sm:$0xff]  }
  0xfa   :  { %1552 = vmatmul.mubr.bf16.gmra.mrb[92].mxu0 %v2734_v0  ;;  %1270 = vmatprep.mubr.bf16.mxu1 %v2735_v1 }
  0xfb   :  { %1559 = vmatprep.mubr.bf16.mxu0 %v2737_v2 }
 0x101   :  { %1271 = vmatmul.mubr.bf16.gmra.mrb[96].mxu1 %v2739_v3  ;;  %v2770_v3 = vld [vmem:[%s3648_s0 + $0x3a8] ss:$16 sps:$4 sm:$0xff]  }
 0x102   :  { %1560 = vmatmul.mubr.bf16.gmra.mrb[96].mxu0 %v2740_v4  ;;  %1278 = vmatprep.mubr.bf16.mxu1 %v2741_v5  ;;  %v2771_v4 = vld [vmem:[%s3648_s0 + $0x3c4] ss:$16 sps:$4 sm:$0xff]  }
 0x103   :  { %1567 = vmatprep.mubr.bf16.mxu0 %v2743_v6 }
 0x109   :  { %1279 = vmatmul.mubr.bf16.gmra.mrb[100].mxu1 %v2745_v7 }
 0x10a   :  { %1568 = vmatmul.mubr.bf16.gmra.mrb[100].mxu0 %v2746_v8  ;;  %1286 = vmatprep.mubr.bf16.mxu1 %v2747_v9  ;;  %v2773_v9 = vld [vmem:[%s3648_s0 + $0x3cc] ss:$16 sps:$4 sm:$0xff]  }
 0x10b   :  { %1575 = vmatprep.mubr.bf16.mxu0 %v2749_v10 }
 0x111   :  { %1287 = vmatmul.mubr.bf16.gmra.mrb[104].mxu1 %v2751_v11 }
 0x112   :  { %1576 = vmatmul.mubr.bf16.gmra.mrb[104].mxu0 %v2752_v12  ;;  %1294 = vmatprep.mubr.bf16.mxu1 %v2753_v13 }
 0x113   :  { %1583 = vmatprep.mubr.bf16.mxu0 %v2755_v14 }
 0x114   :  { %v1080_v16 = vpop.f32.mrb[0].mxu1 }
 0x115   :  { %v1081_v17 = vadd.f32 %v3266_v15, %v1080_v16  ;;  %v1369_v18 = vpop.f32.mrb[0].mxu0  ;;  %v1082_v19 = vpop.f32.mrb[1].mxu1 }
 0x116   :  { %v1371_v21 = vpop.f32.mrb[1].mxu0  ;;  %v1083_v22 = vpop.f32.mrb[2].mxu1 }
 0x117   :  { %v1370_v25 = vadd.f32 %v1369_v18, %v1081_v17  ;;  %v1084_v26 = vadd.f32 %v3266_v15, %v1083_v22  ;;  %v1372_v27 = vpop.f32.mrb[2].mxu0  ;;  %v1085_v28 = vpop.f32.mrb[3].mxu1  ;;  %v2775_v22 = vld [vmem:[%s3648_s0 + $0x3c0] ss:$16 sps:$4 sm:$0xff]  }
 0x118   :  { %v1374_v30 = vpop.f32.mrb[3].mxu0 }
 0x119   :  { %vm1624_vm0 = vcmp.gt.f32.partialorder %v1370_v25, 0.0  ;;  %v1688_v31 = vmul.f32 0.2, %v1370_v25  ;;  %v1373_v32 = vadd.f32 %v1372_v27, %v1084_v26  ;;  %1295 = vmatmul.mubr.bf16.gmra.mrb[108].mxu1 %v2757_v20  ;;  %v2776_v26 = vld [vmem:[%s3648_s0 + $0x3c8] ss:$16 sps:$4 sm:$0xff]  }
 0x11a   :  { %1584 = vmatmul.mubr.bf16.gmra.mrb[108].mxu0 %v2758_v23  ;;  %1302 = vmatprep.mubr.bf16.mxu1 %v2759_v24  ;;  %v2777_v27 = vld [vmem:[%s3648_s0 + $0x3e4] ss:$16 sps:$4 sm:$0xff]  }
 0x11b   :  { %v1752_v33 = vsel %vm1624_vm0, %v1370_v25, %v1688_v31  ;;  %vm1625_vm2 = vcmp.gt.f32.partialorder %v1373_v32, 0.0  ;;  %v1689_v34 = vmul.f32 0.2, %v1373_v32  ;;  %1591 = vmatprep.mubr.bf16.mxu0 %v2761_v29 }
 0x11c   :  { %v2366_v35 = vpack.c.bf16 %v1752_v33, %v1752_v33  ;;  %v1088_v36 = vpop.f32.mrb[4].mxu1 }
 0x11d   :  { %v1753_v37 = vsel %vm1625_vm2, %v1373_v32, %v1689_v34  ;;  %v1089_v38 = vadd.f32 %v3266_v15, %v1088_v36  ;;  %v1377_v39 = vpop.f32.mrb[4].mxu0  ;;  %v1090_v40 = vpop.f32.mrb[5].mxu1  ;;  %v2779_v32 = vld [vmem:[%s3648_s0 + $0x3ec] ss:$16 sps:$4 sm:$0xff]  }
 0x11e   :  { %2073 = vst.msk [vmem:[%s3650_s3] sm:$0xf] %vm2072_vm1, %v2366_v35  ;;  %v2367_v42 = vpack.c.bf16 %v1753_v37, %v1753_v37  ;;  %v1379_v43 = vpop.f32.mrb[5].mxu0  ;;  %v1091_v44 = vpop.f32.mrb[6].mxu1 }
 0x11f   :  { %v1378_v47 = vadd.f32 %v1377_v39, %v1089_v38  ;;  %v1092_v48 = vadd.f32 %v3266_v15, %v1091_v44  ;;  %v1380_v49 = vpop.f32.mrb[6].mxu0  ;;  %v1093_v50 = vpop.f32.mrb[7].mxu1  ;;  %v2781_v44 = vld [vmem:[%s3648_s0 + $0x3e0] ss:$16 sps:$4 sm:$0xff]  }
 0x120   :  { %2074 = vst.msk [vmem:[%s3650_s3 + $0x4] sm:$0xf] %vm2072_vm1, %v2367_v42  ;;  %v1382_v52 = vpop.f32.mrb[7].mxu0 }
 0x121   :  { %vm1626_vm3 = vcmp.gt.f32.partialorder %v1378_v47, 0.0  ;;  %v1690_v53 = vmul.f32 0.2, %v1378_v47  ;;  %v1381_v54 = vadd.f32 %v1380_v49, %v1092_v48  ;;  %1303 = vmatmul.mubr.bf16.gmra.mrb[112].mxu1 %v2763_v41  ;;  %v2782_v48 = vld [vmem:[%s3648_s0 + $0x3e8] ss:$16 sps:$4 sm:$0xff]  }
 0x122   :  { %1592 = vmatmul.mubr.bf16.gmra.mrb[112].mxu0 %v2764_v45  ;;  %1310 = vmatprep.mubr.bf16.mxu1 %v2765_v46 }
 0x123   :  { %v1754_v55 = vsel %vm1626_vm3, %v1378_v47, %v1690_v53  ;;  %vm1627_vm4 = vcmp.gt.f32.partialorder %v1381_v54, 0.0  ;;  %v1691_v56 = vmul.f32 0.2, %v1381_v54  ;;  %1599 = vmatprep.mubr.bf16.mxu0 %v2767_v51 }
 0x124   :  { %v2368_v57 = vpack.c.bf16 %v1754_v55, %v1754_v55  ;;  %v1096_v58 = vpop.f32.mrb[8].mxu1 }
 0x125   :  { %v1755_v59 = vsel %vm1627_vm4, %v1381_v54, %v1691_v56  ;;  %v1097_v60 = vadd.f32 %v3266_v15, %v1096_v58  ;;  %v1385_v61 = vpop.f32.mrb[8].mxu0  ;;  %v1098_v62 = vpop.f32.mrb[9].mxu1 }
 0x126   :  { %2075 = vst.msk [vmem:[%s3650_s3 + $0x8] sm:$0xf] %vm2072_vm1, %v2368_v57  ;;  %v2369_v0 = vpack.c.bf16 %v1755_v59, %v1755_v59  ;;  %v1387_v1 = vpop.f32.mrb[9].mxu0  ;;  %v1099_v2 = vpop.f32.mrb[10].mxu1 }
 0x127   :  { %v1386_v5 = vadd.f32 %v1385_v61, %v1097_v60  ;;  %v1100_v6 = vadd.f32 %v3266_v15, %v1099_v2  ;;  %v1388_v7 = vpop.f32.mrb[10].mxu0  ;;  %v1101_v8 = vpop.f32.mrb[11].mxu1 }
 0x128   :  { %2076 = vst.msk [vmem:[%s3650_s3 + $0xc] sm:$0xf] %vm2072_vm1, %v2369_v0  ;;  %v1390_v10 = vpop.f32.mrb[11].mxu0 }
 0x129   :  { %vm1628_vm5 = vcmp.gt.f32.partialorder %v1386_v5, 0.0  ;;  %v1692_v11 = vmul.f32 0.2, %v1386_v5  ;;  %v1389_v12 = vadd.f32 %v1388_v7, %v1100_v6  ;;  %1311 = vmatmul.mubr.bf16.gmra.mrb[116].mxu1 %v2769_v63 }
 0x12a   :  { %1600 = vmatmul.mubr.bf16.gmra.mrb[116].mxu0 %v2770_v3  ;;  %1318 = vmatprep.mubr.bf16.mxu1 %v2771_v4 }
 0x12b   :  { %v1756_v13 = vsel %vm1628_vm5, %v1386_v5, %v1692_v11  ;;  %vm1629_vm6 = vcmp.gt.f32.partialorder %v1389_v12, 0.0  ;;  %v1693_v14 = vmul.f32 0.2, %v1389_v12  ;;  %1607 = vmatprep.mubr.bf16.mxu0 %v2773_v9 }
 0x12c   :  { %v2370_v16 = vpack.c.bf16 %v1756_v13, %v1756_v13  ;;  %v1104_v17 = vpop.f32.mrb[12].mxu1 }
 0x12d   :  { %v1757_v18 = vsel %vm1629_vm6, %v1389_v12, %v1693_v14  ;;  %v1105_v19 = vadd.f32 %v3266_v15, %v1104_v17  ;;  %v1393_v20 = vpop.f32.mrb[12].mxu0  ;;  %v1106_v21 = vpop.f32.mrb[13].mxu1 }
 0x12e   :  { %2077 = vst.msk [vmem:[%s3650_s3 + $0x10] sm:$0xf] %vm2072_vm1, %v2370_v16  ;;  %v2371_v23 = vpack.c.bf16 %v1757_v18, %v1757_v18  ;;  %v1395_v24 = vpop.f32.mrb[13].mxu0  ;;  %v1107_v25 = vpop.f32.mrb[14].mxu1 }
 0x12f   :  { %v1394_v28 = vadd.f32 %v1393_v20, %v1105_v19  ;;  %v1108_v29 = vadd.f32 %v3266_v15, %v1107_v25  ;;  %v1396_v30 = vpop.f32.mrb[14].mxu0  ;;  %v1109_v31 = vpop.f32.mrb[15].mxu1 }
 0x130   :  { %2078 = vst.msk [vmem:[%s3650_s3 + $0x14] sm:$0xf] %vm2072_vm1, %v2371_v23  ;;  %v1398_v33 = vpop.f32.mrb[15].mxu0 }
 0x131   :  { %vm1630_vm7 = vcmp.gt.f32.partialorder %v1394_v28, 0.0  ;;  %v1694_v34 = vmul.f32 0.2, %v1394_v28  ;;  %v1397_v35 = vadd.f32 %v1396_v30, %v1108_v29  ;;  %1319 = vmatmul.mubr.bf16.gmra.mrb[120].mxu1 %v2775_v22 }
 0x132   :  { %1608 = vmatmul.mubr.bf16.gmra.mrb[120].mxu0 %v2776_v26  ;;  %1326 = vmatprep.mubr.bf16.mxu1 %v2777_v27 }
 0x133   :  { %v1758_v36 = vsel %vm1630_vm7, %v1394_v28, %v1694_v34  ;;  %vm1631_vm8 = vcmp.gt.f32.partialorder %v1397_v35, 0.0  ;;  %v1695_v37 = vmul.f32 0.2, %v1397_v35  ;;  %1615 = vmatprep.mubr.bf16.mxu0 %v2779_v32 }
 0x134   :  { %v2372_v38 = vpack.c.bf16 %v1758_v36, %v1758_v36  ;;  %v1112_v39 = vpop.f32.mrb[16].mxu1 }
 0x135   :  { %v1759_v40 = vsel %vm1631_vm8, %v1397_v35, %v1695_v37  ;;  %v1113_v41 = vadd.f32 %v3266_v15, %v1112_v39  ;;  %v1401_v42 = vpop.f32.mrb[16].mxu0  ;;  %v1114_v43 = vpop.f32.mrb[17].mxu1 }
 0x136   :  { %2079 = vst.msk [vmem:[%s3650_s3 + $0x18] sm:$0xf] %vm2072_vm1, %v2372_v38  ;;  %v2373_v45 = vpack.c.bf16 %v1759_v40, %v1759_v40  ;;  %v1403_v46 = vpop.f32.mrb[17].mxu0  ;;  %v1115_v47 = vpop.f32.mrb[18].mxu1 }
 0x137   :  { %v1402_v49 = vadd.f32 %v1401_v42, %v1113_v41  ;;  %v1116_v50 = vadd.f32 %v3266_v15, %v1115_v47  ;;  %v1404_v51 = vpop.f32.mrb[18].mxu0  ;;  %v1117_v52 = vpop.f32.mrb[19].mxu1 }
 0x138   :  { %2080 = vst.msk [vmem:[%s3650_s3 + $0x1c] sm:$0xf] %vm2072_vm1, %v2373_v45  ;;  %v1406_v53 = vpop.f32.mrb[19].mxu0 }
 0x139   :  { %vm1632_vm9 = vcmp.gt.f32.partialorder %v1402_v49, 0.0  ;;  %v1696_v54 = vmul.f32 0.2, %v1402_v49  ;;  %v1405_v55 = vadd.f32 %v1404_v51, %v1116_v50  ;;  %1327 = vmatmul.mubr.bf16.gmra.mrb[124].mxu1 %v2781_v44 }
 0x13a   :  { %1616 = vmatmul.mubr.bf16.gmra.mrb[124].mxu0 %v2782_v48 }
 0x13b   :  { %v1760_v56 = vsel %vm1632_vm9, %v1402_v49, %v1696_v54  ;;  %vm1633_vm10 = vcmp.gt.f32.partialorder %v1405_v55, 0.0  ;;  %v1697_v57 = vmul.f32 0.2, %v1405_v55 }
 0x13c   :  { %v2374_v58 = vpack.c.bf16 %v1760_v56, %v1760_v56  ;;  %v1120_v59 = vpop.f32.mrb[20].mxu1 }
 0x13d   :  { %v1761_v60 = vsel %vm1633_vm10, %v1405_v55, %v1697_v57  ;;  %v1121_v61 = vadd.f32 %v3266_v15, %v1120_v59  ;;  %v1409_v62 = vpop.f32.mrb[20].mxu0  ;;  %v1122_v63 = vpop.f32.mrb[21].mxu1 }
 0x13e   :  { %2081 = vst.msk [vmem:[%s3650_s3 + $0x20] sm:$0xf] %vm2072_vm1, %v2374_v58  ;;  %v2375_v0 = vpack.c.bf16 %v1761_v60, %v1761_v60  ;;  %v1411_v1 = vpop.f32.mrb[21].mxu0  ;;  %v1123_v2 = vpop.f32.mrb[22].mxu1 }
 0x13f   :  { %v1410_v3 = vadd.f32 %v1409_v62, %v1121_v61  ;;  %v1124_v4 = vadd.f32 %v3266_v15, %v1123_v2  ;;  %v1412_v5 = vpop.f32.mrb[22].mxu0  ;;  %v1125_v6 = vpop.f32.mrb[23].mxu1 }
 0x140   :  { %2082 = vst.msk [vmem:[%s3650_s3 + $0x24] sm:$0xf] %vm2072_vm1, %v2375_v0  ;;  %v1414_v7 = vpop.f32.mrb[23].mxu0 }
 0x141   :  { %vm1634_vm11 = vcmp.gt.f32.partialorder %v1410_v3, 0.0  ;;  %v1698_v8 = vmul.f32 0.2, %v1410_v3  ;;  %v1413_v9 = vadd.f32 %v1412_v5, %v1124_v4 }
 0x143   :  { %v1762_v10 = vsel %vm1634_vm11, %v1410_v3, %v1698_v8  ;;  %vm1635_vm12 = vcmp.gt.f32.partialorder %v1413_v9, 0.0  ;;  %v1699_v11 = vmul.f32 0.2, %v1413_v9 }
 0x144   :  { %v2376_v12 = vpack.c.bf16 %v1762_v10, %v1762_v10  ;;  %v1128_v13 = vpop.f32.mrb[24].mxu1 }
 0x145   :  { %v1763_v14 = vsel %vm1635_vm12, %v1413_v9, %v1699_v11  ;;  %v1129_v16 = vadd.f32 %v3266_v15, %v1128_v13  ;;  %v1417_v17 = vpop.f32.mrb[24].mxu0  ;;  %v1130_v18 = vpop.f32.mrb[25].mxu1 }
 0x146   :  { %2083 = vst.msk [vmem:[%s3650_s3 + $0x28] sm:$0xf] %vm2072_vm1, %v2376_v12  ;;  %v2377_v19 = vpack.c.bf16 %v1763_v14, %v1763_v14  ;;  %v1419_v20 = vpop.f32.mrb[25].mxu0  ;;  %v1131_v21 = vpop.f32.mrb[26].mxu1 }
 0x147   :  { %v1418_v22 = vadd.f32 %v1417_v17, %v1129_v16  ;;  %v1132_v23 = vadd.f32 %v3266_v15, %v1131_v21  ;;  %v1420_v24 = vpop.f32.mrb[26].mxu0  ;;  %v1133_v25 = vpop.f32.mrb[27].mxu1 }
 0x148   :  { %2084 = vst.msk [vmem:[%s3650_s3 + $0x2c] sm:$0xf] %vm2072_vm1, %v2377_v19  ;;  %v1422_v26 = vpop.f32.mrb[27].mxu0 }
 0x149   :  { %vm1636_vm13 = vcmp.gt.f32.partialorder %v1418_v22, 0.0  ;;  %v1700_v27 = vmul.f32 0.2, %v1418_v22  ;;  %v1421_v28 = vadd.f32 %v1420_v24, %v1132_v23 }
 0x14b   :  { %v1764_v29 = vsel %vm1636_vm13, %v1418_v22, %v1700_v27  ;;  %vm1637_vm14 = vcmp.gt.f32.partialorder %v1421_v28, 0.0  ;;  %v1701_v30 = vmul.f32 0.2, %v1421_v28 }
 0x14c   :  { %v2378_v31 = vpack.c.bf16 %v1764_v29, %v1764_v29  ;;  %v1136_v32 = vpop.f32.mrb[28].mxu1 }
 0x14d   :  { %v1765_v33 = vsel %vm1637_vm14, %v1421_v28, %v1701_v30  ;;  %v1137_v34 = vadd.f32 %v3266_v15, %v1136_v32  ;;  %v1425_v35 = vpop.f32.mrb[28].mxu0  ;;  %v1138_v36 = vpop.f32.mrb[29].mxu1 }
 0x14e   :  { %2085 = vst.msk [vmem:[%s3650_s3 + $0x30] sm:$0xf] %vm2072_vm1, %v2378_v31  ;;  %v2379_v37 = vpack.c.bf16 %v1765_v33, %v1765_v33  ;;  %v1427_v38 = vpop.f32.mrb[29].mxu0  ;;  %v1139_v39 = vpop.f32.mrb[30].mxu1 }
 0x14f   :  { %v1426_v40 = vadd.f32 %v1425_v35, %v1137_v34  ;;  %v1140_v41 = vadd.f32 %v3266_v15, %v1139_v39  ;;  %v1428_v42 = vpop.f32.mrb[30].mxu0  ;;  %v1141_v43 = vpop.f32.mrb[31].mxu1 }
 0x150   :  { %2086 = vst.msk [vmem:[%s3650_s3 + $0x34] sm:$0xf] %vm2072_vm1, %v2379_v37  ;;  %v1430_v44 = vpop.f32.mrb[31].mxu0 }
 0x151   :  { %vm1638_vm15 = vcmp.gt.f32.partialorder %v1426_v40, 0.0  ;;  %v1702_v45 = vmul.f32 0.2, %v1426_v40  ;;  %v1429_v46 = vadd.f32 %v1428_v42, %v1140_v41 }
 0x153   :  { %v1766_v47 = vsel %vm1638_vm15, %v1426_v40, %v1702_v45  ;;  %vm1639_vm0 = vcmp.gt.f32.partialorder %v1429_v46, 0.0  ;;  %v1703_v48 = vmul.f32 0.2, %v1429_v46 }
 0x154   :  { %v2380_v49 = vpack.c.bf16 %v1766_v47, %v1766_v47  ;;  %v1144_v50 = vpop.f32.mrb[32].mxu1 }
 0x155   :  { %v1767_v51 = vsel %vm1639_vm0, %v1429_v46, %v1703_v48  ;;  %v1145_v52 = vadd.f32 %v3266_v15, %v1144_v50  ;;  %v1433_v53 = vpop.f32.mrb[32].mxu0  ;;  %v1146_v54 = vpop.f32.mrb[33].mxu1 }
 0x156   :  { %2087 = vst.msk [vmem:[%s3650_s3 + $0x38] sm:$0xf] %vm2072_vm1, %v2380_v49  ;;  %v2381_v55 = vpack.c.bf16 %v1767_v51, %v1767_v51  ;;  %v1435_v56 = vpop.f32.mrb[33].mxu0  ;;  %v1147_v57 = vpop.f32.mrb[34].mxu1 }
 0x157   :  { %v1434_v58 = vadd.f32 %v1433_v53, %v1145_v52  ;;  %v1148_v59 = vadd.f32 %v3266_v15, %v1147_v57  ;;  %v1436_v60 = vpop.f32.mrb[34].mxu0  ;;  %v1149_v61 = vpop.f32.mrb[35].mxu1 }
 0x158   :  { %2088 = vst.msk [vmem:[%s3650_s3 + $0x3c] sm:$0xf] %vm2072_vm1, %v2381_v55  ;;  %v1438_v62 = vpop.f32.mrb[35].mxu0 }
 0x159   :  { %vm1640_vm2 = vcmp.gt.f32.partialorder %v1434_v58, 0.0  ;;  %v1704_v63 = vmul.f32 0.2, %v1434_v58  ;;  %v1437_v0 = vadd.f32 %v1436_v60, %v1148_v59 }
 0x15b   :  { %v1768_v1 = vsel %vm1640_vm2, %v1434_v58, %v1704_v63  ;;  %vm1641_vm3 = vcmp.gt.f32.partialorder %v1437_v0, 0.0  ;;  %v1705_v2 = vmul.f32 0.2, %v1437_v0 }
 0x15c   :  { %v2382_v3 = vpack.c.bf16 %v1768_v1, %v1768_v1  ;;  %v1152_v4 = vpop.f32.mrb[36].mxu1 }
 0x15d   :  { %v1769_v5 = vsel %vm1641_vm3, %v1437_v0, %v1705_v2  ;;  %v1153_v6 = vadd.f32 %v3266_v15, %v1152_v4  ;;  %v1441_v7 = vpop.f32.mrb[36].mxu0  ;;  %v1154_v8 = vpop.f32.mrb[37].mxu1 }
 0x15e   :  { %2089 = vst.msk [vmem:[%s3650_s3 + $0x40] sm:$0xf] %vm2072_vm1, %v2382_v3  ;;  %v2383_v9 = vpack.c.bf16 %v1769_v5, %v1769_v5  ;;  %v1443_v10 = vpop.f32.mrb[37].mxu0  ;;  %v1155_v11 = vpop.f32.mrb[38].mxu1 }
 0x15f   :  { %v1442_v12 = vadd.f32 %v1441_v7, %v1153_v6  ;;  %v1156_v13 = vadd.f32 %v3266_v15, %v1155_v11  ;;  %v1444_v14 = vpop.f32.mrb[38].mxu0  ;;  %v1157_v16 = vpop.f32.mrb[39].mxu1 }
 0x160   :  { %2090 = vst.msk [vmem:[%s3650_s3 + $0x44] sm:$0xf] %vm2072_vm1, %v2383_v9  ;;  %v1446_v17 = vpop.f32.mrb[39].mxu0 }
 0x161   :  { %vm1642_vm4 = vcmp.gt.f32.partialorder %v1442_v12, 0.0  ;;  %v1706_v18 = vmul.f32 0.2, %v1442_v12  ;;  %v1445_v19 = vadd.f32 %v1444_v14, %v1156_v13 }
 0x163   :  { %v1770_v20 = vsel %vm1642_vm4, %v1442_v12, %v1706_v18  ;;  %vm1643_vm5 = vcmp.gt.f32.partialorder %v1445_v19, 0.0  ;;  %v1707_v21 = vmul.f32 0.2, %v1445_v19 }
 0x164   :  { %v2384_v22 = vpack.c.bf16 %v1770_v20, %v1770_v20  ;;  %v1160_v23 = vpop.f32.mrb[40].mxu1 }
 0x165   :  { %v1771_v24 = vsel %vm1643_vm5, %v1445_v19, %v1707_v21  ;;  %v1161_v25 = vadd.f32 %v3266_v15, %v1160_v23  ;;  %v1449_v26 = vpop.f32.mrb[40].mxu0  ;;  %v1162_v27 = vpop.f32.mrb[41].mxu1 }
 0x166   :  { %2091 = vst.msk [vmem:[%s3650_s3 + $0x48] sm:$0xf] %vm2072_vm1, %v2384_v22  ;;  %v2385_v28 = vpack.c.bf16 %v1771_v24, %v1771_v24  ;;  %v1451_v29 = vpop.f32.mrb[41].mxu0  ;;  %v1163_v30 = vpop.f32.mrb[42].mxu1 }
 0x167   :  { %v1450_v31 = vadd.f32 %v1449_v26, %v1161_v25  ;;  %v1164_v32 = vadd.f32 %v3266_v15, %v1163_v30  ;;  %v1452_v33 = vpop.f32.mrb[42].mxu0  ;;  %v1165_v34 = vpop.f32.mrb[43].mxu1 }
 0x168   :  { %2092 = vst.msk [vmem:[%s3650_s3 + $0x4c] sm:$0xf] %vm2072_vm1, %v2385_v28  ;;  %v1454_v35 = vpop.f32.mrb[43].mxu0 }
 0x169   :  { %vm1644_vm6 = vcmp.gt.f32.partialorder %v1450_v31, 0.0  ;;  %v1708_v36 = vmul.f32 0.2, %v1450_v31  ;;  %v1453_v37 = vadd.f32 %v1452_v33, %v1164_v32 }
 0x16b   :  { %v1772_v38 = vsel %vm1644_vm6, %v1450_v31, %v1708_v36  ;;  %vm1645_vm7 = vcmp.gt.f32.partialorder %v1453_v37, 0.0  ;;  %v1709_v39 = vmul.f32 0.2, %v1453_v37 }
 0x16c   :  { %v2386_v40 = vpack.c.bf16 %v1772_v38, %v1772_v38  ;;  %v1168_v41 = vpop.f32.mrb[44].mxu1 }
 0x16d   :  { %v1773_v42 = vsel %vm1645_vm7, %v1453_v37, %v1709_v39  ;;  %v1169_v43 = vadd.f32 %v3266_v15, %v1168_v41  ;;  %v1457_v44 = vpop.f32.mrb[44].mxu0  ;;  %v1170_v45 = vpop.f32.mrb[45].mxu1 }
 0x16e   :  { %2093 = vst.msk [vmem:[%s3650_s3 + $0x50] sm:$0xf] %vm2072_vm1, %v2386_v40  ;;  %v2387_v46 = vpack.c.bf16 %v1773_v42, %v1773_v42  ;;  %v1459_v47 = vpop.f32.mrb[45].mxu0  ;;  %v1171_v48 = vpop.f32.mrb[46].mxu1 }
 0x16f   :  { %v1458_v49 = vadd.f32 %v1457_v44, %v1169_v43  ;;  %v1172_v50 = vadd.f32 %v3266_v15, %v1171_v48  ;;  %v1460_v51 = vpop.f32.mrb[46].mxu0  ;;  %v1173_v52 = vpop.f32.mrb[47].mxu1 }
 0x170   :  { %2094 = vst.msk [vmem:[%s3650_s3 + $0x54] sm:$0xf] %vm2072_vm1, %v2387_v46  ;;  %v1462_v53 = vpop.f32.mrb[47].mxu0 }
 0x171   :  { %vm1646_vm8 = vcmp.gt.f32.partialorder %v1458_v49, 0.0  ;;  %v1710_v54 = vmul.f32 0.2, %v1458_v49  ;;  %v1461_v55 = vadd.f32 %v1460_v51, %v1172_v50 }
 0x173   :  { %v1774_v56 = vsel %vm1646_vm8, %v1458_v49, %v1710_v54  ;;  %vm1647_vm9 = vcmp.gt.f32.partialorder %v1461_v55, 0.0  ;;  %v1711_v57 = vmul.f32 0.2, %v1461_v55 }
 0x174   :  { %v2388_v58 = vpack.c.bf16 %v1774_v56, %v1774_v56  ;;  %v1176_v59 = vpop.f32.mrb[48].mxu1 }
 0x175   :  { %v1775_v60 = vsel %vm1647_vm9, %v1461_v55, %v1711_v57  ;;  %v1177_v61 = vadd.f32 %v3266_v15, %v1176_v59  ;;  %v1465_v62 = vpop.f32.mrb[48].mxu0  ;;  %v1178_v63 = vpop.f32.mrb[49].mxu1 }
 0x176   :  { %2095 = vst.msk [vmem:[%s3650_s3 + $0x58] sm:$0xf] %vm2072_vm1, %v2388_v58  ;;  %v2389_v0 = vpack.c.bf16 %v1775_v60, %v1775_v60  ;;  %v1467_v1 = vpop.f32.mrb[49].mxu0  ;;  %v1179_v2 = vpop.f32.mrb[50].mxu1 }
 0x177   :  { %v1466_v3 = vadd.f32 %v1465_v62, %v1177_v61  ;;  %v1180_v4 = vadd.f32 %v3266_v15, %v1179_v2  ;;  %v1468_v5 = vpop.f32.mrb[50].mxu0  ;;  %v1181_v6 = vpop.f32.mrb[51].mxu1 }
 0x178   :  { %2096 = vst.msk [vmem:[%s3650_s3 + $0x5c] sm:$0xf] %vm2072_vm1, %v2389_v0  ;;  %v1470_v7 = vpop.f32.mrb[51].mxu0 }
 0x179   :  { %vm1648_vm10 = vcmp.gt.f32.partialorder %v1466_v3, 0.0  ;;  %v1712_v8 = vmul.f32 0.2, %v1466_v3  ;;  %v1469_v9 = vadd.f32 %v1468_v5, %v1180_v4 }
 0x17b   :  { %v1776_v10 = vsel %vm1648_vm10, %v1466_v3, %v1712_v8  ;;  %vm1649_vm11 = vcmp.gt.f32.partialorder %v1469_v9, 0.0  ;;  %v1713_v11 = vmul.f32 0.2, %v1469_v9 }
 0x17c   :  { %v2390_v12 = vpack.c.bf16 %v1776_v10, %v1776_v10  ;;  %v1184_v13 = vpop.f32.mrb[52].mxu1 }
 0x17d   :  { %v1777_v14 = vsel %vm1649_vm11, %v1469_v9, %v1713_v11  ;;  %v1185_v16 = vadd.f32 %v3266_v15, %v1184_v13  ;;  %v1473_v17 = vpop.f32.mrb[52].mxu0  ;;  %v1186_v18 = vpop.f32.mrb[53].mxu1 }
 0x17e   :  { %2097 = vst.msk [vmem:[%s3650_s3 + $0x60] sm:$0xf] %vm2072_vm1, %v2390_v12  ;;  %v2391_v19 = vpack.c.bf16 %v1777_v14, %v1777_v14  ;;  %v1475_v20 = vpop.f32.mrb[53].mxu0  ;;  %v1187_v21 = vpop.f32.mrb[54].mxu1 }
 0x17f   :  { %v1474_v22 = vadd.f32 %v1473_v17, %v1185_v16  ;;  %v1188_v23 = vadd.f32 %v3266_v15, %v1187_v21  ;;  %v1476_v24 = vpop.f32.mrb[54].mxu0  ;;  %v1189_v25 = vpop.f32.mrb[55].mxu1 }
 0x180   :  { %2098 = vst.msk [vmem:[%s3650_s3 + $0x64] sm:$0xf] %vm2072_vm1, %v2391_v19  ;;  %v1478_v26 = vpop.f32.mrb[55].mxu0 }
 0x181   :  { %vm1650_vm12 = vcmp.gt.f32.partialorder %v1474_v22, 0.0  ;;  %v1714_v27 = vmul.f32 0.2, %v1474_v22  ;;  %v1477_v28 = vadd.f32 %v1476_v24, %v1188_v23 }
 0x183   :  { %v1778_v29 = vsel %vm1650_vm12, %v1474_v22, %v1714_v27  ;;  %vm1651_vm13 = vcmp.gt.f32.partialorder %v1477_v28, 0.0  ;;  %v1715_v30 = vmul.f32 0.2, %v1477_v28 }
 0x184   :  { %v2392_v31 = vpack.c.bf16 %v1778_v29, %v1778_v29  ;;  %v1192_v32 = vpop.f32.mrb[56].mxu1 }
 0x185   :  { %v1779_v33 = vsel %vm1651_vm13, %v1477_v28, %v1715_v30  ;;  %v1193_v34 = vadd.f32 %v3266_v15, %v1192_v32  ;;  %v1481_v35 = vpop.f32.mrb[56].mxu0  ;;  %v1194_v36 = vpop.f32.mrb[57].mxu1 }
 0x186   :  { %2099 = vst.msk [vmem:[%s3650_s3 + $0x68] sm:$0xf] %vm2072_vm1, %v2392_v31  ;;  %v2393_v37 = vpack.c.bf16 %v1779_v33, %v1779_v33  ;;  %v1483_v38 = vpop.f32.mrb[57].mxu0  ;;  %v1195_v39 = vpop.f32.mrb[58].mxu1 }
 0x187   :  { %v1482_v40 = vadd.f32 %v1481_v35, %v1193_v34  ;;  %v1196_v41 = vadd.f32 %v3266_v15, %v1195_v39  ;;  %v1484_v42 = vpop.f32.mrb[58].mxu0  ;;  %v1197_v43 = vpop.f32.mrb[59].mxu1 }
 0x188   :  { %2100 = vst.msk [vmem:[%s3650_s3 + $0x6c] sm:$0xf] %vm2072_vm1, %v2393_v37  ;;  %v1486_v44 = vpop.f32.mrb[59].mxu0 }
 0x189   :  { %vm1652_vm14 = vcmp.gt.f32.partialorder %v1482_v40, 0.0  ;;  %v1716_v45 = vmul.f32 0.2, %v1482_v40  ;;  %v1485_v46 = vadd.f32 %v1484_v42, %v1196_v41 }
 0x18b   :  { %v1780_v47 = vsel %vm1652_vm14, %v1482_v40, %v1716_v45  ;;  %vm1653_vm15 = vcmp.gt.f32.partialorder %v1485_v46, 0.0  ;;  %v1717_v48 = vmul.f32 0.2, %v1485_v46 }
 0x18c   :  { %v2394_v49 = vpack.c.bf16 %v1780_v47, %v1780_v47  ;;  %v1200_v50 = vpop.f32.mrb[60].mxu1 }
 0x18d   :  { %v1781_v51 = vsel %vm1653_vm15, %v1485_v46, %v1717_v48  ;;  %v1201_v52 = vadd.f32 %v3266_v15, %v1200_v50  ;;  %v1489_v53 = vpop.f32.mrb[60].mxu0  ;;  %v1202_v54 = vpop.f32.mrb[61].mxu1 }
 0x18e   :  { %2101 = vst.msk [vmem:[%s3650_s3 + $0x70] sm:$0xf] %vm2072_vm1, %v2394_v49  ;;  %v2395_v55 = vpack.c.bf16 %v1781_v51, %v1781_v51  ;;  %v1491_v56 = vpop.f32.mrb[61].mxu0  ;;  %v1203_v57 = vpop.f32.mrb[62].mxu1 }
 0x18f   :  { %v1490_v58 = vadd.f32 %v1489_v53, %v1201_v52  ;;  %v1204_v59 = vadd.f32 %v3266_v15, %v1203_v57  ;;  %v1492_v60 = vpop.f32.mrb[62].mxu0  ;;  %v1205_v61 = vpop.f32.mrb[63].mxu1 }
 0x190   :  { %2102 = vst.msk [vmem:[%s3650_s3 + $0x74] sm:$0xf] %vm2072_vm1, %v2395_v55  ;;  %v1494_v62 = vpop.f32.mrb[63].mxu0 }
 0x191   :  { %vm1654_vm0 = vcmp.gt.f32.partialorder %v1490_v58, 0.0  ;;  %v1718_v63 = vmul.f32 0.2, %v1490_v58  ;;  %v1493_v0 = vadd.f32 %v1492_v60, %v1204_v59 }
 0x193   :  { %v1782_v1 = vsel %vm1654_vm0, %v1490_v58, %v1718_v63  ;;  %vm1655_vm2 = vcmp.gt.f32.partialorder %v1493_v0, 0.0  ;;  %v1719_v2 = vmul.f32 0.2, %v1493_v0 }
 0x194   :  { %v2396_v3 = vpack.c.bf16 %v1782_v1, %v1782_v1  ;;  %v1208_v4 = vpop.f32.mrb[64].mxu1 }
 0x195   :  { %v1783_v5 = vsel %vm1655_vm2, %v1493_v0, %v1719_v2  ;;  %v1209_v6 = vadd.f32 %v3266_v15, %v1208_v4  ;;  %v1497_v7 = vpop.f32.mrb[64].mxu0  ;;  %v1210_v8 = vpop.f32.mrb[65].mxu1 }
 0x196   :  { %2103 = vst.msk [vmem:[%s3650_s3 + $0x78] sm:$0xf] %vm2072_vm1, %v2396_v3  ;;  %v2397_v9 = vpack.c.bf16 %v1783_v5, %v1783_v5  ;;  %v1499_v10 = vpop.f32.mrb[65].mxu0  ;;  %v1211_v11 = vpop.f32.mrb[66].mxu1 }
 0x197   :  { %v1498_v12 = vadd.f32 %v1497_v7, %v1209_v6  ;;  %v1212_v13 = vadd.f32 %v3266_v15, %v1211_v11  ;;  %v1500_v14 = vpop.f32.mrb[66].mxu0  ;;  %v1213_v16 = vpop.f32.mrb[67].mxu1 }
 0x198   :  { %2104 = vst.msk [vmem:[%s3650_s3 + $0x7c] sm:$0xf] %vm2072_vm1, %v2397_v9  ;;  %v1502_v17 = vpop.f32.mrb[67].mxu0 }
 0x199   :  { %vm1656_vm3 = vcmp.gt.f32.partialorder %v1498_v12, 0.0  ;;  %v1720_v18 = vmul.f32 0.2, %v1498_v12  ;;  %v1501_v19 = vadd.f32 %v1500_v14, %v1212_v13 }
 0x19b   :  { %v1784_v20 = vsel %vm1656_vm3, %v1498_v12, %v1720_v18  ;;  %vm1657_vm4 = vcmp.gt.f32.partialorder %v1501_v19, 0.0  ;;  %v1721_v21 = vmul.f32 0.2, %v1501_v19 }
 0x19c   :  { %v2398_v22 = vpack.c.bf16 %v1784_v20, %v1784_v20  ;;  %v1216_v23 = vpop.f32.mrb[68].mxu1 }
 0x19d   :  { %v1785_v24 = vsel %vm1657_vm4, %v1501_v19, %v1721_v21  ;;  %v1217_v25 = vadd.f32 %v3266_v15, %v1216_v23  ;;  %v1505_v26 = vpop.f32.mrb[68].mxu0  ;;  %v1218_v27 = vpop.f32.mrb[69].mxu1 }
 0x19e   :  { %2105 = vst.msk [vmem:[%s3650_s3 + $0x80] sm:$0xf] %vm2072_vm1, %v2398_v22  ;;  %v2399_v28 = vpack.c.bf16 %v1785_v24, %v1785_v24  ;;  %v1507_v29 = vpop.f32.mrb[69].mxu0  ;;  %v1219_v30 = vpop.f32.mrb[70].mxu1 }
 0x19f   :  { %v1506_v31 = vadd.f32 %v1505_v26, %v1217_v25  ;;  %v1220_v32 = vadd.f32 %v3266_v15, %v1219_v30  ;;  %v1508_v33 = vpop.f32.mrb[70].mxu0  ;;  %v1221_v34 = vpop.f32.mrb[71].mxu1 }
 0x1a0   :  { %2106 = vst.msk [vmem:[%s3650_s3 + $0x84] sm:$0xf] %vm2072_vm1, %v2399_v28  ;;  %v1510_v35 = vpop.f32.mrb[71].mxu0 }
 0x1a1   :  { %vm1658_vm5 = vcmp.gt.f32.partialorder %v1506_v31, 0.0  ;;  %v1722_v36 = vmul.f32 0.2, %v1506_v31  ;;  %v1509_v37 = vadd.f32 %v1508_v33, %v1220_v32 }
 0x1a3   :  { %v1786_v38 = vsel %vm1658_vm5, %v1506_v31, %v1722_v36  ;;  %vm1659_vm6 = vcmp.gt.f32.partialorder %v1509_v37, 0.0  ;;  %v1723_v39 = vmul.f32 0.2, %v1509_v37 }
 0x1a4   :  { %v2400_v40 = vpack.c.bf16 %v1786_v38, %v1786_v38  ;;  %v1224_v41 = vpop.f32.mrb[72].mxu1 }
 0x1a5   :  { %v1787_v42 = vsel %vm1659_vm6, %v1509_v37, %v1723_v39  ;;  %v1225_v43 = vadd.f32 %v3266_v15, %v1224_v41  ;;  %v1513_v44 = vpop.f32.mrb[72].mxu0  ;;  %v1226_v45 = vpop.f32.mrb[73].mxu1 }
 0x1a6   :  { %2107 = vst.msk [vmem:[%s3650_s3 + $0x88] sm:$0xf] %vm2072_vm1, %v2400_v40  ;;  %v2401_v46 = vpack.c.bf16 %v1787_v42, %v1787_v42  ;;  %v1515_v47 = vpop.f32.mrb[73].mxu0  ;;  %v1227_v48 = vpop.f32.mrb[74].mxu1 }
 0x1a7   :  { %v1514_v49 = vadd.f32 %v1513_v44, %v1225_v43  ;;  %v1228_v50 = vadd.f32 %v3266_v15, %v1227_v48  ;;  %v1516_v51 = vpop.f32.mrb[74].mxu0  ;;  %v1229_v52 = vpop.f32.mrb[75].mxu1 }
 0x1a8   :  { %2108 = vst.msk [vmem:[%s3650_s3 + $0x8c] sm:$0xf] %vm2072_vm1, %v2401_v46  ;;  %v1518_v53 = vpop.f32.mrb[75].mxu0 }
 0x1a9   :  { %vm1660_vm7 = vcmp.gt.f32.partialorder %v1514_v49, 0.0  ;;  %v1724_v54 = vmul.f32 0.2, %v1514_v49  ;;  %v1517_v55 = vadd.f32 %v1516_v51, %v1228_v50 }
 0x1ab   :  { %v1788_v56 = vsel %vm1660_vm7, %v1514_v49, %v1724_v54  ;;  %vm1661_vm8 = vcmp.gt.f32.partialorder %v1517_v55, 0.0  ;;  %v1725_v57 = vmul.f32 0.2, %v1517_v55 }
 0x1ac   :  { %v2402_v58 = vpack.c.bf16 %v1788_v56, %v1788_v56  ;;  %v1232_v59 = vpop.f32.mrb[76].mxu1 }
 0x1ad   :  { %v1789_v60 = vsel %vm1661_vm8, %v1517_v55, %v1725_v57  ;;  %v1233_v61 = vadd.f32 %v3266_v15, %v1232_v59  ;;  %v1521_v62 = vpop.f32.mrb[76].mxu0  ;;  %v1234_v63 = vpop.f32.mrb[77].mxu1 }
 0x1ae   :  { %2109 = vst.msk [vmem:[%s3650_s3 + $0x90] sm:$0xf] %vm2072_vm1, %v2402_v58  ;;  %v2403_v0 = vpack.c.bf16 %v1789_v60, %v1789_v60  ;;  %v1523_v1 = vpop.f32.mrb[77].mxu0  ;;  %v1235_v2 = vpop.f32.mrb[78].mxu1 }
 0x1af   :  { %v1522_v3 = vadd.f32 %v1521_v62, %v1233_v61  ;;  %v1236_v4 = vadd.f32 %v3266_v15, %v1235_v2  ;;  %v1524_v5 = vpop.f32.mrb[78].mxu0  ;;  %v1237_v6 = vpop.f32.mrb[79].mxu1 }
 0x1b0   :  { %2110 = vst.msk [vmem:[%s3650_s3 + $0x94] sm:$0xf] %vm2072_vm1, %v2403_v0  ;;  %v1526_v7 = vpop.f32.mrb[79].mxu0 }
 0x1b1   :  { %vm1662_vm9 = vcmp.gt.f32.partialorder %v1522_v3, 0.0  ;;  %v1726_v8 = vmul.f32 0.2, %v1522_v3  ;;  %v1525_v9 = vadd.f32 %v1524_v5, %v1236_v4 }
 0x1b3   :  { %v1790_v10 = vsel %vm1662_vm9, %v1522_v3, %v1726_v8  ;;  %vm1663_vm10 = vcmp.gt.f32.partialorder %v1525_v9, 0.0  ;;  %v1727_v11 = vmul.f32 0.2, %v1525_v9 }
 0x1b4   :  { %v2404_v12 = vpack.c.bf16 %v1790_v10, %v1790_v10  ;;  %v1240_v13 = vpop.f32.mrb[80].mxu1 }
 0x1b5   :  { %v1791_v14 = vsel %vm1663_vm10, %v1525_v9, %v1727_v11  ;;  %v1241_v16 = vadd.f32 %v3266_v15, %v1240_v13  ;;  %v1529_v17 = vpop.f32.mrb[80].mxu0  ;;  %v1242_v18 = vpop.f32.mrb[81].mxu1 }
 0x1b6   :  { %2111 = vst.msk [vmem:[%s3650_s3 + $0x98] sm:$0xf] %vm2072_vm1, %v2404_v12  ;;  %v2405_v19 = vpack.c.bf16 %v1791_v14, %v1791_v14  ;;  %v1531_v20 = vpop.f32.mrb[81].mxu0  ;;  %v1243_v21 = vpop.f32.mrb[82].mxu1 }
 0x1b7   :  { %v1530_v22 = vadd.f32 %v1529_v17, %v1241_v16  ;;  %v1244_v23 = vadd.f32 %v3266_v15, %v1243_v21  ;;  %v1532_v24 = vpop.f32.mrb[82].mxu0  ;;  %v1245_v25 = vpop.f32.mrb[83].mxu1 }
 0x1b8   :  { %2112 = vst.msk [vmem:[%s3650_s3 + $0x9c] sm:$0xf] %vm2072_vm1, %v2405_v19  ;;  %v1534_v26 = vpop.f32.mrb[83].mxu0 }
 0x1b9   :  { %vm1664_vm11 = vcmp.gt.f32.partialorder %v1530_v22, 0.0  ;;  %v1728_v27 = vmul.f32 0.2, %v1530_v22  ;;  %v1533_v28 = vadd.f32 %v1532_v24, %v1244_v23 }
 0x1bb   :  { %v1792_v29 = vsel %vm1664_vm11, %v1530_v22, %v1728_v27  ;;  %vm1665_vm12 = vcmp.gt.f32.partialorder %v1533_v28, 0.0  ;;  %v1729_v30 = vmul.f32 0.2, %v1533_v28 }
 0x1bc   :  { %v2406_v31 = vpack.c.bf16 %v1792_v29, %v1792_v29  ;;  %v1248_v32 = vpop.f32.mrb[84].mxu1 }
 0x1bd   :  { %v1793_v33 = vsel %vm1665_vm12, %v1533_v28, %v1729_v30  ;;  %v1249_v34 = vadd.f32 %v3266_v15, %v1248_v32  ;;  %v1537_v35 = vpop.f32.mrb[84].mxu0  ;;  %v1250_v36 = vpop.f32.mrb[85].mxu1 }
 0x1be   :  { %2113 = vst.msk [vmem:[%s3650_s3 + $0xa0] sm:$0xf] %vm2072_vm1, %v2406_v31  ;;  %v2407_v37 = vpack.c.bf16 %v1793_v33, %v1793_v33  ;;  %v1539_v38 = vpop.f32.mrb[85].mxu0  ;;  %v1251_v39 = vpop.f32.mrb[86].mxu1 }
 0x1bf   :  { %v1538_v40 = vadd.f32 %v1537_v35, %v1249_v34  ;;  %v1252_v41 = vadd.f32 %v3266_v15, %v1251_v39  ;;  %v1540_v42 = vpop.f32.mrb[86].mxu0  ;;  %v1253_v43 = vpop.f32.mrb[87].mxu1  ;;  %v3537_v15 = vld [vmem:[%s3649_s2] ss:$0 sm:$0xff] }
 0x1c0   :  { %2114 = vst.msk [vmem:[%s3650_s3 + $0xa4] sm:$0xf] %vm2072_vm1, %v2407_v37  ;;  %v1542_v44 = vpop.f32.mrb[87].mxu0 }
 0x1c1   :  { %vm1666_vm13 = vcmp.gt.f32.partialorder %v1538_v40, 0.0  ;;  %v1730_v45 = vmul.f32 0.2, %v1538_v40  ;;  %v1541_v46 = vadd.f32 %v1540_v42, %v1252_v41 }
 0x1c3   :  { %v1794_v47 = vsel %vm1666_vm13, %v1538_v40, %v1730_v45  ;;  %vm1667_vm14 = vcmp.gt.f32.partialorder %v1541_v46, 0.0  ;;  %v1731_v48 = vmul.f32 0.2, %v1541_v46 }
 0x1c4   :  { %v2408_v49 = vpack.c.bf16 %v1794_v47, %v1794_v47  ;;  %v1256_v50 = vpop.f32.mrb[88].mxu1 }
 0x1c5   :  { %v1795_v51 = vsel %vm1667_vm14, %v1541_v46, %v1731_v48  ;;  %v1257_v52 = vadd.f32 %v3537_v15, %v1256_v50  ;;  %v1545_v53 = vpop.f32.mrb[88].mxu0  ;;  %v1258_v54 = vpop.f32.mrb[89].mxu1 }
 0x1c6   :  { %2115 = vst.msk [vmem:[%s3650_s3 + $0xa8] sm:$0xf] %vm2072_vm1, %v2408_v49  ;;  %v2409_v55 = vpack.c.bf16 %v1795_v51, %v1795_v51  ;;  %v1547_v56 = vpop.f32.mrb[89].mxu0  ;;  %v1259_v57 = vpop.f32.mrb[90].mxu1 }
 0x1c7   :  { %v1546_v58 = vadd.f32 %v1545_v53, %v1257_v52  ;;  %v1260_v59 = vadd.f32 %v3537_v15, %v1259_v57  ;;  %v1548_v60 = vpop.f32.mrb[90].mxu0  ;;  %v1261_v61 = vpop.f32.mrb[91].mxu1 }
 0x1c8   :  { %2116 = vst.msk [vmem:[%s3650_s3 + $0xac] sm:$0xf] %vm2072_vm1, %v2409_v55  ;;  %v1550_v62 = vpop.f32.mrb[91].mxu0 }
 0x1c9   :  { %vm1668_vm15 = vcmp.gt.f32.partialorder %v1546_v58, 0.0  ;;  %v1732_v63 = vmul.f32 0.2, %v1546_v58  ;;  %v1549_v0 = vadd.f32 %v1548_v60, %v1260_v59 }
 0x1cb   :  { %v1796_v1 = vsel %vm1668_vm15, %v1546_v58, %v1732_v63  ;;  %vm1669_vm0 = vcmp.gt.f32.partialorder %v1549_v0, 0.0  ;;  %v1733_v2 = vmul.f32 0.2, %v1549_v0 }
 0x1cc   :  { %v2410_v3 = vpack.c.bf16 %v1796_v1, %v1796_v1  ;;  %v1264_v4 = vpop.f32.mrb[92].mxu1 }
 0x1cd   :  { %v1797_v5 = vsel %vm1669_vm0, %v1549_v0, %v1733_v2  ;;  %v1265_v6 = vadd.f32 %v3537_v15, %v1264_v4  ;;  %v1553_v7 = vpop.f32.mrb[92].mxu0  ;;  %v1266_v8 = vpop.f32.mrb[93].mxu1 }
 0x1ce   :  { %2117 = vst.msk [vmem:[%s3650_s3 + $0xb0] sm:$0xf] %vm2072_vm1, %v2410_v3  ;;  %v2411_v9 = vpack.c.bf16 %v1797_v5, %v1797_v5  ;;  %v1555_v10 = vpop.f32.mrb[93].mxu0  ;;  %v1267_v11 = vpop.f32.mrb[94].mxu1 }
 0x1cf   :  { %v1554_v12 = vadd.f32 %v1553_v7, %v1265_v6  ;;  %v1268_v13 = vadd.f32 %v3537_v15, %v1267_v11  ;;  %v1556_v14 = vpop.f32.mrb[94].mxu0  ;;  %v1269_v16 = vpop.f32.mrb[95].mxu1 }
 0x1d0   :  { %2118 = vst.msk [vmem:[%s3650_s3 + $0xb4] sm:$0xf] %vm2072_vm1, %v2411_v9  ;;  %v1558_v17 = vpop.f32.mrb[95].mxu0 }
 0x1d1   :  { %vm1670_vm2 = vcmp.gt.f32.partialorder %v1554_v12, 0.0  ;;  %v1734_v18 = vmul.f32 0.2, %v1554_v12  ;;  %v1557_v19 = vadd.f32 %v1556_v14, %v1268_v13 }
 0x1d3   :  { %v1798_v20 = vsel %vm1670_vm2, %v1554_v12, %v1734_v18  ;;  %vm1671_vm3 = vcmp.gt.f32.partialorder %v1557_v19, 0.0  ;;  %v1735_v21 = vmul.f32 0.2, %v1557_v19 }
 0x1d4   :  { %v2412_v22 = vpack.c.bf16 %v1798_v20, %v1798_v20  ;;  %v1272_v23 = vpop.f32.mrb[96].mxu1 }
 0x1d5   :  { %v1799_v24 = vsel %vm1671_vm3, %v1557_v19, %v1735_v21  ;;  %v1273_v25 = vadd.f32 %v3537_v15, %v1272_v23  ;;  %v1561_v26 = vpop.f32.mrb[96].mxu0  ;;  %v1274_v27 = vpop.f32.mrb[97].mxu1 }
 0x1d6   :  { %2119 = vst.msk [vmem:[%s3650_s3 + $0xb8] sm:$0xf] %vm2072_vm1, %v2412_v22  ;;  %v2413_v28 = vpack.c.bf16 %v1799_v24, %v1799_v24  ;;  %v1563_v29 = vpop.f32.mrb[97].mxu0  ;;  %v1275_v30 = vpop.f32.mrb[98].mxu1 }
 0x1d7   :  { %v1562_v31 = vadd.f32 %v1561_v26, %v1273_v25  ;;  %v1276_v32 = vadd.f32 %v3537_v15, %v1275_v30  ;;  %v1564_v33 = vpop.f32.mrb[98].mxu0  ;;  %v1277_v34 = vpop.f32.mrb[99].mxu1 }
 0x1d8   :  { %2120 = vst.msk [vmem:[%s3650_s3 + $0xbc] sm:$0xf] %vm2072_vm1, %v2413_v28  ;;  %v1566_v35 = vpop.f32.mrb[99].mxu0 }
 0x1d9   :  { %vm1672_vm4 = vcmp.gt.f32.partialorder %v1562_v31, 0.0  ;;  %v1736_v36 = vmul.f32 0.2, %v1562_v31  ;;  %v1565_v37 = vadd.f32 %v1564_v33, %v1276_v32 }
 0x1db   :  { %v1800_v38 = vsel %vm1672_vm4, %v1562_v31, %v1736_v36  ;;  %vm1673_vm5 = vcmp.gt.f32.partialorder %v1565_v37, 0.0  ;;  %v1737_v39 = vmul.f32 0.2, %v1565_v37 }
 0x1dc   :  { %v2414_v40 = vpack.c.bf16 %v1800_v38, %v1800_v38  ;;  %v1280_v41 = vpop.f32.mrb[100].mxu1 }
 0x1dd   :  { %v1801_v42 = vsel %vm1673_vm5, %v1565_v37, %v1737_v39  ;;  %v1281_v43 = vadd.f32 %v3537_v15, %v1280_v41  ;;  %v1569_v44 = vpop.f32.mrb[100].mxu0  ;;  %v1282_v45 = vpop.f32.mrb[101].mxu1 }
 0x1de   :  { %2121 = vst.msk [vmem:[%s3650_s3 + $0xc0] sm:$0xf] %vm2072_vm1, %v2414_v40  ;;  %v2415_v46 = vpack.c.bf16 %v1801_v42, %v1801_v42  ;;  %v1571_v47 = vpop.f32.mrb[101].mxu0  ;;  %v1283_v48 = vpop.f32.mrb[102].mxu1 }
 0x1df   :  { %v1570_v49 = vadd.f32 %v1569_v44, %v1281_v43  ;;  %v1284_v50 = vadd.f32 %v3537_v15, %v1283_v48  ;;  %v1572_v51 = vpop.f32.mrb[102].mxu0  ;;  %v1285_v52 = vpop.f32.mrb[103].mxu1 }
 0x1e0   :  { %2122 = vst.msk [vmem:[%s3650_s3 + $0xc4] sm:$0xf] %vm2072_vm1, %v2415_v46  ;;  %v1574_v53 = vpop.f32.mrb[103].mxu0 }
 0x1e1   :  { %vm1674_vm6 = vcmp.gt.f32.partialorder %v1570_v49, 0.0  ;;  %v1738_v54 = vmul.f32 0.2, %v1570_v49  ;;  %v1573_v55 = vadd.f32 %v1572_v51, %v1284_v50 }
 0x1e3   :  { %v1802_v56 = vsel %vm1674_vm6, %v1570_v49, %v1738_v54  ;;  %vm1675_vm7 = vcmp.gt.f32.partialorder %v1573_v55, 0.0  ;;  %v1739_v57 = vmul.f32 0.2, %v1573_v55 }
 0x1e4   :  { %v2416_v58 = vpack.c.bf16 %v1802_v56, %v1802_v56  ;;  %v1288_v59 = vpop.f32.mrb[104].mxu1 }
 0x1e5   :  { %v1803_v60 = vsel %vm1675_vm7, %v1573_v55, %v1739_v57  ;;  %v1289_v61 = vadd.f32 %v3537_v15, %v1288_v59  ;;  %v1577_v62 = vpop.f32.mrb[104].mxu0  ;;  %v1290_v63 = vpop.f32.mrb[105].mxu1 }
 0x1e6   :  { %2123 = vst.msk [vmem:[%s3650_s3 + $0xc8] sm:$0xf] %vm2072_vm1, %v2416_v58  ;;  %v2417_v0 = vpack.c.bf16 %v1803_v60, %v1803_v60  ;;  %v1579_v1 = vpop.f32.mrb[105].mxu0  ;;  %v1291_v2 = vpop.f32.mrb[106].mxu1 }
 0x1e7   :  { %v1578_v3 = vadd.f32 %v1577_v62, %v1289_v61  ;;  %v1292_v4 = vadd.f32 %v3537_v15, %v1291_v2  ;;  %v1580_v5 = vpop.f32.mrb[106].mxu0  ;;  %v1293_v6 = vpop.f32.mrb[107].mxu1 }
 0x1e8   :  { %2124 = vst.msk [vmem:[%s3650_s3 + $0xcc] sm:$0xf] %vm2072_vm1, %v2417_v0  ;;  %v1582_v7 = vpop.f32.mrb[107].mxu0 }
 0x1e9   :  { %vm1676_vm8 = vcmp.gt.f32.partialorder %v1578_v3, 0.0  ;;  %v1740_v8 = vmul.f32 0.2, %v1578_v3  ;;  %v1581_v9 = vadd.f32 %v1580_v5, %v1292_v4 }
 0x1eb   :  { %v1804_v10 = vsel %vm1676_vm8, %v1578_v3, %v1740_v8  ;;  %vm1677_vm9 = vcmp.gt.f32.partialorder %v1581_v9, 0.0  ;;  %v1741_v11 = vmul.f32 0.2, %v1581_v9 }
 0x1ec   :  { %v2418_v12 = vpack.c.bf16 %v1804_v10, %v1804_v10  ;;  %v1296_v13 = vpop.f32.mrb[108].mxu1 }
 0x1ed   :  { %v1805_v14 = vsel %vm1677_vm9, %v1581_v9, %v1741_v11  ;;  %v1297_v16 = vadd.f32 %v3537_v15, %v1296_v13  ;;  %v1585_v17 = vpop.f32.mrb[108].mxu0  ;;  %v1298_v18 = vpop.f32.mrb[109].mxu1 }
 0x1ee   :  { %2125 = vst.msk [vmem:[%s3650_s3 + $0xd0] sm:$0xf] %vm2072_vm1, %v2418_v12  ;;  %v2419_v19 = vpack.c.bf16 %v1805_v14, %v1805_v14  ;;  %v1587_v20 = vpop.f32.mrb[109].mxu0  ;;  %v1299_v21 = vpop.f32.mrb[110].mxu1 }
 0x1ef   :  { %v1586_v22 = vadd.f32 %v1585_v17, %v1297_v16  ;;  %v1300_v23 = vadd.f32 %v3537_v15, %v1299_v21  ;;  %v1588_v24 = vpop.f32.mrb[110].mxu0  ;;  %v1301_v25 = vpop.f32.mrb[111].mxu1 }
 0x1f0   :  { %2126 = vst.msk [vmem:[%s3650_s3 + $0xd4] sm:$0xf] %vm2072_vm1, %v2419_v19  ;;  %v1590_v26 = vpop.f32.mrb[111].mxu0 }
 0x1f1   :  { %vm1678_vm10 = vcmp.gt.f32.partialorder %v1586_v22, 0.0  ;;  %v1742_v27 = vmul.f32 0.2, %v1586_v22  ;;  %v1589_v28 = vadd.f32 %v1588_v24, %v1300_v23 }
 0x1f3   :  { %v1806_v29 = vsel %vm1678_vm10, %v1586_v22, %v1742_v27  ;;  %vm1679_vm11 = vcmp.gt.f32.partialorder %v1589_v28, 0.0  ;;  %v1743_v30 = vmul.f32 0.2, %v1589_v28 }
 0x1f4   :  { %v2420_v31 = vpack.c.bf16 %v1806_v29, %v1806_v29  ;;  %v1304_v32 = vpop.f32.mrb[112].mxu1 }
 0x1f5   :  { %v1807_v33 = vsel %vm1679_vm11, %v1589_v28, %v1743_v30  ;;  %v1305_v34 = vadd.f32 %v3537_v15, %v1304_v32  ;;  %v1593_v35 = vpop.f32.mrb[112].mxu0  ;;  %v1306_v36 = vpop.f32.mrb[113].mxu1 }
 0x1f6   :  { %2127 = vst.msk [vmem:[%s3650_s3 + $0xd8] sm:$0xf] %vm2072_vm1, %v2420_v31  ;;  %v2421_v37 = vpack.c.bf16 %v1807_v33, %v1807_v33  ;;  %v1595_v38 = vpop.f32.mrb[113].mxu0  ;;  %v1307_v39 = vpop.f32.mrb[114].mxu1 }
 0x1f7   :  { %v1594_v40 = vadd.f32 %v1593_v35, %v1305_v34  ;;  %v1308_v41 = vadd.f32 %v3537_v15, %v1307_v39  ;;  %v1596_v42 = vpop.f32.mrb[114].mxu0  ;;  %v1309_v43 = vpop.f32.mrb[115].mxu1 }
 0x1f8   :  { %2128 = vst.msk [vmem:[%s3650_s3 + $0xdc] sm:$0xf] %vm2072_vm1, %v2421_v37  ;;  %v1598_v44 = vpop.f32.mrb[115].mxu0 }
 0x1f9   :  { %vm1680_vm12 = vcmp.gt.f32.partialorder %v1594_v40, 0.0  ;;  %v1744_v45 = vmul.f32 0.2, %v1594_v40  ;;  %v1597_v46 = vadd.f32 %v1596_v42, %v1308_v41 }
 0x1fb   :  { %v1808_v47 = vsel %vm1680_vm12, %v1594_v40, %v1744_v45  ;;  %vm1681_vm13 = vcmp.gt.f32.partialorder %v1597_v46, 0.0  ;;  %v1745_v48 = vmul.f32 0.2, %v1597_v46 }
 0x1fc   :  { %v2422_v49 = vpack.c.bf16 %v1808_v47, %v1808_v47  ;;  %v1312_v50 = vpop.f32.mrb[116].mxu1 }
 0x1fd   :  { %v1809_v51 = vsel %vm1681_vm13, %v1597_v46, %v1745_v48  ;;  %v1313_v52 = vadd.f32 %v3537_v15, %v1312_v50  ;;  %v1601_v53 = vpop.f32.mrb[116].mxu0  ;;  %v1314_v54 = vpop.f32.mrb[117].mxu1 }
 0x1fe   :  { %2129 = vst.msk [vmem:[%s3650_s3 + $0xe0] sm:$0xf] %vm2072_vm1, %v2422_v49  ;;  %v2423_v55 = vpack.c.bf16 %v1809_v51, %v1809_v51  ;;  %v1603_v56 = vpop.f32.mrb[117].mxu0  ;;  %v1315_v57 = vpop.f32.mrb[118].mxu1 }
 0x1ff   :  { %v1602_v58 = vadd.f32 %v1601_v53, %v1313_v52  ;;  %v1316_v59 = vadd.f32 %v3537_v15, %v1315_v57  ;;  %v1604_v60 = vpop.f32.mrb[118].mxu0  ;;  %v1317_v61 = vpop.f32.mrb[119].mxu1 }
 0x200   :  { %2130 = vst.msk [vmem:[%s3650_s3 + $0xe4] sm:$0xf] %vm2072_vm1, %v2423_v55  ;;  %v1606_v62 = vpop.f32.mrb[119].mxu0 }
 0x201   :  { %vm1682_vm14 = vcmp.gt.f32.partialorder %v1602_v58, 0.0  ;;  %v1746_v63 = vmul.f32 0.2, %v1602_v58  ;;  %v1605_v0 = vadd.f32 %v1604_v60, %v1316_v59 }
 0x203   :  { %v1810_v1 = vsel %vm1682_vm14, %v1602_v58, %v1746_v63  ;;  %vm1683_vm15 = vcmp.gt.f32.partialorder %v1605_v0, 0.0  ;;  %v1747_v2 = vmul.f32 0.2, %v1605_v0 }
 0x204   :  { %v2424_v3 = vpack.c.bf16 %v1810_v1, %v1810_v1  ;;  %v1320_v4 = vpop.f32.mrb[120].mxu1 }
 0x205   :  { %v1811_v5 = vsel %vm1683_vm15, %v1605_v0, %v1747_v2  ;;  %v1321_v6 = vadd.f32 %v3537_v15, %v1320_v4  ;;  %v1609_v7 = vpop.f32.mrb[120].mxu0  ;;  %v1322_v8 = vpop.f32.mrb[121].mxu1 }
 0x206   :  { %2131 = vst.msk [vmem:[%s3650_s3 + $0xe8] sm:$0xf] %vm2072_vm1, %v2424_v3  ;;  %v2425_v9 = vpack.c.bf16 %v1811_v5, %v1811_v5  ;;  %v1611_v10 = vpop.f32.mrb[121].mxu0  ;;  %v1323_v11 = vpop.f32.mrb[122].mxu1 }
 0x207   :  { %v1610_v12 = vadd.f32 %v1609_v7, %v1321_v6  ;;  %v1324_v13 = vadd.f32 %v3537_v15, %v1323_v11  ;;  %v1612_v14 = vpop.f32.mrb[122].mxu0  ;;  %v1325_v16 = vpop.f32.mrb[123].mxu1 }
 0x208   :  { %2132 = vst.msk [vmem:[%s3650_s3 + $0xec] sm:$0xf] %vm2072_vm1, %v2425_v9  ;;  %v1614_v17 = vpop.f32.mrb[123].mxu0 }
 0x209   :  { %vm1684_vm0 = vcmp.gt.f32.partialorder %v1610_v12, 0.0  ;;  %v1748_v18 = vmul.f32 0.2, %v1610_v12  ;;  %v1613_v19 = vadd.f32 %v1612_v14, %v1324_v13 }
 0x20b   :  { %v1812_v20 = vsel %vm1684_vm0, %v1610_v12, %v1748_v18  ;;  %vm1685_vm2 = vcmp.gt.f32.partialorder %v1613_v19, 0.0  ;;  %v1749_v21 = vmul.f32 0.2, %v1613_v19 }
 0x20c   :  { %v2426_v22 = vpack.c.bf16 %v1812_v20, %v1812_v20  ;;  %v1328_v23 = vpop.f32.mrb[124].mxu1 }
 0x20d   :  { %v1813_v24 = vsel %vm1685_vm2, %v1613_v19, %v1749_v21  ;;  %v1329_v25 = vadd.f32 %v3537_v15, %v1328_v23  ;;  %v1617_v26 = vpop.f32.mrb[124].mxu0  ;;  %v1330_v27 = vpop.f32.mrb[125].mxu1 }
 0x20e   :  { %2133 = vst.msk [vmem:[%s3650_s3 + $0xf0] sm:$0xf] %vm2072_vm1, %v2426_v22  ;;  %v2427_v28 = vpack.c.bf16 %v1813_v24, %v1813_v24  ;;  %v1619_v29 = vpop.f32.mrb[125].mxu0  ;;  %v1331_v30 = vpop.f32.mrb[126].mxu1 }
 0x20f   :  { %v1618_v31 = vadd.f32 %v1617_v26, %v1329_v25  ;;  %v1332_v32 = vadd.f32 %v3537_v15, %v1331_v30  ;;  %v1620_v33 = vpop.f32.mrb[126].mxu0  ;;  %v1333_v34 = vpop.f32.mrb[127].mxu1 }
 0x210   :  { %2134 = vst.msk [vmem:[%s3650_s3 + $0xf4] sm:$0xf] %vm2072_vm1, %v2427_v28  ;;  %v1622_v35 = vpop.f32.mrb[127].mxu0 }
 0x211   :  { %vm1686_vm3 = vcmp.gt.f32.partialorder %v1618_v31, 0.0  ;;  %v1750_v36 = vmul.f32 0.2, %v1618_v31  ;;  %v1621_v37 = vadd.f32 %v1620_v33, %v1332_v32 }
 0x213   :  { %v1814_v38 = vsel %vm1686_vm3, %v1618_v31, %v1750_v36  ;;  %vm1687_vm4 = vcmp.gt.f32.partialorder %v1621_v37, 0.0  ;;  %v1751_v39 = vmul.f32 0.2, %v1621_v37 }
 0x214   :  { %v2428_v40 = vpack.c.bf16 %v1814_v38, %v1814_v38 }
 0x215   :  { %v1815_v41 = vsel %vm1687_vm4, %v1621_v37, %v1751_v39 }
 0x216   :  { %2135 = vst.msk [vmem:[%s3650_s3 + $0xf8] sm:$0xf] %vm2072_vm1, %v2428_v40  ;;  %v2429_v15 = vpack.c.bf16 %v1815_v41, %v1815_v41 }
 0x218   :  { %2136 = vst.msk [vmem:[%s3650_s3 + $0xfc] sm:$0xf] %vm2072_vm1, %v2429_v15 }

// kernel: forward.9
= control target key start
LH: loop header
LB: loop body
LE: loop exit
PB: predicated region body
PF: predicated region fallthrough
CT: control target
= control target key end

     0   :  { %vm1418_vm1 = vcmask 519168   ;;  %s2457_s1 = inlined_call_operand.vmem [shape: bf16[1024,64], index: 1, kind: input, shape index: {}]   ;;  %s2458_s0 = inlined_call_operand.vmem [shape: bf16[128,1024], index: 0, kind: input, shape index: {}]   ;;  %s2459_s2 = inlined_call_operand.vmem [shape: f32[1,64], index: 2, kind: input, shape index: {}]   ;;  %s2460_s3 = inlined_call_operand.vmem [shape: bf16[128,64], index: 3, kind: output, shape index: {}]  }
   0x1   :  { %v1856_v0 = vld [vmem:[%s2457_s1 + $0x40] sm:$0xff]   ;;  %v1860_v4 = vld [vmem:[%s2457_s1 + $0x48] sm:$0xff]   ;;  %v1864_v8 = vld [vmem:[%s2457_s1 + $0x50] sm:$0xff]  }
   0x2   :  { %v1857_v1 = vld [vmem:[%s2457_s1 + $0xc0] sm:$0xff]   ;;  %1600 = vmatprep.subr.bf16.mxu0 %v1856_v0  ;;  %v1861_v5 = vld [vmem:[%s2457_s1 + $0xc8] sm:$0xff]   ;;  %v1865_v9 = vld [vmem:[%s2457_s1 + $0xd0] sm:$0xff]  }
   0x3   :  { %v1858_v2 = vld [vmem:[%s2457_s1] sm:$0xff]   ;;  %1664 = vmatprep.subr.bf16.mxu1 %v1857_v1  ;;  %v1862_v6 = vld [vmem:[%s2457_s1 + $0x8] sm:$0xff]   ;;  %v1866_v10 = vld [vmem:[%s2457_s1 + $0x10] sm:$0xff]  }
   0x4   :  { %v1859_v3 = vld [vmem:[%s2457_s1 + $0x80] sm:$0xff]   ;;  %1601 = vmatpush3.bf16.msra.mxu0 %v1858_v2  ;;  %v1863_v7 = vld [vmem:[%s2457_s1 + $0x88] sm:$0xff]   ;;  %v1867_v11 = vld [vmem:[%s2457_s1 + $0x90] sm:$0xff]  }
   0x5   :  { %1665 = vmatpush3.bf16.msra.mxu1 %v1859_v3  ;;  %1602 = vmatprep.subr.bf16.mxu0 %v1860_v4  ;;  %v1868_v12 = vld [vmem:[%s2457_s1 + $0x58] sm:$0xff]   ;;  %v1872_v16 = vld [vmem:[%s2457_s1 + $0x60] sm:$0xff]   ;;  %v1876_v20 = vld [vmem:[%s2457_s1 + $0x68] sm:$0xff]  }
   0x6   :  { %1666 = vmatprep.subr.bf16.mxu1 %v1861_v5  ;;  %v1869_v13 = vld [vmem:[%s2457_s1 + $0xd8] sm:$0xff]   ;;  %v1873_v17 = vld [vmem:[%s2457_s1 + $0xe0] sm:$0xff]   ;;  %v1877_v21 = vld [vmem:[%s2457_s1 + $0xe8] sm:$0xff]  }
   0x7   :  { %v1870_v14 = vld [vmem:[%s2457_s1 + $0x18] sm:$0xff]   ;;  %v1874_v18 = vld [vmem:[%s2457_s1 + $0x20] sm:$0xff]   ;;  %v1878_v22 = vld [vmem:[%s2457_s1 + $0x28] sm:$0xff]  }
   0x8   :  { %1603 = vmatpush3.bf16.msra.mxu0 %v1862_v6  ;;  %v1871_v15 = vld [vmem:[%s2457_s1 + $0x98] sm:$0xff]   ;;  %v1875_v19 = vld [vmem:[%s2457_s1 + $0xa0] sm:$0xff]   ;;  %v1879_v23 = vld [vmem:[%s2457_s1 + $0xa8] sm:$0xff]  }
   0x9   :  { %1667 = vmatpush3.bf16.msra.mxu1 %v1863_v7  ;;  %1604 = vmatprep.subr.bf16.mxu0 %v1864_v8  ;;  %v1880_v24 = vld [vmem:[%s2457_s1 + $0x70] sm:$0xff]   ;;  %v1884_v28 = vld [vmem:[%s2457_s1 + $0x78] sm:$0xff]   ;;  %v15_v32 = vld [vmem:[%s2458_s0] sm:$0xff] }
   0xa   :  { %1668 = vmatprep.subr.bf16.mxu1 %v1865_v9  ;;  %v1881_v25 = vld [vmem:[%s2457_s1 + $0xf0] sm:$0xff]   ;;  %v1885_v29 = vld [vmem:[%s2457_s1 + $0xf8] sm:$0xff]   ;;  %v19_v33 = vld [vmem:[%s2458_s0 + $0x20] sm:$0xff] }
   0xb   :  { %v1882_v26 = vld [vmem:[%s2457_s1 + $0x30] sm:$0xff]   ;;  %v1886_v30 = vld [vmem:[%s2457_s1 + $0x38] sm:$0xff]   ;;  %v16_v34 = vld [vmem:[%s2458_s0 + $0x8] sm:$0xff]  ;;  %v1440_v35 = vcombine.low %v15_v32, %v19_v33  ;;  %v1441_v36 = vcombine.high %v15_v32, %v19_v33 }
   0xc   :  { %1605 = vmatpush3.bf16.msra.mxu0 %v1866_v10  ;;  %v1883_v27 = vld [vmem:[%s2457_s1 + $0xb0] sm:$0xff]   ;;  %v1887_v31 = vld [vmem:[%s2457_s1 + $0xb8] sm:$0xff]   ;;  %v20_v37 = vld [vmem:[%s2458_s0 + $0x28] sm:$0xff] }
   0xd   :  { %1669 = vmatpush3.bf16.msra.mxu1 %v1867_v11  ;;  %1606 = vmatprep.subr.bf16.mxu0 %v1868_v12  ;;  %v1442_v38 = vcombine.low %v16_v34, %v20_v37  ;;  %v1443_v39 = vcombine.high %v16_v34, %v20_v37  ;;  %v1888_v40 = vld [vmem:[%s2457_s1 + $0x140] sm:$0xff]   ;;  %v24_v47 = vld [vmem:[%s2458_s0 + $0x48] sm:$0xff]  ;;  %v1896_v62 = vld [vmem:[%s2457_s1 + $0x150] sm:$0xff]  }
   0xe   :  { %1670 = vmatprep.subr.bf16.mxu1 %v1869_v13  ;;  %950 = vmatprep.mubr.bf16.mxu0 %v1441_v36  ;;  %v1889_v41 = vld [vmem:[%s2457_s1 + $0x100] sm:$0xff]   ;;  %v28_v48 = vld [vmem:[%s2458_s0 + $0x68] sm:$0xff]  ;;  %v1897_v63 = vld [vmem:[%s2457_s1 + $0x110] sm:$0xff]  }
   0xf   :  { %1047 = vmatprep.mubr.bf16.mxu1 %v1443_v39  ;;  %v1890_v42 = vld [vmem:[%s2457_s1 + $0x1c0] sm:$0xff]   ;;  %v1451_v49 = vcombine.high %v24_v47, %v28_v48  ;;  %v1892_v50 = vld [vmem:[%s2457_s1 + $0x148] sm:$0xff]   ;;  %v1450_v53 = vcombine.low %v24_v47, %v28_v48  ;;  %v1898_v0 = vld [vmem:[%s2457_s1 + $0x1d0] sm:$0xff]  }
  0x10   :  { %1607 = vmatpush3.bf16.msra.mxu0 %v1870_v14  ;;  %v1891_v43 = vld [vmem:[%s2457_s1 + $0x180] sm:$0xff]   ;;  %v1893_v52 = vld [vmem:[%s2457_s1 + $0x108] sm:$0xff]   ;;  %v1899_v1 = vld [vmem:[%s2457_s1 + $0x190] sm:$0xff]  }
  0x11   :  { %1671 = vmatpush3.bf16.msra.mxu1 %v1871_v15  ;;  %1608 = vmatprep.subr.bf16.mxu0 %v1872_v16  ;;  %v23_v44 = vld [vmem:[%s2458_s0 + $0x40] sm:$0xff]  ;;  %v1894_v54 = vld [vmem:[%s2457_s1 + $0x1c8] sm:$0xff]   ;;  %v1900_v10 = vld [vmem:[%s2457_s1 + $0x158] sm:$0xff]  }
  0x12   :  { %1672 = vmatprep.subr.bf16.mxu1 %v1873_v17  ;;  %v27_v45 = vld [vmem:[%s2458_s0 + $0x60] sm:$0xff]  ;;  %v1895_v55 = vld [vmem:[%s2457_s1 + $0x188] sm:$0xff]   ;;  %v1901_v11 = vld [vmem:[%s2457_s1 + $0x118] sm:$0xff]  }
  0x13   :  { %v1449_v46 = vcombine.high %v23_v44, %v27_v45  ;;  %v1448_v51 = vcombine.low %v23_v44, %v27_v45  ;;  %v31_v56 = vld [vmem:[%s2458_s0 + $0x80] sm:$0xff]  ;;  %v32_v58 = vld [vmem:[%s2458_s0 + $0x88] sm:$0xff]  ;;  %v1902_v12 = vld [vmem:[%s2457_s1 + $0x1d8] sm:$0xff]  }
  0x14   :  { %1609 = vmatpush3.bf16.msra.mxu0 %v1874_v18  ;;  %v35_v57 = vld [vmem:[%s2458_s0 + $0xa0] sm:$0xff]  ;;  %v36_v59 = vld [vmem:[%s2458_s0 + $0xa8] sm:$0xff]  ;;  %v1903_v13 = vld [vmem:[%s2457_s1 + $0x198] sm:$0xff]  }
  0x15   :  { %1673 = vmatpush3.bf16.msra.mxu1 %v1875_v19  ;;  %1610 = vmatprep.subr.bf16.mxu0 %v1876_v20  ;;  %v1457_v60 = vcombine.high %v31_v56, %v35_v57  ;;  %v1459_v61 = vcombine.high %v32_v58, %v36_v59  ;;  %v1456_v2 = vcombine.low %v31_v56, %v35_v57  ;;  %v39_v3 = vld [vmem:[%s2458_s0 + $0xc0] sm:$0xff]  ;;  %v40_v5 = vld [vmem:[%s2458_s0 + $0xc8] sm:$0xff]  ;;  %v1913_v39 = vld [vmem:[%s2457_s1 + $0x130] sm:$0xff]  }
  0x16   :  { %1674 = vmatprep.subr.bf16.mxu1 %v1877_v21  ;;  %v43_v4 = vld [vmem:[%s2458_s0 + $0xe0] sm:$0xff]  ;;  %v1458_v6 = vcombine.low %v32_v58, %v36_v59  ;;  %v44_v8 = vld [vmem:[%s2458_s0 + $0xe8] sm:$0xff]  ;;  %v1917_v48 = vld [vmem:[%s2457_s1 + $0x138] sm:$0xff]  }
  0x17   :  { %v1465_v7 = vcombine.high %v39_v3, %v43_v4  ;;  %v1467_v9 = vcombine.high %v40_v5, %v44_v8  ;;  %v47_v14 = vld [vmem:[%s2458_s0 + $0x100] sm:$0xff]  ;;  %v48_v16 = vld [vmem:[%s2458_s0 + $0x108] sm:$0xff]  ;;  %v1464_v19 = vcombine.low %v39_v3, %v43_v4  ;;  %v1466_v21 = vcombine.low %v40_v5, %v44_v8  ;;  %v26_v8 = vld [vmem:[%s2458_s0 + $0x58] sm:$0xff] }
  0x18   :  { %1611 = vmatpush3.bf16.msra.mxu0 %v1878_v22  ;;  %v51_v15 = vld [vmem:[%s2458_s0 + $0x120] sm:$0xff]  ;;  %v52_v17 = vld [vmem:[%s2458_s0 + $0x128] sm:$0xff] }
  0x19   :  { %1675 = vmatpush3.bf16.msra.mxu1 %v1879_v23  ;;  %1612 = vmatprep.subr.bf16.mxu0 %v1880_v24  ;;  %v1904_v18 = vld [vmem:[%s2457_s1 + $0x160] sm:$0xff]   ;;  %v1473_v22 = vcombine.high %v47_v14, %v51_v15  ;;  %v1475_v24 = vcombine.high %v48_v16, %v52_v17  ;;  %v1910_v32 = vld [vmem:[%s2457_s1 + $0x1e8] sm:$0xff]   ;;  %v1472_v34 = vcombine.low %v47_v14, %v51_v15  ;;  %v33_v14 = vld [vmem:[%s2458_s0 + $0x90] sm:$0xff] }
  0x1a   :  { %1676 = vmatprep.subr.bf16.mxu1 %v1881_v25  ;;  %v1905_v20 = vld [vmem:[%s2457_s1 + $0x120] sm:$0xff]   ;;  %v1911_v33 = vld [vmem:[%s2457_s1 + $0x1a8] sm:$0xff]   ;;  %v37_v15 = vld [vmem:[%s2458_s0 + $0xb0] sm:$0xff] }
  0x1b   :  { %v1906_v23 = vld [vmem:[%s2457_s1 + $0x1e0] sm:$0xff]   ;;  %v64_v44 = vld [vmem:[%s2458_s0 + $0x188] sm:$0xff] }
  0x1c   :  { %1613 = vmatpush3.bf16.msra.mxu0 %v1882_v26  ;;  %v1907_v25 = vld [vmem:[%s2457_s1 + $0x1a0] sm:$0xff]   ;;  %v68_v45 = vld [vmem:[%s2458_s0 + $0x1a8] sm:$0xff] }
  0x1d   :  { %1677 = vmatpush3.bf16.msra.mxu1 %v1883_v27  ;;  %1614 = vmatprep.subr.bf16.mxu0 %v1884_v28  ;;  %v55_v26 = vld [vmem:[%s2458_s0 + $0x140] sm:$0xff]  ;;  %v1908_v28 = vld [vmem:[%s2457_s1 + $0x168] sm:$0xff]   ;;  %v1490_v59 = vcombine.low %v64_v44, %v68_v45 }
  0x1e   :  { %1678 = vmatprep.subr.bf16.mxu1 %v1885_v29  ;;  %v59_v27 = vld [vmem:[%s2458_s0 + $0x160] sm:$0xff]  ;;  %v56_v29 = vld [vmem:[%s2458_s0 + $0x148] sm:$0xff] }
  0x1f   :  { %v1481_v36 = vcombine.high %v55_v26, %v59_v27  ;;  %v1480_v47 = vcombine.low %v55_v26, %v59_v27  ;;  %v72_v56 = vld [vmem:[%s2458_s0 + $0x1c8] sm:$0xff]  ;;  %v1460_v26 = vcombine.low %v33_v14, %v37_v15 }
  0x20   :  { %1615 = vmatpush3.bf16.msra.mxu0 %v1886_v30  ;;  %v60_v30 = vld [vmem:[%s2458_s0 + $0x168] sm:$0xff] }
  0x21   :  { %1679 = vmatpush3.bf16.msra.mxu1 %v1887_v31  ;;  %1728 = vmatprep.subr.bf16.mxu0 %v1888_v40  ;;  %v1909_v31 = vld [vmem:[%s2457_s1 + $0x128] sm:$0xff]   ;;  %v1483_v37 = vcombine.high %v56_v29, %v60_v30  ;;  %v1914_v40 = vld [vmem:[%s2457_s1 + $0x1f0] sm:$0xff]  }
  0x22   :  { %1792 = vmatprep.subr.bf16.mxu1 %v1890_v42  ;;  %v67_v42 = vld [vmem:[%s2458_s0 + $0x1a0] sm:$0xff]  ;;  %v76_v57 = vld [vmem:[%s2458_s0 + $0x1e8] sm:$0xff] }
  0x23   :  { %951 = vmatmul.mubr.bf16.vlgmr.msra.gmra.mrb[0].mxu0 %v1440_v35  ;;  %v1474_v35 = vcombine.low %v48_v16, %v52_v17  ;;  %v1498_v3 = vcombine.low %v72_v56, %v76_v57  ;;  %v34_v16 = vld [vmem:[%s2458_s0 + $0x98] sm:$0xff] }
  0x24   :  { %1048 = vmatmul.mubr.bf16.vlgmr.msra.gmra.mrb[0].mxu1 %v1442_v38  ;;  %1729 = vmatpush3.bf16.msra.mxu0 %v1889_v41  ;;  %v1912_v38 = vld [vmem:[%s2457_s1 + $0x170] sm:$0xff]   ;;  %v63_v41 = vld [vmem:[%s2458_s0 + $0x180] sm:$0xff]  ;;  %v38_v17 = vld [vmem:[%s2458_s0 + $0xb8] sm:$0xff] }
  0x25   :  { %1793 = vmatpush3.bf16.msra.mxu1 %v1891_v43  ;;  %958 = vmatprep.mubr.bf16.mxu0 %v1449_v46  ;;  %v1915_v43 = vld [vmem:[%s2457_s1 + $0x1b0] sm:$0xff]   ;;  %v1916_v46 = vld [vmem:[%s2457_s1 + $0x178] sm:$0xff]   ;;  %v1488_v58 = vcombine.low %v63_v41, %v67_v42  ;;  %v1462_v27 = vcombine.low %v34_v16, %v38_v17 }
  0x26   :  { %1055 = vmatprep.mubr.bf16.mxu1 %v1451_v49  ;;  %1730 = vmatprep.subr.bf16.mxu0 %v1892_v50  ;;  %v1482_v49 = vcombine.low %v56_v29, %v60_v30  ;;  %v1489_v50 = vcombine.high %v63_v41, %v67_v42  ;;  %v49_v30 = vld [vmem:[%s2458_s0 + $0x110] sm:$0xff]  ;;  %v62_v41 = vld [vmem:[%s2458_s0 + $0x178] sm:$0xff] }
  0x27   :  { %1794 = vmatprep.subr.bf16.mxu1 %v1894_v54  ;;  %v71_v54 = vld [vmem:[%s2458_s0 + $0x1c0] sm:$0xff] }
  0x28   :  { %1731 = vmatpush3.bf16.msra.mxu0 %v1893_v52  ;;  %v1491_v52 = vcombine.high %v64_v44, %v68_v45 }
  0x29   :  { %1795 = vmatpush3.bf16.msra.mxu1 %v1895_v55  ;;  %1732 = vmatprep.subr.bf16.mxu0 %v1896_v62  ;;  %v75_v55 = vld [vmem:[%s2458_s0 + $0x1e0] sm:$0xff]  ;;  %v17_v62 = vld [vmem:[%s2458_s0 + $0x10] sm:$0xff] }
  0x2a   :  { %1796 = vmatprep.subr.bf16.mxu1 %v1898_v0  ;;  %v18_v0 = vld [vmem:[%s2458_s0 + $0x18] sm:$0xff] }
  0x2b   :  { %959 = vmatmul.mubr.bf16.gmra.mrb[4].mxu0 %v1448_v51  ;;  %v1918_v51 = vld [vmem:[%s2457_s1 + $0x1f8] sm:$0xff]  }
  0x2c   :  { %1056 = vmatmul.mubr.bf16.gmra.mrb[4].mxu1 %v1450_v53  ;;  %966 = vmatprep.mubr.bf16.mxu0 %v1457_v60  ;;  %v1919_v53 = vld [vmem:[%s2457_s1 + $0x1b8] sm:$0xff]   ;;  %v1497_v60 = vcombine.high %v71_v54, %v75_v55 }
  0x2d   :  { %1063 = vmatprep.mubr.bf16.mxu1 %v1459_v61  ;;  %1733 = vmatpush3.bf16.msra.mxu0 %v1897_v63  ;;  %v1499_v61 = vcombine.high %v72_v56, %v76_v57  ;;  %v21_v63 = vld [vmem:[%s2458_s0 + $0x30] sm:$0xff]  ;;  %v74_v56 = vld [vmem:[%s2458_s0 + $0x1d8] sm:$0xff] }
  0x2e   :  { %1797 = vmatpush3.bf16.msra.mxu1 %v1899_v1  ;;  %1734 = vmatprep.subr.bf16.mxu0 %v1900_v10  ;;  %v22_v1 = vld [vmem:[%s2458_s0 + $0x38] sm:$0xff]  ;;  %v1445_v4 = vcombine.high %v17_v62, %v21_v63  ;;  %v1444_v10 = vcombine.low %v17_v62, %v21_v63 }
  0x2f   :  { %1798 = vmatprep.subr.bf16.mxu1 %v1902_v12  ;;  %v1447_v5 = vcombine.high %v18_v0, %v22_v1  ;;  %v78_v57 = vld [vmem:[%s2458_s0 + $0x1f8] sm:$0xff] }
  0x30   :  { %v1502_v63 = vcombine.low %v74_v56, %v78_v57 }
  0x31   :  { %1735 = vmatpush3.bf16.msra.mxu0 %v1901_v11  ;;  %v1446_v11 = vcombine.low %v18_v0, %v22_v1 }
  0x32   :  { %1799 = vmatpush3.bf16.msra.mxu1 %v1903_v13  ;;  %1736 = vmatprep.subr.bf16.mxu0 %v1904_v18 }
  0x33   :  { %967 = vmatmul.mubr.bf16.gmra.mrb[8].mxu0 %v1456_v2  ;;  %1800 = vmatprep.subr.bf16.mxu1 %v1906_v23  ;;  %v1496_v2 = vcombine.low %v71_v54, %v75_v55  ;;  %v45_v23 = vld [vmem:[%s2458_s0 + $0xf0] sm:$0xff] }
  0x34   :  { %1064 = vmatmul.mubr.bf16.gmra.mrb[8].mxu1 %v1458_v6  ;;  %974 = vmatprep.mubr.bf16.mxu0 %v1465_v7  ;;  %v25_v6 = vld [vmem:[%s2458_s0 + $0x50] sm:$0xff] }
  0x35   :  { %1071 = vmatprep.mubr.bf16.mxu1 %v1467_v9  ;;  %1737 = vmatpush3.bf16.msra.mxu0 %v1905_v20  ;;  %v29_v7 = vld [vmem:[%s2458_s0 + $0x70] sm:$0xff]  ;;  %v30_v9 = vld [vmem:[%s2458_s0 + $0x78] sm:$0xff]  ;;  %v1461_v20 = vcombine.high %v33_v14, %v37_v15 }
  0x36   :  { %1801 = vmatpush3.bf16.msra.mxu1 %v1907_v25  ;;  %1738 = vmatprep.subr.bf16.mxu0 %v1908_v28  ;;  %v1453_v12 = vcombine.high %v25_v6, %v29_v7  ;;  %v1455_v13 = vcombine.high %v26_v8, %v30_v9  ;;  %v1452_v18 = vcombine.low %v25_v6, %v29_v7  ;;  %v46_v25 = vld [vmem:[%s2458_s0 + $0xf8] sm:$0xff]  ;;  %v73_v54 = vld [vmem:[%s2458_s0 + $0x1d0] sm:$0xff] }
  0x37   :  { %1802 = vmatprep.subr.bf16.mxu1 %v1910_v32  ;;  %v50_v32 = vld [vmem:[%s2458_s0 + $0x118] sm:$0xff]  ;;  %v77_v55 = vld [vmem:[%s2458_s0 + $0x1f0] sm:$0xff] }
  0x38   :  { %v1500_v62 = vcombine.low %v73_v54, %v77_v55 }
  0x39   :  { %1739 = vmatpush3.bf16.msra.mxu0 %v1909_v31  ;;  %v53_v31 = vld [vmem:[%s2458_s0 + $0x130] sm:$0xff] }
  0x3a   :  { %1803 = vmatpush3.bf16.msra.mxu1 %v1911_v33  ;;  %1740 = vmatprep.subr.bf16.mxu0 %v1912_v38  ;;  %v54_v33 = vld [vmem:[%s2458_s0 + $0x138] sm:$0xff]  ;;  %v57_v38 = vld [vmem:[%s2458_s0 + $0x150] sm:$0xff]  ;;  %v1476_v42 = vcombine.low %v49_v30, %v53_v31 }
  0x3b   :  { %975 = vmatmul.mubr.bf16.gmra.mrb[12].mxu0 %v1464_v19  ;;  %1804 = vmatprep.subr.bf16.mxu1 %v1914_v40  ;;  %v1454_v19 = vcombine.low %v26_v8, %v30_v9  ;;  %v58_v40 = vld [vmem:[%s2458_s0 + $0x158] sm:$0xff] }
  0x3c   :  { %1072 = vmatmul.mubr.bf16.gmra.mrb[12].mxu1 %v1466_v21  ;;  %982 = vmatprep.mubr.bf16.mxu0 %v1473_v22  ;;  %v1463_v21 = vcombine.high %v34_v16, %v38_v17  ;;  %v41_v22 = vld [vmem:[%s2458_s0 + $0xd0] sm:$0xff]  ;;  %v1487_v45 = vcombine.high %v58_v40, %v62_v41 }
  0x3d   :  { %1079 = vmatprep.mubr.bf16.mxu1 %v1475_v24  ;;  %1741 = vmatpush3.bf16.msra.mxu0 %v1913_v39  ;;  %v42_v24 = vld [vmem:[%s2458_s0 + $0xd8] sm:$0xff]  ;;  %v1469_v28 = vcombine.high %v41_v22, %v45_v23  ;;  %v61_v39 = vld [vmem:[%s2458_s0 + $0x170] sm:$0xff] }
  0x3e   :  { %1805 = vmatpush3.bf16.msra.mxu1 %v1915_v43  ;;  %1742 = vmatprep.subr.bf16.mxu0 %v1916_v46  ;;  %v1471_v29 = vcombine.high %v42_v24, %v46_v25  ;;  %v1478_v43 = vcombine.low %v50_v32, %v54_v33  ;;  %v1485_v44 = vcombine.high %v57_v38, %v61_v39  ;;  %v65_v46 = vld [vmem:[%s2458_s0 + $0x190] sm:$0xff] }
  0x3f   :  { %1806 = vmatprep.subr.bf16.mxu1 %v1918_v51  ;;  %v1486_v51 = vcombine.low %v58_v40, %v62_v41 }
  0x41   :  { %1743 = vmatpush3.bf16.msra.mxu0 %v1917_v48  ;;  %v66_v48 = vld [vmem:[%s2458_s0 + $0x198] sm:$0xff] }
  0x42   :  { %1807 = vmatpush3.bf16.msra.mxu1 %v1919_v53 }
  0x43   :  { %983 = vmatmul.mubr.bf16.gmra.mrb[16].mxu0 %v1472_v34  ;;  %v1468_v34 = vcombine.low %v41_v22, %v45_v23 }
  0x44   :  { %1080 = vmatmul.mubr.bf16.gmra.mrb[16].mxu1 %v1474_v35  ;;  %990 = vmatprep.mubr.bf16.mxu0 %v1481_v36  ;;  %v1470_v35 = vcombine.low %v42_v24, %v46_v25  ;;  %v1477_v36 = vcombine.high %v49_v30, %v53_v31 }
  0x45   :  { %1087 = vmatprep.mubr.bf16.mxu1 %v1483_v37  ;;  %v1479_v37 = vcombine.high %v50_v32, %v54_v33 }
  0x4b   :  { %991 = vmatmul.mubr.bf16.gmra.mrb[20].mxu0 %v1480_v47  ;;  %v69_v47 = vld [vmem:[%s2458_s0 + $0x1b0] sm:$0xff] }
  0x4c   :  { %1088 = vmatmul.mubr.bf16.gmra.mrb[20].mxu1 %v1482_v49  ;;  %998 = vmatprep.mubr.bf16.mxu0 %v1489_v50  ;;  %v70_v49 = vld [vmem:[%s2458_s0 + $0x1b8] sm:$0xff]  ;;  %v1484_v50 = vcombine.low %v57_v38, %v61_v39 }
  0x4d   :  { %1095 = vmatprep.mubr.bf16.mxu1 %v1491_v52  ;;  %v1493_v52 = vcombine.high %v65_v46, %v69_v47  ;;  %v1495_v53 = vcombine.high %v66_v48, %v70_v49 }
  0x53   :  { %999 = vmatmul.mubr.bf16.gmra.mrb[24].mxu0 %v1488_v58  ;;  %v1492_v58 = vcombine.low %v65_v46, %v69_v47 }
  0x54   :  { %1096 = vmatmul.mubr.bf16.gmra.mrb[24].mxu1 %v1490_v59  ;;  %1006 = vmatprep.mubr.bf16.mxu0 %v1497_v60  ;;  %v1494_v59 = vcombine.low %v66_v48, %v70_v49  ;;  %v1501_v60 = vcombine.high %v73_v54, %v77_v55 }
  0x55   :  { %1103 = vmatprep.mubr.bf16.mxu1 %v1499_v61  ;;  %v1503_v61 = vcombine.high %v74_v56, %v78_v57 }
  0x5b   :  { %1007 = vmatmul.mubr.bf16.gmra.mrb[28].mxu0 %v1496_v2  ;;  %v2327_v2 = vld [vmem:[%s2459_s2] ss:$0 sm:$0xff] }
  0x5c   :  { %1104 = vmatmul.mubr.bf16.gmra.mrb[28].mxu1 %v1498_v3  ;;  %1144 = vmatprep.mubr.bf16.mxu0 %v1445_v4 }
  0x5d   :  { %1241 = vmatprep.mubr.bf16.mxu1 %v1447_v5 }
  0x63   :  { %1145 = vmatmul.mubr.bf16.vlgmr.msra.gmra.mrb[32].mxu0 %v1444_v10 }
  0x64   :  { %1242 = vmatmul.mubr.bf16.vlgmr.msra.gmra.mrb[32].mxu1 %v1446_v11  ;;  %1152 = vmatprep.mubr.bf16.mxu0 %v1453_v12 }
  0x65   :  { %1249 = vmatprep.mubr.bf16.mxu1 %v1455_v13 }
  0x6b   :  { %1153 = vmatmul.mubr.bf16.gmra.mrb[36].mxu0 %v1452_v18 }
  0x6c   :  { %1250 = vmatmul.mubr.bf16.gmra.mrb[36].mxu1 %v1454_v19  ;;  %1160 = vmatprep.mubr.bf16.mxu0 %v1461_v20 }
  0x6d   :  { %1257 = vmatprep.mubr.bf16.mxu1 %v1463_v21 }
  0x73   :  { %1161 = vmatmul.mubr.bf16.gmra.mrb[40].mxu0 %v1460_v26 }
  0x74   :  { %1258 = vmatmul.mubr.bf16.gmra.mrb[40].mxu1 %v1462_v27  ;;  %1168 = vmatprep.mubr.bf16.mxu0 %v1469_v28 }
  0x75   :  { %1265 = vmatprep.mubr.bf16.mxu1 %v1471_v29 }
  0x7b   :  { %1169 = vmatmul.mubr.bf16.gmra.mrb[44].mxu0 %v1468_v34 }
  0x7c   :  { %1266 = vmatmul.mubr.bf16.gmra.mrb[44].mxu1 %v1470_v35  ;;  %1176 = vmatprep.mubr.bf16.mxu0 %v1477_v36 }
  0x7d   :  { %1273 = vmatprep.mubr.bf16.mxu1 %v1479_v37 }
  0x83   :  { %1177 = vmatmul.mubr.bf16.gmra.mrb[48].mxu0 %v1476_v42 }
  0x84   :  { %1274 = vmatmul.mubr.bf16.gmra.mrb[48].mxu1 %v1478_v43  ;;  %1184 = vmatprep.mubr.bf16.mxu0 %v1485_v44 }
  0x85   :  { %1281 = vmatprep.mubr.bf16.mxu1 %v1487_v45 }
  0x8b   :  { %1185 = vmatmul.mubr.bf16.gmra.mrb[52].mxu0 %v1484_v50 }
  0x8c   :  { %1282 = vmatmul.mubr.bf16.gmra.mrb[52].mxu1 %v1486_v51  ;;  %1192 = vmatprep.mubr.bf16.mxu0 %v1493_v52 }
  0x8d   :  { %1289 = vmatprep.mubr.bf16.mxu1 %v1495_v53 }
  0x93   :  { %1193 = vmatmul.mubr.bf16.gmra.mrb[56].mxu0 %v1492_v58 }
  0x94   :  { %1290 = vmatmul.mubr.bf16.gmra.mrb[56].mxu1 %v1494_v59  ;;  %1200 = vmatprep.mubr.bf16.mxu0 %v1501_v60 }
  0x95   :  { %1297 = vmatprep.mubr.bf16.mxu1 %v1503_v61 }
  0x9b   :  { %1201 = vmatmul.mubr.bf16.gmra.mrb[60].mxu0 %v1500_v62 }
  0x9c   :  { %1298 = vmatmul.mubr.bf16.gmra.mrb[60].mxu1 %v1502_v63 }
  0xf6   :  { %v1616_v0 = vpop.f32.mrb[0].mxu0 }
  0xf7   :  { %v1680_v1 = vpop.f32.mrb[0].mxu1  ;;  %v1617_v3 = vpop.f32.mrb[1].mxu0 }
  0xf8   :  { %v1618_v4 = vadd.f32 %v1617_v3, %v1616_v0  ;;  %v1681_v5 = vpop.f32.mrb[1].mxu1  ;;  %v1619_v6 = vpop.f32.mrb[2].mxu0 }
  0xf9   :  { %v1682_v7 = vadd.f32 %v1681_v5, %v1680_v1  ;;  %v1683_v8 = vpop.f32.mrb[2].mxu1  ;;  %v1620_v9 = vpop.f32.mrb[3].mxu0 }
  0xfa   :  { %v953_v10 = vadd.f32 %v1618_v4, %v2327_v2  ;;  %v1621_v11 = vadd.f32 %v1620_v9, %v1619_v6  ;;  %v1684_v12 = vpop.f32.mrb[3].mxu1 }
  0xfb   :  { %v1685_v13 = vadd.f32 %v1684_v12, %v1683_v8 }
  0xfc   :  { %v2330_v14 = vadd.f32 %v1682_v7, %v953_v10  ;;  %v956_v15 = vadd.f32 %v1621_v11, %v2327_v2 }
  0xfe   :  { %v2333_v16 = vadd.f32 %v1685_v13, %v956_v15  ;;  %v1622_v17 = vpop.f32.mrb[4].mxu0 }
  0xff   :  { %v1686_v18 = vpop.f32.mrb[4].mxu1  ;;  %v1623_v19 = vpop.f32.mrb[5].mxu0 }
 0x100   :  { %v1624_v20 = vadd.f32 %v1623_v19, %v1622_v17  ;;  %v1687_v21 = vpop.f32.mrb[5].mxu1  ;;  %v1625_v22 = vpop.f32.mrb[6].mxu0 }
 0x101   :  { %v1688_v23 = vadd.f32 %v1687_v21, %v1686_v18  ;;  %v1689_v24 = vpop.f32.mrb[6].mxu1  ;;  %v1626_v25 = vpop.f32.mrb[7].mxu0 }
 0x102   :  { %v961_v26 = vadd.f32 %v1624_v20, %v2327_v2  ;;  %v1627_v27 = vadd.f32 %v1626_v25, %v1625_v22  ;;  %v1690_v28 = vpop.f32.mrb[7].mxu1 }
 0x103   :  { %v1691_v29 = vadd.f32 %v1690_v28, %v1689_v24 }
 0x104   :  { %v2336_v30 = vadd.f32 %v1688_v23, %v961_v26  ;;  %v964_v31 = vadd.f32 %v1627_v27, %v2327_v2 }
 0x106   :  { %v2339_v32 = vadd.f32 %v1691_v29, %v964_v31  ;;  %v1628_v33 = vpop.f32.mrb[8].mxu0 }
 0x107   :  { %v1692_v34 = vpop.f32.mrb[8].mxu1  ;;  %v1629_v35 = vpop.f32.mrb[9].mxu0 }
 0x108   :  { %v1630_v36 = vadd.f32 %v1629_v35, %v1628_v33  ;;  %v1693_v37 = vpop.f32.mrb[9].mxu1  ;;  %v1631_v38 = vpop.f32.mrb[10].mxu0 }
 0x109   :  { %v1694_v39 = vadd.f32 %v1693_v37, %v1692_v34  ;;  %v1695_v40 = vpop.f32.mrb[10].mxu1  ;;  %v1632_v41 = vpop.f32.mrb[11].mxu0 }
 0x10a   :  { %v969_v42 = vadd.f32 %v1630_v36, %v2327_v2  ;;  %v1633_v43 = vadd.f32 %v1632_v41, %v1631_v38  ;;  %v1696_v44 = vpop.f32.mrb[11].mxu1 }
 0x10b   :  { %v1697_v45 = vadd.f32 %v1696_v44, %v1695_v40 }
 0x10c   :  { %v2342_v46 = vadd.f32 %v1694_v39, %v969_v42  ;;  %v972_v47 = vadd.f32 %v1633_v43, %v2327_v2 }
 0x10e   :  { %v2345_v48 = vadd.f32 %v1697_v45, %v972_v47  ;;  %v1634_v49 = vpop.f32.mrb[12].mxu0 }
 0x10f   :  { %v1698_v50 = vpop.f32.mrb[12].mxu1  ;;  %v1635_v51 = vpop.f32.mrb[13].mxu0 }
 0x110   :  { %v1636_v52 = vadd.f32 %v1635_v51, %v1634_v49  ;;  %v1699_v53 = vpop.f32.mrb[13].mxu1  ;;  %v1637_v54 = vpop.f32.mrb[14].mxu0 }
 0x111   :  { %v1700_v55 = vadd.f32 %v1699_v53, %v1698_v50  ;;  %v1701_v56 = vpop.f32.mrb[14].mxu1  ;;  %v1638_v57 = vpop.f32.mrb[15].mxu0 }
 0x112   :  { %v977_v58 = vadd.f32 %v1636_v52, %v2327_v2  ;;  %v1639_v59 = vadd.f32 %v1638_v57, %v1637_v54  ;;  %v1702_v60 = vpop.f32.mrb[15].mxu1 }
 0x113   :  { %v1703_v61 = vadd.f32 %v1702_v60, %v1701_v56 }
 0x114   :  { %v2348_v62 = vadd.f32 %v1700_v55, %v977_v58  ;;  %v980_v63 = vadd.f32 %v1639_v59, %v2327_v2 }
 0x116   :  { %v2351_v0 = vadd.f32 %v1703_v61, %v980_v63  ;;  %v1640_v1 = vpop.f32.mrb[16].mxu0 }
 0x117   :  { %v1704_v3 = vpop.f32.mrb[16].mxu1  ;;  %v1641_v4 = vpop.f32.mrb[17].mxu0 }
 0x118   :  { %v1642_v5 = vadd.f32 %v1641_v4, %v1640_v1  ;;  %v1705_v6 = vpop.f32.mrb[17].mxu1  ;;  %v1643_v7 = vpop.f32.mrb[18].mxu0 }
 0x119   :  { %v1706_v8 = vadd.f32 %v1705_v6, %v1704_v3  ;;  %v1707_v9 = vpop.f32.mrb[18].mxu1  ;;  %v1644_v10 = vpop.f32.mrb[19].mxu0 }
 0x11a   :  { %v985_v11 = vadd.f32 %v1642_v5, %v2327_v2  ;;  %v1645_v12 = vadd.f32 %v1644_v10, %v1643_v7  ;;  %v1708_v13 = vpop.f32.mrb[19].mxu1 }
 0x11b   :  { %v1709_v15 = vadd.f32 %v1708_v13, %v1707_v9 }
 0x11c   :  { %v2354_v17 = vadd.f32 %v1706_v8, %v985_v11  ;;  %v988_v18 = vadd.f32 %v1645_v12, %v2327_v2 }
 0x11e   :  { %v2357_v19 = vadd.f32 %v1709_v15, %v988_v18  ;;  %v1646_v20 = vpop.f32.mrb[20].mxu0 }
 0x11f   :  { %v1710_v21 = vpop.f32.mrb[20].mxu1  ;;  %v1647_v22 = vpop.f32.mrb[21].mxu0 }
 0x120   :  { %v1648_v23 = vadd.f32 %v1647_v22, %v1646_v20  ;;  %v1711_v24 = vpop.f32.mrb[21].mxu1  ;;  %v1649_v25 = vpop.f32.mrb[22].mxu0 }
 0x121   :  { %v1712_v26 = vadd.f32 %v1711_v24, %v1710_v21  ;;  %v1713_v27 = vpop.f32.mrb[22].mxu1  ;;  %v1650_v28 = vpop.f32.mrb[23].mxu0 }
 0x122   :  { %v993_v29 = vadd.f32 %v1648_v23, %v2327_v2  ;;  %v1651_v31 = vadd.f32 %v1650_v28, %v1649_v25  ;;  %v1714_v33 = vpop.f32.mrb[23].mxu1 }
 0x123   :  { %v1715_v34 = vadd.f32 %v1714_v33, %v1713_v27 }
 0x124   :  { %v2360_v35 = vadd.f32 %v1712_v26, %v993_v29  ;;  %v996_v36 = vadd.f32 %v1651_v31, %v2327_v2 }
 0x126   :  { %v2363_v37 = vadd.f32 %v1715_v34, %v996_v36  ;;  %v1652_v38 = vpop.f32.mrb[24].mxu0 }
 0x127   :  { %v1716_v39 = vpop.f32.mrb[24].mxu1  ;;  %v1653_v40 = vpop.f32.mrb[25].mxu0 }
 0x128   :  { %v1654_v41 = vadd.f32 %v1653_v40, %v1652_v38  ;;  %v1717_v42 = vpop.f32.mrb[25].mxu1  ;;  %v1655_v43 = vpop.f32.mrb[26].mxu0 }
 0x129   :  { %v1718_v44 = vadd.f32 %v1717_v42, %v1716_v39  ;;  %v1719_v45 = vpop.f32.mrb[26].mxu1  ;;  %v1656_v47 = vpop.f32.mrb[27].mxu0 }
 0x12a   :  { %v1001_v49 = vadd.f32 %v1654_v41, %v2327_v2  ;;  %v1657_v50 = vadd.f32 %v1656_v47, %v1655_v43  ;;  %v1720_v51 = vpop.f32.mrb[27].mxu1 }
 0x12b   :  { %v1721_v52 = vadd.f32 %v1720_v51, %v1719_v45 }
 0x12c   :  { %v2366_v53 = vadd.f32 %v1718_v44, %v1001_v49  ;;  %v1004_v54 = vadd.f32 %v1657_v50, %v2327_v2 }
 0x12e   :  { %v2369_v55 = vadd.f32 %v1721_v52, %v1004_v54  ;;  %v1658_v56 = vpop.f32.mrb[28].mxu0 }
 0x12f   :  { %v1722_v57 = vpop.f32.mrb[28].mxu1  ;;  %v1659_v58 = vpop.f32.mrb[29].mxu0 }
 0x130   :  { %v1660_v59 = vadd.f32 %v1659_v58, %v1658_v56  ;;  %v1723_v60 = vpop.f32.mrb[29].mxu1  ;;  %v1661_v61 = vpop.f32.mrb[30].mxu0 }
 0x131   :  { %v1724_v63 = vadd.f32 %v1723_v60, %v1722_v57  ;;  %v1725_v1 = vpop.f32.mrb[30].mxu1  ;;  %v1662_v3 = vpop.f32.mrb[31].mxu0 }
 0x132   :  { %v1009_v4 = vadd.f32 %v1660_v59, %v2327_v2  ;;  %v1663_v5 = vadd.f32 %v1662_v3, %v1661_v61  ;;  %v1726_v6 = vpop.f32.mrb[31].mxu1 }
 0x133   :  { %v1727_v7 = vadd.f32 %v1726_v6, %v1725_v1 }
 0x134   :  { %v2372_v8 = vadd.f32 %v1724_v63, %v1009_v4  ;;  %v1012_v9 = vadd.f32 %v1663_v5, %v2327_v2 }
 0x136   :  { %v2375_v10 = vadd.f32 %v1727_v7, %v1012_v9  ;;  %v1744_v11 = vpop.f32.mrb[32].mxu0 }
 0x137   :  { %v1808_v12 = vpop.f32.mrb[32].mxu1  ;;  %v1745_v13 = vpop.f32.mrb[33].mxu0 }
 0x138   :  { %v1746_v15 = vadd.f32 %v1745_v13, %v1744_v11  ;;  %v1809_v18 = vpop.f32.mrb[33].mxu1  ;;  %v1747_v20 = vpop.f32.mrb[34].mxu0 }
 0x139   :  { %v1810_v21 = vadd.f32 %v1809_v18, %v1808_v12  ;;  %v1811_v22 = vpop.f32.mrb[34].mxu1  ;;  %v1748_v23 = vpop.f32.mrb[35].mxu0 }
 0x13a   :  { %v1147_v24 = vadd.f32 %v1746_v15, %v2330_v14  ;;  %v1749_v25 = vadd.f32 %v1748_v23, %v1747_v20  ;;  %v1812_v26 = vpop.f32.mrb[35].mxu1 }
 0x13b   :  { %v1813_v27 = vadd.f32 %v1812_v26, %v1811_v22 }
 0x13c   :  { %v1244_v28 = vadd.f32 %v1810_v21, %v1147_v24  ;;  %v1150_v29 = vadd.f32 %v1749_v25, %v2333_v16 }
 0x13e   :  { %vm1306_vm0 = vcmp.gt.f32.partialorder %v1244_v28, 0.0  ;;  %v1322_v2 = vmul.f32 0.2, %v1244_v28  ;;  %v1247_v31 = vadd.f32 %v1813_v27, %v1150_v29  ;;  %v1750_v33 = vpop.f32.mrb[36].mxu0 }
 0x13f   :  { %v1814_v34 = vpop.f32.mrb[36].mxu1  ;;  %v1751_v36 = vpop.f32.mrb[37].mxu0 }
 0x140   :  { %v1338_v38 = vsel %vm1306_vm0, %v1244_v28, %v1322_v2  ;;  %vm1307_vm2 = vcmp.gt.f32.partialorder %v1247_v31, 0.0  ;;  %v1323_v39 = vmul.f32 0.2, %v1247_v31  ;;  %v1752_v40 = vadd.f32 %v1751_v36, %v1750_v33  ;;  %v1815_v41 = vpop.f32.mrb[37].mxu1  ;;  %v1753_v42 = vpop.f32.mrb[38].mxu0 }
 0x141   :  { %v1584_v14 = vpack.c.bf16 %v1338_v38, %v1338_v38  ;;  %v1816_v43 = vadd.f32 %v1815_v41, %v1814_v34  ;;  %v1817_v44 = vpop.f32.mrb[38].mxu1  ;;  %v1754_v45 = vpop.f32.mrb[39].mxu0 }
 0x142   :  { %v1339_v47 = vsel %vm1307_vm2, %v1247_v31, %v1323_v39  ;;  %v1155_v16 = vadd.f32 %v1752_v40, %v2336_v30  ;;  %v1755_v49 = vadd.f32 %v1754_v45, %v1753_v42  ;;  %v1818_v50 = vpop.f32.mrb[39].mxu1 }
 0x143   :  { %1419 = vst.msk [vmem:[%s2460_s3] sm:$0xf] %vm1418_vm1, %v1584_v14  ;;  %v1585_v51 = vpack.c.bf16 %v1339_v47, %v1339_v47  ;;  %v1819_v52 = vadd.f32 %v1818_v50, %v1817_v44 }
 0x144   :  { %v1252_v54 = vadd.f32 %v1816_v43, %v1155_v16  ;;  %v1158_v56 = vadd.f32 %v1755_v49, %v2339_v32 }
 0x145   :  { %1420 = vst.msk [vmem:[%s2460_s3 + $0x4] sm:$0xf] %vm1418_vm1, %v1585_v51 }
 0x146   :  { %vm1308_vm3 = vcmp.gt.f32.partialorder %v1252_v54, 0.0  ;;  %v1324_v57 = vmul.f32 0.2, %v1252_v54  ;;  %v1255_v30 = vadd.f32 %v1819_v52, %v1158_v56  ;;  %v1756_v58 = vpop.f32.mrb[40].mxu0 }
 0x147   :  { %v1820_v59 = vpop.f32.mrb[40].mxu1  ;;  %v1757_v60 = vpop.f32.mrb[41].mxu0 }
 0x148   :  { %v1340_v61 = vsel %vm1308_vm3, %v1252_v54, %v1324_v57  ;;  %vm1309_vm4 = vcmp.gt.f32.partialorder %v1255_v30, 0.0  ;;  %v1325_v63 = vmul.f32 0.2, %v1255_v30  ;;  %v1758_v1 = vadd.f32 %v1757_v60, %v1756_v58  ;;  %v1821_v3 = vpop.f32.mrb[41].mxu1  ;;  %v1759_v4 = vpop.f32.mrb[42].mxu0 }
 0x149   :  { %v1586_v5 = vpack.c.bf16 %v1340_v61, %v1340_v61  ;;  %v1822_v6 = vadd.f32 %v1821_v3, %v1820_v59  ;;  %v1823_v32 = vpop.f32.mrb[42].mxu1  ;;  %v1760_v7 = vpop.f32.mrb[43].mxu0 }
 0x14a   :  { %v1341_v9 = vsel %vm1309_vm4, %v1255_v30, %v1325_v63  ;;  %v1163_v11 = vadd.f32 %v1758_v1, %v2342_v46  ;;  %v1761_v12 = vadd.f32 %v1760_v7, %v1759_v4  ;;  %v1824_v13 = vpop.f32.mrb[43].mxu1 }
 0x14b   :  { %1421 = vst.msk [vmem:[%s2460_s3 + $0x8] sm:$0xf] %vm1418_vm1, %v1586_v5  ;;  %v1587_v15 = vpack.c.bf16 %v1341_v9, %v1341_v9  ;;  %v1825_v18 = vadd.f32 %v1824_v13, %v1823_v32 }
 0x14c   :  { %v1260_v20 = vadd.f32 %v1822_v6, %v1163_v11  ;;  %v1166_v21 = vadd.f32 %v1761_v12, %v2345_v48 }
 0x14d   :  { %1422 = vst.msk [vmem:[%s2460_s3 + $0xc] sm:$0xf] %vm1418_vm1, %v1587_v15 }
 0x14e   :  { %vm1310_vm5 = vcmp.gt.f32.partialorder %v1260_v20, 0.0  ;;  %v1326_v22 = vmul.f32 0.2, %v1260_v20  ;;  %v1263_v46 = vadd.f32 %v1825_v18, %v1166_v21  ;;  %v1762_v23 = vpop.f32.mrb[44].mxu0 }
 0x14f   :  { %v1826_v24 = vpop.f32.mrb[44].mxu1  ;;  %v1763_v25 = vpop.f32.mrb[45].mxu0 }
 0x150   :  { %v1342_v26 = vsel %vm1310_vm5, %v1260_v20, %v1326_v22  ;;  %vm1311_vm6 = vcmp.gt.f32.partialorder %v1263_v46, 0.0  ;;  %v1327_v27 = vmul.f32 0.2, %v1263_v46  ;;  %v1764_v28 = vadd.f32 %v1763_v25, %v1762_v23  ;;  %v1827_v29 = vpop.f32.mrb[45].mxu1  ;;  %v1765_v2 = vpop.f32.mrb[46].mxu0 }
 0x151   :  { %v1588_v31 = vpack.c.bf16 %v1342_v26, %v1342_v26  ;;  %v1828_v33 = vadd.f32 %v1827_v29, %v1826_v24  ;;  %v1829_v48 = vpop.f32.mrb[46].mxu1  ;;  %v1766_v34 = vpop.f32.mrb[47].mxu0 }
 0x152   :  { %v1343_v36 = vsel %vm1311_vm6, %v1263_v46, %v1327_v27  ;;  %v1171_v38 = vadd.f32 %v1764_v28, %v2348_v62  ;;  %v1767_v39 = vadd.f32 %v1766_v34, %v1765_v2  ;;  %v1830_v40 = vpop.f32.mrb[47].mxu1 }
 0x153   :  { %1423 = vst.msk [vmem:[%s2460_s3 + $0x10] sm:$0xf] %vm1418_vm1, %v1588_v31  ;;  %v1589_v41 = vpack.c.bf16 %v1343_v36, %v1343_v36  ;;  %v1831_v42 = vadd.f32 %v1830_v40, %v1829_v48 }
 0x154   :  { %v1268_v14 = vadd.f32 %v1828_v33, %v1171_v38  ;;  %v1174_v43 = vadd.f32 %v1767_v39, %v2351_v0 }
 0x155   :  { %1424 = vst.msk [vmem:[%s2460_s3 + $0x14] sm:$0xf] %vm1418_vm1, %v1589_v41 }
 0x156   :  { %vm1312_vm7 = vcmp.gt.f32.partialorder %v1268_v14, 0.0  ;;  %v1328_v44 = vmul.f32 0.2, %v1268_v14  ;;  %v1271_v62 = vadd.f32 %v1831_v42, %v1174_v43  ;;  %v1768_v45 = vpop.f32.mrb[48].mxu0 }
 0x157   :  { %v1832_v47 = vpop.f32.mrb[48].mxu1  ;;  %v1769_v16 = vpop.f32.mrb[49].mxu0 }
 0x158   :  { %v1344_v49 = vsel %vm1312_vm7, %v1268_v14, %v1328_v44  ;;  %vm1313_vm8 = vcmp.gt.f32.partialorder %v1271_v62, 0.0  ;;  %v1329_v50 = vmul.f32 0.2, %v1271_v62  ;;  %v1770_v51 = vadd.f32 %v1769_v16, %v1768_v45  ;;  %v1833_v52 = vpop.f32.mrb[49].mxu1  ;;  %v1771_v54 = vpop.f32.mrb[50].mxu0 }
 0x159   :  { %v1590_v56 = vpack.c.bf16 %v1344_v49, %v1344_v49  ;;  %v1834_v57 = vadd.f32 %v1833_v52, %v1832_v47  ;;  %v1835_v0 = vpop.f32.mrb[50].mxu1  ;;  %v1772_v30 = vpop.f32.mrb[51].mxu0 }
 0x15a   :  { %v1345_v58 = vsel %vm1313_vm8, %v1271_v62, %v1329_v50  ;;  %v1179_v59 = vadd.f32 %v1770_v51, %v2354_v17  ;;  %v1773_v60 = vadd.f32 %v1772_v30, %v1771_v54  ;;  %v1836_v61 = vpop.f32.mrb[51].mxu1 }
 0x15b   :  { %1425 = vst.msk [vmem:[%s2460_s3 + $0x18] sm:$0xf] %vm1418_vm1, %v1590_v56  ;;  %v1591_v63 = vpack.c.bf16 %v1345_v58, %v1345_v58  ;;  %v1837_v1 = vadd.f32 %v1836_v61, %v1835_v0 }
 0x15c   :  { %v1276_v3 = vadd.f32 %v1834_v57, %v1179_v59  ;;  %v1182_v4 = vadd.f32 %v1773_v60, %v2357_v19 }
 0x15d   :  { %1426 = vst.msk [vmem:[%s2460_s3 + $0x1c] sm:$0xf] %vm1418_vm1, %v1591_v63 }
 0x15e   :  { %vm1314_vm9 = vcmp.gt.f32.partialorder %v1276_v3, 0.0  ;;  %v1330_v5 = vmul.f32 0.2, %v1276_v3  ;;  %v1279_v17 = vadd.f32 %v1837_v1, %v1182_v4  ;;  %v1774_v6 = vpop.f32.mrb[52].mxu0 }
 0x15f   :  { %v1838_v32 = vpop.f32.mrb[52].mxu1  ;;  %v1775_v7 = vpop.f32.mrb[53].mxu0 }
 0x160   :  { %v1346_v9 = vsel %vm1314_vm9, %v1276_v3, %v1330_v5  ;;  %vm1315_vm10 = vcmp.gt.f32.partialorder %v1279_v17, 0.0  ;;  %v1331_v11 = vmul.f32 0.2, %v1279_v17  ;;  %v1776_v12 = vadd.f32 %v1775_v7, %v1774_v6  ;;  %v1839_v13 = vpop.f32.mrb[53].mxu1  ;;  %v1777_v15 = vpop.f32.mrb[54].mxu0 }
 0x161   :  { %v1592_v18 = vpack.c.bf16 %v1346_v9, %v1346_v9  ;;  %v1840_v20 = vadd.f32 %v1839_v13, %v1838_v32  ;;  %v1841_v19 = vpop.f32.mrb[54].mxu1  ;;  %v1778_v21 = vpop.f32.mrb[55].mxu0 }
 0x162   :  { %v1347_v22 = vsel %vm1315_vm10, %v1279_v17, %v1331_v11  ;;  %v1187_v46 = vadd.f32 %v1776_v12, %v2360_v35  ;;  %v1779_v23 = vadd.f32 %v1778_v21, %v1777_v15  ;;  %v1842_v24 = vpop.f32.mrb[55].mxu1 }
 0x163   :  { %1427 = vst.msk [vmem:[%s2460_s3 + $0x20] sm:$0xf] %vm1418_vm1, %v1592_v18  ;;  %v1593_v25 = vpack.c.bf16 %v1347_v22, %v1347_v22  ;;  %v1843_v26 = vadd.f32 %v1842_v24, %v1841_v19 }
 0x164   :  { %v1284_v27 = vadd.f32 %v1840_v20, %v1187_v46  ;;  %v1190_v28 = vadd.f32 %v1779_v23, %v2363_v37 }
 0x165   :  { %1428 = vst.msk [vmem:[%s2460_s3 + $0x24] sm:$0xf] %vm1418_vm1, %v1593_v25 }
 0x166   :  { %vm1316_vm11 = vcmp.gt.f32.partialorder %v1284_v27, 0.0  ;;  %v1332_v29 = vmul.f32 0.2, %v1284_v27  ;;  %v1287_v35 = vadd.f32 %v1843_v26, %v1190_v28  ;;  %v1780_v2 = vpop.f32.mrb[56].mxu0 }
 0x167   :  { %v1844_v31 = vpop.f32.mrb[56].mxu1  ;;  %v1781_v33 = vpop.f32.mrb[57].mxu0 }
 0x168   :  { %v1348_v48 = vsel %vm1316_vm11, %v1284_v27, %v1332_v29  ;;  %vm1317_vm12 = vcmp.gt.f32.partialorder %v1287_v35, 0.0  ;;  %v1333_v34 = vmul.f32 0.2, %v1287_v35  ;;  %v1782_v36 = vadd.f32 %v1781_v33, %v1780_v2  ;;  %v1845_v38 = vpop.f32.mrb[57].mxu1  ;;  %v1783_v39 = vpop.f32.mrb[58].mxu0 }
 0x169   :  { %v1594_v40 = vpack.c.bf16 %v1348_v48, %v1348_v48  ;;  %v1846_v41 = vadd.f32 %v1845_v38, %v1844_v31  ;;  %v1847_v37 = vpop.f32.mrb[58].mxu1  ;;  %v1784_v42 = vpop.f32.mrb[59].mxu0 }
 0x16a   :  { %v1349_v14 = vsel %vm1317_vm12, %v1287_v35, %v1333_v34  ;;  %v1195_v43 = vadd.f32 %v1782_v36, %v2366_v53  ;;  %v1785_v44 = vadd.f32 %v1784_v42, %v1783_v39  ;;  %v1848_v62 = vpop.f32.mrb[59].mxu1 }
 0x16b   :  { %1429 = vst.msk [vmem:[%s2460_s3 + $0x28] sm:$0xf] %vm1418_vm1, %v1594_v40  ;;  %v1595_v45 = vpack.c.bf16 %v1349_v14, %v1349_v14  ;;  %v1849_v47 = vadd.f32 %v1848_v62, %v1847_v37 }
 0x16c   :  { %v1292_v16 = vadd.f32 %v1846_v41, %v1195_v43  ;;  %v1198_v49 = vadd.f32 %v1785_v44, %v2369_v55 }
 0x16d   :  { %1430 = vst.msk [vmem:[%s2460_s3 + $0x2c] sm:$0xf] %vm1418_vm1, %v1595_v45 }
 0x16e   :  { %vm1318_vm13 = vcmp.gt.f32.partialorder %v1292_v16, 0.0  ;;  %v1334_v50 = vmul.f32 0.2, %v1292_v16  ;;  %v1295_v53 = vadd.f32 %v1849_v47, %v1198_v49  ;;  %v1786_v51 = vpop.f32.mrb[60].mxu0 }
 0x16f   :  { %v1850_v52 = vpop.f32.mrb[60].mxu1  ;;  %v1787_v54 = vpop.f32.mrb[61].mxu0 }
 0x170   :  { %v1350_v56 = vsel %vm1318_vm13, %v1292_v16, %v1334_v50  ;;  %vm1319_vm14 = vcmp.gt.f32.partialorder %v1295_v53, 0.0  ;;  %v1335_v57 = vmul.f32 0.2, %v1295_v53  ;;  %v1788_v0 = vadd.f32 %v1787_v54, %v1786_v51  ;;  %v1851_v30 = vpop.f32.mrb[61].mxu1  ;;  %v1789_v58 = vpop.f32.mrb[62].mxu0 }
 0x171   :  { %v1596_v59 = vpack.c.bf16 %v1350_v56, %v1350_v56  ;;  %v1852_v60 = vadd.f32 %v1851_v30, %v1850_v52  ;;  %v1853_v55 = vpop.f32.mrb[62].mxu1  ;;  %v1790_v61 = vpop.f32.mrb[63].mxu0 }
 0x172   :  { %v1351_v63 = vsel %vm1319_vm14, %v1295_v53, %v1335_v57  ;;  %v1203_v1 = vadd.f32 %v1788_v0, %v2372_v8  ;;  %v1791_v3 = vadd.f32 %v1790_v61, %v1789_v58  ;;  %v1854_v4 = vpop.f32.mrb[63].mxu1 }
 0x173   :  { %1431 = vst.msk [vmem:[%s2460_s3 + $0x30] sm:$0xf] %vm1418_vm1, %v1596_v59  ;;  %v1597_v5 = vpack.c.bf16 %v1351_v63, %v1351_v63  ;;  %v1855_v17 = vadd.f32 %v1854_v4, %v1853_v55 }
 0x174   :  { %v1300_v6 = vadd.f32 %v1852_v60, %v1203_v1  ;;  %v1206_v32 = vadd.f32 %v1791_v3, %v2375_v10 }
 0x175   :  { %1432 = vst.msk [vmem:[%s2460_s3 + $0x34] sm:$0xf] %vm1418_vm1, %v1597_v5 }
 0x176   :  { %vm1320_vm15 = vcmp.gt.f32.partialorder %v1300_v6, 0.0  ;;  %v1336_v7 = vmul.f32 0.2, %v1300_v6  ;;  %v1303_v8 = vadd.f32 %v1855_v17, %v1206_v32 }
 0x178   :  { %v1352_v9 = vsel %vm1320_vm15, %v1300_v6, %v1336_v7  ;;  %vm1321_vm0 = vcmp.gt.f32.partialorder %v1303_v8, 0.0  ;;  %v1337_v11 = vmul.f32 0.2, %v1303_v8 }
 0x179   :  { %v1598_v12 = vpack.c.bf16 %v1352_v9, %v1352_v9 }
 0x17a   :  { %v1353_v13 = vsel %vm1321_vm0, %v1303_v8, %v1337_v11 }
 0x17b   :  { %1433 = vst.msk [vmem:[%s2460_s3 + $0x38] sm:$0xf] %vm1418_vm1, %v1598_v12  ;;  %v1599_v15 = vpack.c.bf16 %v1353_v13, %v1353_v13 }
 0x17d   :  { %1434 = vst.msk [vmem:[%s2460_s3 + $0x3c] sm:$0xf] %vm1418_vm1, %v1599_v15 }

// kernel: forward.10
= control target key start
LH: loop header
LB: loop body
LE: loop exit
PB: predicated region body
PF: predicated region fallthrough
CT: control target
= control target key end

     0   :  { %vm854_vm1 = vcmask 519168   ;;  %s1407_s1 = inlined_call_operand.vmem [shape: bf16[1024,64], index: 1, kind: input, shape index: {}]   ;;  %s1408_s0 = inlined_call_operand.vmem [shape: bf16[32,1024], index: 0, kind: input, shape index: {}]   ;;  %s1409_s2 = inlined_call_operand.vmem [shape: f32[1,64], index: 2, kind: input, shape index: {}]   ;;  %s1410_s3 = inlined_call_operand.vmem [shape: bf16[32,64], index: 3, kind: output, shape index: {}]  }
   0x1   :  { %v1064_v0 = vld [vmem:[%s1407_s1 + $0x40] sm:$0xff]   ;;  %v1068_v4 = vld [vmem:[%s1407_s1 + $0x48] sm:$0xff]   ;;  %v1072_v8 = vld [vmem:[%s1407_s1 + $0x50] sm:$0xff]  }
   0x2   :  { %v1065_v1 = vld [vmem:[%s1407_s1 + $0xc0] sm:$0xff]   ;;  %952 = vmatprep.subr.bf16.mxu0 %v1064_v0  ;;  %v1069_v5 = vld [vmem:[%s1407_s1 + $0xc8] sm:$0xff]   ;;  %v1073_v9 = vld [vmem:[%s1407_s1 + $0xd0] sm:$0xff]  }
   0x3   :  { %v1066_v2 = vld [vmem:[%s1407_s1] sm:$0xff]   ;;  %980 = vmatprep.subr.bf16.mxu1 %v1065_v1  ;;  %v1070_v6 = vld [vmem:[%s1407_s1 + $0x8] sm:$0xff]   ;;  %v1074_v10 = vld [vmem:[%s1407_s1 + $0x10] sm:$0xff]  }
   0x4   :  { %v1067_v3 = vld [vmem:[%s1407_s1 + $0x80] sm:$0xff]   ;;  %953 = vmatpush3.bf16.msra.mxu0 %v1066_v2  ;;  %v1071_v7 = vld [vmem:[%s1407_s1 + $0x88] sm:$0xff]   ;;  %v1075_v11 = vld [vmem:[%s1407_s1 + $0x90] sm:$0xff]  }
   0x5   :  { %981 = vmatpush3.bf16.msra.mxu1 %v1067_v3  ;;  %954 = vmatprep.subr.bf16.mxu0 %v1068_v4  ;;  %v1076_v12 = vld [vmem:[%s1407_s1 + $0x58] sm:$0xff]   ;;  %v1080_v16 = vld [vmem:[%s1407_s1 + $0x60] sm:$0xff]   ;;  %v1084_v20 = vld [vmem:[%s1407_s1 + $0x68] sm:$0xff]  }
   0x6   :  { %982 = vmatprep.subr.bf16.mxu1 %v1069_v5  ;;  %v1077_v13 = vld [vmem:[%s1407_s1 + $0xd8] sm:$0xff]   ;;  %v1081_v17 = vld [vmem:[%s1407_s1 + $0xe0] sm:$0xff]   ;;  %v1085_v21 = vld [vmem:[%s1407_s1 + $0xe8] sm:$0xff]  }
   0x7   :  { %v1078_v14 = vld [vmem:[%s1407_s1 + $0x18] sm:$0xff]   ;;  %v1082_v18 = vld [vmem:[%s1407_s1 + $0x20] sm:$0xff]   ;;  %v1086_v22 = vld [vmem:[%s1407_s1 + $0x28] sm:$0xff]  }
   0x8   :  { %955 = vmatpush3.bf16.msra.mxu0 %v1070_v6  ;;  %v1079_v15 = vld [vmem:[%s1407_s1 + $0x98] sm:$0xff]   ;;  %v1083_v19 = vld [vmem:[%s1407_s1 + $0xa0] sm:$0xff]   ;;  %v1087_v23 = vld [vmem:[%s1407_s1 + $0xa8] sm:$0xff]  }
   0x9   :  { %983 = vmatpush3.bf16.msra.mxu1 %v1071_v7  ;;  %956 = vmatprep.subr.bf16.mxu0 %v1072_v8  ;;  %v1088_v24 = vld [vmem:[%s1407_s1 + $0x70] sm:$0xff]   ;;  %v1092_v28 = vld [vmem:[%s1407_s1 + $0x78] sm:$0xff]   ;;  %v15_v32 = vld [vmem:[%s1408_s0] sm:$0xff] }
   0xa   :  { %984 = vmatprep.subr.bf16.mxu1 %v1073_v9  ;;  %v1089_v25 = vld [vmem:[%s1407_s1 + $0xf0] sm:$0xff]   ;;  %v1093_v29 = vld [vmem:[%s1407_s1 + $0xf8] sm:$0xff]   ;;  %v19_v33 = vld [vmem:[%s1408_s0 + $0x20] sm:$0xff] }
   0xb   :  { %v1090_v26 = vld [vmem:[%s1407_s1 + $0x30] sm:$0xff]   ;;  %v1094_v30 = vld [vmem:[%s1407_s1 + $0x38] sm:$0xff]   ;;  %v16_v34 = vld [vmem:[%s1408_s0 + $0x8] sm:$0xff]  ;;  %v864_v35 = vcombine.low %v15_v32, %v19_v33  ;;  %v865_v36 = vcombine.high %v15_v32, %v19_v33 }
   0xc   :  { %957 = vmatpush3.bf16.msra.mxu0 %v1074_v10  ;;  %v1091_v27 = vld [vmem:[%s1407_s1 + $0xb0] sm:$0xff]   ;;  %v1095_v31 = vld [vmem:[%s1407_s1 + $0xb8] sm:$0xff]   ;;  %v20_v37 = vld [vmem:[%s1408_s0 + $0x28] sm:$0xff] }
   0xd   :  { %985 = vmatpush3.bf16.msra.mxu1 %v1075_v11  ;;  %958 = vmatprep.subr.bf16.mxu0 %v1076_v12  ;;  %v866_v38 = vcombine.low %v16_v34, %v20_v37  ;;  %v867_v39 = vcombine.high %v16_v34, %v20_v37  ;;  %v1096_v40 = vld [vmem:[%s1407_s1 + $0x140] sm:$0xff]   ;;  %v1100_v44 = vld [vmem:[%s1407_s1 + $0x148] sm:$0xff]   ;;  %v1104_v48 = vld [vmem:[%s1407_s1 + $0x150] sm:$0xff]  }
   0xe   :  { %986 = vmatprep.subr.bf16.mxu1 %v1077_v13  ;;  %662 = vmatprep.mubr.bf16.mxu0 %v865_v36  ;;  %v1097_v41 = vld [vmem:[%s1407_s1 + $0x1c0] sm:$0xff]   ;;  %v1101_v45 = vld [vmem:[%s1407_s1 + $0x1c8] sm:$0xff]   ;;  %v1105_v49 = vld [vmem:[%s1407_s1 + $0x1d0] sm:$0xff]  }
   0xf   :  { %711 = vmatprep.mubr.bf16.mxu1 %v867_v39  ;;  %v1098_v42 = vld [vmem:[%s1407_s1 + $0x100] sm:$0xff]   ;;  %v1102_v46 = vld [vmem:[%s1407_s1 + $0x108] sm:$0xff]   ;;  %v1106_v50 = vld [vmem:[%s1407_s1 + $0x110] sm:$0xff]  }
  0x10   :  { %959 = vmatpush3.bf16.msra.mxu0 %v1078_v14  ;;  %v1099_v43 = vld [vmem:[%s1407_s1 + $0x180] sm:$0xff]   ;;  %v1103_v47 = vld [vmem:[%s1407_s1 + $0x188] sm:$0xff]   ;;  %v1107_v51 = vld [vmem:[%s1407_s1 + $0x190] sm:$0xff]  }
  0x11   :  { %987 = vmatpush3.bf16.msra.mxu1 %v1079_v15  ;;  %960 = vmatprep.subr.bf16.mxu0 %v1080_v16  ;;  %v1108_v52 = vld [vmem:[%s1407_s1 + $0x158] sm:$0xff]   ;;  %v1112_v56 = vld [vmem:[%s1407_s1 + $0x160] sm:$0xff]   ;;  %v1116_v63 = vld [vmem:[%s1407_s1 + $0x168] sm:$0xff]  }
  0x12   :  { %988 = vmatprep.subr.bf16.mxu1 %v1081_v17  ;;  %v1109_v53 = vld [vmem:[%s1407_s1 + $0x1d8] sm:$0xff]   ;;  %v1113_v57 = vld [vmem:[%s1407_s1 + $0x1e0] sm:$0xff]   ;;  %v1117_v1 = vld [vmem:[%s1407_s1 + $0x1e8] sm:$0xff]  }
  0x13   :  { %v1110_v54 = vld [vmem:[%s1407_s1 + $0x118] sm:$0xff]   ;;  %v1114_v58 = vld [vmem:[%s1407_s1 + $0x120] sm:$0xff]   ;;  %v1118_v2 = vld [vmem:[%s1407_s1 + $0x128] sm:$0xff]  }
  0x14   :  { %961 = vmatpush3.bf16.msra.mxu0 %v1082_v18  ;;  %v1111_v55 = vld [vmem:[%s1407_s1 + $0x198] sm:$0xff]   ;;  %v1115_v59 = vld [vmem:[%s1407_s1 + $0x1a0] sm:$0xff]   ;;  %v1119_v3 = vld [vmem:[%s1407_s1 + $0x1a8] sm:$0xff]  }
  0x15   :  { %989 = vmatpush3.bf16.msra.mxu1 %v1083_v19  ;;  %962 = vmatprep.subr.bf16.mxu0 %v1084_v20  ;;  %v23_v60 = vld [vmem:[%s1408_s0 + $0x40] sm:$0xff]  ;;  %v24_v4 = vld [vmem:[%s1408_s0 + $0x48] sm:$0xff]  ;;  %v1120_v8 = vld [vmem:[%s1407_s1 + $0x170] sm:$0xff]  }
  0x16   :  { %990 = vmatprep.subr.bf16.mxu1 %v1085_v21  ;;  %v27_v61 = vld [vmem:[%s1408_s0 + $0x60] sm:$0xff]  ;;  %v28_v5 = vld [vmem:[%s1408_s0 + $0x68] sm:$0xff]  ;;  %v1121_v9 = vld [vmem:[%s1407_s1 + $0x1f0] sm:$0xff]  }
  0x17   :  { %v873_v62 = vcombine.high %v23_v60, %v27_v61  ;;  %v872_v0 = vcombine.low %v23_v60, %v27_v61  ;;  %v875_v6 = vcombine.high %v24_v4, %v28_v5  ;;  %v874_v7 = vcombine.low %v24_v4, %v28_v5  ;;  %v1122_v10 = vld [vmem:[%s1407_s1 + $0x130] sm:$0xff]   ;;  %v1124_v12 = vld [vmem:[%s1407_s1 + $0x178] sm:$0xff]   ;;  %v863_v34 = vld [vmem:[%s1409_s2] ss:$0 sm:$0xff] }
  0x18   :  { %963 = vmatpush3.bf16.msra.mxu0 %v1086_v22  ;;  %v1123_v11 = vld [vmem:[%s1407_s1 + $0x1b0] sm:$0xff]   ;;  %v1125_v13 = vld [vmem:[%s1407_s1 + $0x1f8] sm:$0xff]  }
  0x19   :  { %991 = vmatpush3.bf16.msra.mxu1 %v1087_v23  ;;  %964 = vmatprep.subr.bf16.mxu0 %v1088_v24  ;;  %v1126_v14 = vld [vmem:[%s1407_s1 + $0x138] sm:$0xff]   ;;  %v17_v16 = vld [vmem:[%s1408_s0 + $0x10] sm:$0xff] }
  0x1a   :  { %992 = vmatprep.subr.bf16.mxu1 %v1089_v25  ;;  %v1127_v15 = vld [vmem:[%s1407_s1 + $0x1b8] sm:$0xff]   ;;  %v21_v17 = vld [vmem:[%s1408_s0 + $0x30] sm:$0xff] }
  0x1b   :  { %v18_v18 = vld [vmem:[%s1408_s0 + $0x18] sm:$0xff]  ;;  %v868_v20 = vcombine.low %v17_v16, %v21_v17  ;;  %v869_v21 = vcombine.high %v17_v16, %v21_v17  ;;  %v25_v24 = vld [vmem:[%s1408_s0 + $0x50] sm:$0xff] }
  0x1c   :  { %965 = vmatpush3.bf16.msra.mxu0 %v1090_v26  ;;  %v22_v19 = vld [vmem:[%s1408_s0 + $0x38] sm:$0xff]  ;;  %v29_v25 = vld [vmem:[%s1408_s0 + $0x70] sm:$0xff] }
  0x1d   :  { %993 = vmatpush3.bf16.msra.mxu1 %v1091_v27  ;;  %966 = vmatprep.subr.bf16.mxu0 %v1092_v28  ;;  %v870_v22 = vcombine.low %v18_v18, %v22_v19  ;;  %v871_v23 = vcombine.high %v18_v18, %v22_v19  ;;  %v26_v26 = vld [vmem:[%s1408_s0 + $0x58] sm:$0xff]  ;;  %v877_v27 = vcombine.high %v25_v24, %v29_v25 }
  0x1e   :  { %994 = vmatprep.subr.bf16.mxu1 %v1093_v29  ;;  %v30_v28 = vld [vmem:[%s1408_s0 + $0x78] sm:$0xff] }
  0x1f   :  { %v879_v29 = vcombine.high %v26_v26, %v30_v28 }
  0x20   :  { %967 = vmatpush3.bf16.msra.mxu0 %v1094_v30  ;;  %v876_v30 = vcombine.low %v25_v24, %v29_v25 }
  0x21   :  { %995 = vmatpush3.bf16.msra.mxu1 %v1095_v31  ;;  %1008 = vmatprep.subr.bf16.mxu0 %v1096_v40  ;;  %v878_v31 = vcombine.low %v26_v26, %v30_v28 }
  0x22   :  { %1036 = vmatprep.subr.bf16.mxu1 %v1097_v41 }
  0x23   :  { %663 = vmatmul.mubr.bf16.vlgmr.msra.gmra.mrb[0].mxu0 %v864_v35 }
  0x24   :  { %712 = vmatmul.mubr.bf16.vlgmr.msra.gmra.mrb[0].mxu1 %v866_v38  ;;  %1009 = vmatpush3.bf16.msra.mxu0 %v1098_v42 }
  0x25   :  { %1037 = vmatpush3.bf16.msra.mxu1 %v1099_v43  ;;  %1010 = vmatprep.subr.bf16.mxu0 %v1100_v44 }
  0x26   :  { %1038 = vmatprep.subr.bf16.mxu1 %v1101_v45  ;;  %670 = vmatprep.mubr.bf16.mxu0 %v873_v62 }
  0x27   :  { %719 = vmatprep.mubr.bf16.mxu1 %v875_v6 }
  0x28   :  { %1011 = vmatpush3.bf16.msra.mxu0 %v1102_v46 }
  0x29   :  { %1039 = vmatpush3.bf16.msra.mxu1 %v1103_v47  ;;  %1012 = vmatprep.subr.bf16.mxu0 %v1104_v48 }
  0x2a   :  { %1040 = vmatprep.subr.bf16.mxu1 %v1105_v49 }
  0x2b   :  { %671 = vmatmul.mubr.bf16.gmra.mrb[4].mxu0 %v872_v0 }
  0x2c   :  { %1013 = vmatpush3.bf16.msra.mxu0 %v1106_v50  ;;  %720 = vmatmul.mubr.bf16.gmra.mrb[4].mxu1 %v874_v7 }
  0x2d   :  { %1041 = vmatpush3.bf16.msra.mxu1 %v1107_v51  ;;  %1014 = vmatprep.subr.bf16.mxu0 %v1108_v52 }
  0x2e   :  { %1042 = vmatprep.subr.bf16.mxu1 %v1109_v53  ;;  %760 = vmatprep.mubr.bf16.mxu0 %v869_v21 }
  0x2f   :  { %809 = vmatprep.mubr.bf16.mxu1 %v871_v23 }
  0x30   :  { %1015 = vmatpush3.bf16.msra.mxu0 %v1110_v54 }
  0x31   :  { %1043 = vmatpush3.bf16.msra.mxu1 %v1111_v55  ;;  %1016 = vmatprep.subr.bf16.mxu0 %v1112_v56 }
  0x32   :  { %1044 = vmatprep.subr.bf16.mxu1 %v1113_v57 }
  0x34   :  { %1017 = vmatpush3.bf16.msra.mxu0 %v1114_v58 }
  0x35   :  { %1045 = vmatpush3.bf16.msra.mxu1 %v1115_v59  ;;  %1018 = vmatprep.subr.bf16.mxu0 %v1116_v63 }
  0x36   :  { %1046 = vmatprep.subr.bf16.mxu1 %v1117_v1 }
  0x38   :  { %1019 = vmatpush3.bf16.msra.mxu0 %v1118_v2 }
  0x39   :  { %1047 = vmatpush3.bf16.msra.mxu1 %v1119_v3  ;;  %1020 = vmatprep.subr.bf16.mxu0 %v1120_v8 }
  0x3a   :  { %1048 = vmatprep.subr.bf16.mxu1 %v1121_v9 }
  0x3c   :  { %1021 = vmatpush3.bf16.msra.mxu0 %v1122_v10 }
  0x3d   :  { %1049 = vmatpush3.bf16.msra.mxu1 %v1123_v11  ;;  %1022 = vmatprep.subr.bf16.mxu0 %v1124_v12 }
  0x3e   :  { %1050 = vmatprep.subr.bf16.mxu1 %v1125_v13 }
  0x40   :  { %1023 = vmatpush3.bf16.msra.mxu0 %v1126_v14 }
  0x41   :  { %1051 = vmatpush3.bf16.msra.mxu1 %v1127_v15 }
  0x43   :  { %761 = vmatmul.mubr.bf16.vlgmr.msra.gmra.mrb[8].mxu0 %v868_v20 }
  0x44   :  { %810 = vmatmul.mubr.bf16.vlgmr.msra.gmra.mrb[8].mxu1 %v870_v22  ;;  %768 = vmatprep.mubr.bf16.mxu0 %v877_v27 }
  0x45   :  { %817 = vmatprep.mubr.bf16.mxu1 %v879_v29 }
  0x4b   :  { %769 = vmatmul.mubr.bf16.gmra.mrb[12].mxu0 %v876_v30 }
  0x4c   :  { %818 = vmatmul.mubr.bf16.gmra.mrb[12].mxu1 %v878_v31 }
  0xf6   :  { %v968_v32 = vpop.f32.mrb[0].mxu0 }
  0xf7   :  { %v996_v33 = vpop.f32.mrb[0].mxu1  ;;  %v969_v35 = vpop.f32.mrb[1].mxu0 }
  0xf8   :  { %v970_v36 = vadd.f32 %v969_v35, %v968_v32  ;;  %v997_v37 = vpop.f32.mrb[1].mxu1  ;;  %v971_v38 = vpop.f32.mrb[2].mxu0 }
  0xf9   :  { %v998_v39 = vadd.f32 %v997_v37, %v996_v33  ;;  %v999_v40 = vpop.f32.mrb[2].mxu1  ;;  %v972_v41 = vpop.f32.mrb[3].mxu0 }
  0xfa   :  { %v665_v42 = vadd.f32 %v970_v36, %v863_v34  ;;  %v973_v43 = vadd.f32 %v972_v41, %v971_v38  ;;  %v1000_v44 = vpop.f32.mrb[3].mxu1 }
  0xfb   :  { %v1001_v45 = vadd.f32 %v1000_v44, %v999_v40 }
  0xfc   :  { %v714_v46 = vadd.f32 %v998_v39, %v665_v42  ;;  %v668_v47 = vadd.f32 %v973_v43, %v863_v34 }
  0xfe   :  { %v717_v48 = vadd.f32 %v1001_v45, %v668_v47  ;;  %v974_v49 = vpop.f32.mrb[4].mxu0 }
  0xff   :  { %v975_v50 = vpop.f32.mrb[5].mxu0  ;;  %v1002_v56 = vpop.f32.mrb[4].mxu1 }
 0x100   :  { %v976_v51 = vadd.f32 %v975_v50, %v974_v49  ;;  %v977_v52 = vpop.f32.mrb[6].mxu0  ;;  %v1003_v57 = vpop.f32.mrb[5].mxu1 }
 0x101   :  { %v978_v53 = vpop.f32.mrb[7].mxu0  ;;  %v1004_v59 = vadd.f32 %v1003_v57, %v1002_v56  ;;  %v1005_v60 = vpop.f32.mrb[6].mxu1 }
 0x102   :  { %v979_v54 = vadd.f32 %v978_v53, %v977_v52  ;;  %v673_v55 = vadd.f32 %v976_v51, %v863_v34  ;;  %v1006_v61 = vpop.f32.mrb[7].mxu1 }
 0x103   :  { %v1007_v63 = vadd.f32 %v1006_v61, %v1005_v60 }
 0x104   :  { %v676_v58 = vadd.f32 %v979_v54, %v863_v34  ;;  %v722_v62 = vadd.f32 %v1004_v59, %v673_v55 }
 0x106   :  { %v725_v0 = vadd.f32 %v1007_v63, %v676_v58 }
 0x116   :  { %v1024_v1 = vpop.f32.mrb[8].mxu0 }
 0x117   :  { %v1052_v2 = vpop.f32.mrb[8].mxu1  ;;  %v1025_v3 = vpop.f32.mrb[9].mxu0 }
 0x118   :  { %v1053_v4 = vpop.f32.mrb[9].mxu1  ;;  %v1026_v5 = vadd.f32 %v1025_v3, %v1024_v1  ;;  %v1027_v7 = vpop.f32.mrb[10].mxu0 }
 0x119   :  { %v1054_v6 = vadd.f32 %v1053_v4, %v1052_v2  ;;  %v1055_v8 = vpop.f32.mrb[10].mxu1  ;;  %v1028_v9 = vpop.f32.mrb[11].mxu0 }
 0x11a   :  { %v1056_v10 = vpop.f32.mrb[11].mxu1  ;;  %v763_v11 = vadd.f32 %v1026_v5, %v714_v46  ;;  %v1029_v12 = vadd.f32 %v1028_v9, %v1027_v7 }
 0x11b   :  { %v1057_v13 = vadd.f32 %v1056_v10, %v1055_v8 }
 0x11c   :  { %v812_v14 = vadd.f32 %v1054_v6, %v763_v11  ;;  %v766_v15 = vadd.f32 %v1029_v12, %v717_v48 }
 0x11e   :  { %vm826_vm0 = vcmp.gt.f32.partialorder %v812_v14, 0.0  ;;  %v830_v16 = vmul.f32 0.2, %v812_v14  ;;  %v815_v17 = vadd.f32 %v1057_v13, %v766_v15  ;;  %v1030_v18 = vpop.f32.mrb[12].mxu0 }
 0x11f   :  { %v1058_v19 = vpop.f32.mrb[12].mxu1  ;;  %v1031_v20 = vpop.f32.mrb[13].mxu0 }
 0x120   :  { %v1059_v21 = vpop.f32.mrb[13].mxu1  ;;  %v834_v22 = vsel %vm826_vm0, %v812_v14, %v830_v16  ;;  %vm827_vm2 = vcmp.gt.f32.partialorder %v815_v17, 0.0  ;;  %v831_v23 = vmul.f32 0.2, %v815_v17  ;;  %v1032_v24 = vadd.f32 %v1031_v20, %v1030_v18  ;;  %v1033_v25 = vpop.f32.mrb[14].mxu0 }
 0x121   :  { %v1061_v26 = vpop.f32.mrb[14].mxu1  ;;  %v948_v27 = vpack.c.bf16 %v834_v22, %v834_v22  ;;  %v1060_v28 = vadd.f32 %v1059_v21, %v1058_v19  ;;  %v1034_v29 = vpop.f32.mrb[15].mxu0 }
 0x122   :  { %v1062_v30 = vpop.f32.mrb[15].mxu1  ;;  %v835_v31 = vsel %vm827_vm2, %v815_v17, %v831_v23  ;;  %v771_v32 = vadd.f32 %v1032_v24, %v722_v62  ;;  %v1035_v33 = vadd.f32 %v1034_v29, %v1033_v25 }
 0x123   :  { %v1063_v34 = vadd.f32 %v1062_v30, %v1061_v26  ;;  %855 = vst.msk [vmem:[%s1410_s3] sm:$0xf] %vm854_vm1, %v948_v27  ;;  %v949_v35 = vpack.c.bf16 %v835_v31, %v835_v31 }
 0x124   :  { %v820_v36 = vadd.f32 %v1060_v28, %v771_v32  ;;  %v774_v37 = vadd.f32 %v1035_v33, %v725_v0 }
 0x125   :  { %856 = vst.msk [vmem:[%s1410_s3 + $0x4] sm:$0xf] %vm854_vm1, %v949_v35 }
 0x126   :  { %vm828_vm3 = vcmp.gt.f32.partialorder %v820_v36, 0.0  ;;  %v832_v38 = vmul.f32 0.2, %v820_v36  ;;  %v823_v39 = vadd.f32 %v1063_v34, %v774_v37 }
 0x128   :  { %v836_v40 = vsel %vm828_vm3, %v820_v36, %v832_v38  ;;  %vm829_vm4 = vcmp.gt.f32.partialorder %v823_v39, 0.0  ;;  %v833_v41 = vmul.f32 0.2, %v823_v39 }
 0x129   :  { %v950_v42 = vpack.c.bf16 %v836_v40, %v836_v40 }
 0x12a   :  { %v837_v43 = vsel %vm829_vm4, %v823_v39, %v833_v41 }
 0x12b   :  { %857 = vst.msk [vmem:[%s1410_s3 + $0x8] sm:$0xf] %vm854_vm1, %v950_v42  ;;  %v951_v44 = vpack.c.bf16 %v837_v43, %v837_v43 }
 0x12d   :  { %858 = vst.msk [vmem:[%s1410_s3 + $0xc] sm:$0xf] %vm854_vm1, %v951_v44 }

// kernel: forward.11
= control target key start
LH: loop header
LB: loop body
LE: loop exit
PB: predicated region body
PF: predicated region fallthrough
CT: control target
= control target key end

     0   :  { %v157_v28 = vlaneseq  ;;  %v1014_v36 = vmov 1966171168   ;;  %s1259_s0 = inlined_call_operand.vmem [shape: bf16[2,1024], index: 0, kind: input, shape index: {}]   ;;  %s1260_s1 = inlined_call_operand.vmem [shape: bf16[1024,64], index: 1, kind: input, shape index: {}]   ;;  %s1261_s2 = inlined_call_operand.vmem [shape: f32[1,64], index: 2, kind: input, shape index: {}]   ;;  %s1262_s3 = inlined_call_operand.hbm [shape: f32[2,64], index: 3, kind: output, shape index: {}]  }
   0x1   :  { %v925_v0 = vld [vmem:[%s1260_s1 + $0x40] sm:$0xff]   ;;  %v929_v4 = vld [vmem:[%s1260_s1 + $0x48] sm:$0xff]   ;;  %v933_v8 = vld [vmem:[%s1260_s1 + $0x50] sm:$0xff]   ;;  %v155_v37 = vunpack.c.l.s4 %v1014_v36 }
   0x2   :  { %v926_v1 = vld [vmem:[%s1260_s1 + $0xc0] sm:$0xff]   ;;  %835 = vmatprep.subr.bf16.mxu0 %v925_v0  ;;  %v930_v5 = vld [vmem:[%s1260_s1 + $0xc8] sm:$0xff]   ;;  %v934_v9 = vld [vmem:[%s1260_s1 + $0xd0] sm:$0xff]   ;;  %v158_v33 = vshrl.u32 %v157_v28, 7 }
   0x3   :  { %v927_v2 = vld [vmem:[%s1260_s1] sm:$0xff]   ;;  %857 = vmatprep.subr.bf16.mxu1 %v926_v1  ;;  %v931_v6 = vld [vmem:[%s1260_s1 + $0x8] sm:$0xff]   ;;  %v935_v10 = vld [vmem:[%s1260_s1 + $0x10] sm:$0xff]   ;;  %v156_v40 = vunpack.c.0.s8 %v155_v37 }
   0x4   :  { %v928_v3 = vld [vmem:[%s1260_s1 + $0x80] sm:$0xff]   ;;  %836 = vmatpush3.bf16.msra.mxu0 %v927_v2  ;;  %v932_v7 = vld [vmem:[%s1260_s1 + $0x88] sm:$0xff]   ;;  %v936_v11 = vld [vmem:[%s1260_s1 + $0x90] sm:$0xff]  }
   0x5   :  { %858 = vmatpush3.bf16.msra.mxu1 %v928_v3  ;;  %837 = vmatprep.subr.bf16.mxu0 %v929_v4  ;;  %v937_v12 = vld [vmem:[%s1260_s1 + $0x58] sm:$0xff]   ;;  %v941_v16 = vld [vmem:[%s1260_s1 + $0x60] sm:$0xff]   ;;  %v945_v20 = vld [vmem:[%s1260_s1 + $0x68] sm:$0xff]   ;;  %v1141_v41 = vsub.s32 %v156_v40, %v158_v33 }
   0x6   :  { %859 = vmatprep.subr.bf16.mxu1 %v930_v5  ;;  %v938_v13 = vld [vmem:[%s1260_s1 + $0xd8] sm:$0xff]   ;;  %v942_v17 = vld [vmem:[%s1260_s1 + $0xe0] sm:$0xff]   ;;  %v946_v21 = vld [vmem:[%s1260_s1 + $0xe8] sm:$0xff]  }
   0x7   :  { %v939_v14 = vld [vmem:[%s1260_s1 + $0x18] sm:$0xff]   ;;  %v943_v18 = vld [vmem:[%s1260_s1 + $0x20] sm:$0xff]   ;;  %v947_v22 = vld [vmem:[%s1260_s1 + $0x28] sm:$0xff]  }
   0x8   :  { %838 = vmatpush3.bf16.msra.mxu0 %v931_v6  ;;  %v940_v15 = vld [vmem:[%s1260_s1 + $0x98] sm:$0xff]   ;;  %v944_v19 = vld [vmem:[%s1260_s1 + $0xa0] sm:$0xff]   ;;  %v948_v23 = vld [vmem:[%s1260_s1 + $0xa8] sm:$0xff]  }
   0x9   :  { %860 = vmatpush3.bf16.msra.mxu1 %v932_v7  ;;  %839 = vmatprep.subr.bf16.mxu0 %v933_v8  ;;  %v949_v24 = vld [vmem:[%s1260_s1 + $0x70] sm:$0xff]   ;;  %v953_v29 = vld [vmem:[%s1260_s1 + $0x78] sm:$0xff]   ;;  %v16_v34 = vld [vmem:[%s1259_s0] sm:$0xff] }
   0xa   :  { %861 = vmatprep.subr.bf16.mxu1 %v934_v9  ;;  %v950_v25 = vld [vmem:[%s1260_s1 + $0xf0] sm:$0xff]   ;;  %v954_v30 = vld [vmem:[%s1260_s1 + $0xf8] sm:$0xff]   ;;  %v958_v35 = vld [vmem:[%s1260_s1 + $0x140] sm:$0xff]   ;;  %v153_v39 = vcombine.high %v16_v34, %v16_v34  ;;  %v160_v42 = vrot.slane %v16_v34, %v1141_v41 }
   0xb   :  { %v951_v26 = vld [vmem:[%s1260_s1 + $0x30] sm:$0xff]   ;;  %v955_v31 = vld [vmem:[%s1260_s1 + $0x38] sm:$0xff]   ;;  %v959_v38 = vld [vmem:[%s1260_s1 + $0x1c0] sm:$0xff]  }
   0xc   :  { %840 = vmatpush3.bf16.msra.mxu0 %v935_v10  ;;  %v952_v27 = vld [vmem:[%s1260_s1 + $0xb0] sm:$0xff]   ;;  %v956_v32 = vld [vmem:[%s1260_s1 + $0xb8] sm:$0xff]   ;;  %v1145_v43 = vrot.slane %v153_v39, %v1141_v41  ;;  %v168_v44 = vcombine.high %v160_v42, %v160_v42  ;;  %v176_v45 = vrot.slane %v160_v42, %v1141_v41  ;;  %v960_v48 = vld [vmem:[%s1260_s1 + $0x100] sm:$0xff]  }
   0xd   :  { %862 = vmatpush3.bf16.msra.mxu1 %v936_v11  ;;  %841 = vmatprep.subr.bf16.mxu0 %v937_v12  ;;  %v962_v51 = vld [vmem:[%s1260_s1 + $0x148] sm:$0xff]   ;;  %v961_v53 = vld [vmem:[%s1260_s1 + $0x180] sm:$0xff]   ;;  %v966_v57 = vld [vmem:[%s1260_s1 + $0x150] sm:$0xff]  }
   0xe   :  { %863 = vmatprep.subr.bf16.mxu1 %v938_v13  ;;  %v169_v46 = vcombine.high %v1145_v43, %v1145_v43  ;;  %v190_v47 = vrot.slane %v168_v44, %v1141_v41  ;;  %v198_v50 = vcombine.high %v176_v45, %v176_v45  ;;  %v963_v54 = vld [vmem:[%s1260_s1 + $0x1c8] sm:$0xff]   ;;  %v967_v59 = vld [vmem:[%s1260_s1 + $0x1d0] sm:$0xff]   ;;  %v970_v61 = vld [vmem:[%s1260_s1 + $0x158] sm:$0xff]  }
   0xf   :  { %v964_v56 = vld [vmem:[%s1260_s1 + $0x108] sm:$0xff]   ;;  %v968_v60 = vld [vmem:[%s1260_s1 + $0x110] sm:$0xff]   ;;  %v971_v63 = vld [vmem:[%s1260_s1 + $0x1d8] sm:$0xff]  }
  0x10   :  { %842 = vmatpush3.bf16.msra.mxu0 %v939_v14  ;;  %v197_v49 = vrot.slane %v169_v46, %v1141_v41  ;;  %626 = vmatprep.mubr.bf16.mxu0 %v190_v47  ;;  %v200_v52 = vcombine.high %v190_v47, %v190_v47  ;;  %v965_v58 = vld [vmem:[%s1260_s1 + $0x188] sm:$0xff]   ;;  %v969_v62 = vld [vmem:[%s1260_s1 + $0x190] sm:$0xff]   ;;  %v972_v0 = vld [vmem:[%s1260_s1 + $0x118] sm:$0xff]  }
  0x11   :  { %864 = vmatpush3.bf16.msra.mxu1 %v940_v15  ;;  %843 = vmatprep.subr.bf16.mxu0 %v941_v16  ;;  %v974_v1 = vld [vmem:[%s1260_s1 + $0x160] sm:$0xff]   ;;  %v973_v2 = vld [vmem:[%s1260_s1 + $0x198] sm:$0xff]   ;;  %v978_v5 = vld [vmem:[%s1260_s1 + $0x168] sm:$0xff]  }
  0x12   :  { %865 = vmatprep.subr.bf16.mxu1 %v942_v17  ;;  %v201_v55 = vcombine.high %v197_v49, %v197_v49  ;;  %666 = vmatprep.mubr.bf16.mxu1 %v200_v52  ;;  %v975_v3 = vld [vmem:[%s1260_s1 + $0x1e0] sm:$0xff]   ;;  %v979_v7 = vld [vmem:[%s1260_s1 + $0x1e8] sm:$0xff]   ;;  %v982_v9 = vld [vmem:[%s1260_s1 + $0x170] sm:$0xff]  }
  0x13   :  { %v976_v4 = vld [vmem:[%s1260_s1 + $0x120] sm:$0xff]   ;;  %v980_v8 = vld [vmem:[%s1260_s1 + $0x128] sm:$0xff]  }
  0x14   :  { %844 = vmatpush3.bf16.msra.mxu0 %v943_v18  ;;  %v977_v6 = vld [vmem:[%s1260_s1 + $0x1a0] sm:$0xff]  }
  0x15   :  { %866 = vmatpush3.bf16.msra.mxu1 %v944_v19  ;;  %845 = vmatprep.subr.bf16.mxu0 %v945_v20 }
  0x16   :  { %867 = vmatprep.subr.bf16.mxu1 %v946_v21 }
  0x18   :  { %846 = vmatpush3.bf16.msra.mxu0 %v947_v22 }
  0x19   :  { %868 = vmatpush3.bf16.msra.mxu1 %v948_v23  ;;  %847 = vmatprep.subr.bf16.mxu0 %v949_v24 }
  0x1a   :  { %869 = vmatprep.subr.bf16.mxu1 %v950_v25 }
  0x1c   :  { %848 = vmatpush3.bf16.msra.mxu0 %v951_v26 }
  0x1d   :  { %870 = vmatpush3.bf16.msra.mxu1 %v952_v27  ;;  %849 = vmatprep.subr.bf16.mxu0 %v953_v29 }
  0x1e   :  { %871 = vmatprep.subr.bf16.mxu1 %v954_v30 }
  0x20   :  { %850 = vmatpush3.bf16.msra.mxu0 %v955_v31 }
  0x21   :  { %872 = vmatpush3.bf16.msra.mxu1 %v956_v32  ;;  %879 = vmatprep.subr.bf16.mxu0 %v958_v35 }
  0x22   :  { %901 = vmatprep.subr.bf16.mxu1 %v959_v38 }
  0x23   :  { %627 = vmatmul.mubr.bf16.vlgmr.msra.gmra.mrb[0].mxu0 %v176_v45 }
  0x24   :  { %880 = vmatpush3.bf16.msra.mxu0 %v960_v48  ;;  %667 = vmatmul.mubr.bf16.vlgmr.msra.gmra.mrb[0].mxu1 %v198_v50 }
  0x25   :  { %881 = vmatprep.subr.bf16.mxu0 %v962_v51  ;;  %902 = vmatpush3.bf16.msra.mxu1 %v961_v53 }
  0x26   :  { %706 = vmatprep.mubr.bf16.mxu0 %v197_v49  ;;  %903 = vmatprep.subr.bf16.mxu1 %v963_v54 }
  0x27   :  { %746 = vmatprep.mubr.bf16.mxu1 %v201_v55 }
  0x28   :  { %882 = vmatpush3.bf16.msra.mxu0 %v964_v56 }
  0x29   :  { %883 = vmatprep.subr.bf16.mxu0 %v966_v57  ;;  %904 = vmatpush3.bf16.msra.mxu1 %v965_v58 }
  0x2a   :  { %905 = vmatprep.subr.bf16.mxu1 %v967_v59 }
  0x2c   :  { %884 = vmatpush3.bf16.msra.mxu0 %v968_v60 }
  0x2d   :  { %885 = vmatprep.subr.bf16.mxu0 %v970_v61  ;;  %906 = vmatpush3.bf16.msra.mxu1 %v969_v62 }
  0x2e   :  { %907 = vmatprep.subr.bf16.mxu1 %v971_v63 }
  0x30   :  { %886 = vmatpush3.bf16.msra.mxu0 %v972_v0 }
  0x31   :  { %887 = vmatprep.subr.bf16.mxu0 %v974_v1  ;;  %908 = vmatpush3.bf16.msra.mxu1 %v973_v2 }
  0x32   :  { %909 = vmatprep.subr.bf16.mxu1 %v975_v3 }
  0x34   :  { %888 = vmatpush3.bf16.msra.mxu0 %v976_v4 }
  0x35   :  { %889 = vmatprep.subr.bf16.mxu0 %v978_v5 }
  0x36   :  { %8 = vsyncpa [#allocation3], 0  ;;  %910 = vmatpush3.bf16.msra.mxu1 %v977_v6  ;;  %v981_v10 = vld [vmem:[%s1260_s1 + $0x1a8] sm:$0xff]   ;;  %v983_v11 = vld [vmem:[%s1260_s1 + $0x1f0] sm:$0xff]   ;;  %v183_v17 = vrot.slane %v1145_v43, %v1141_v41  ;;  %vm754_vm0 = vcmask 517120  }
  0x37   :  { %911 = vmatprep.subr.bf16.mxu1 %v979_v7  ;;  %v984_v12 = vld [vmem:[%s1260_s1 + $0x130] sm:$0xff]   ;;  %v986_v13 = vld [vmem:[%s1260_s1 + $0x178] sm:$0xff]   ;;  %v770_v21 = vld [vmem:[%s1261_s2] ss:$0 sm:$0xff] }
  0x38   :  { %890 = vmatpush3.bf16.msra.mxu0 %v980_v8  ;;  %v985_v14 = vld [vmem:[%s1260_s1 + $0x1b0] sm:$0xff]   ;;  %v987_v15 = vld [vmem:[%s1260_s1 + $0x1f8] sm:$0xff]   ;;  %v199_v19 = vcombine.high %v183_v17, %v183_v17 }
  0x39   :  { %891 = vmatprep.subr.bf16.mxu0 %v982_v9  ;;  %v988_v16 = vld [vmem:[%s1260_s1 + $0x138] sm:$0xff]  }
  0x3a   :  { %912 = vmatpush3.bf16.msra.mxu1 %v981_v10  ;;  %v989_v18 = vld [vmem:[%s1260_s1 + $0x1b8] sm:$0xff]   ;;  %s1015_s1 = smov [#allocation2]  }
  0x3b   :  { %913 = vmatprep.subr.bf16.mxu1 %v983_v11  ;;  %s762_s2 = sshll.u32 %s1015_s1, 4  ;;  %s763_s2 = int_to_ptr.vmem [resolvable:$true] %s762_s2 }
  0x3c   :  { %892 = vmatpush3.bf16.msra.mxu0 %v984_v12  ;;  %s990_s6 = scalar_lea.vmem %s763_s2, 32  ;;  %p995_p1 = scmp.lt.s32.totalorder %s763_s2, %s763_s2 }
  0x3d   :  { %893 = vmatprep.subr.bf16.mxu0 %v986_v13  ;;  %p991_p0 = scmp.ne.s32.totalorder %s763_s2, %s990_s6  ;;  %p996_p2 = scmp.lt.s32.totalorder %s990_s6, %s990_s6 }
  0x3e   :  { %914 = vmatpush3.bf16.msra.mxu1 %v985_v14 }
  0x3f   :  { %915 = vmatprep.subr.bf16.mxu1 %v987_v15  ;;  %p997_p3 = por %p996_p2, %p995_p1 }
  0x40   :  { %894 = vmatpush3.bf16.msra.mxu0 %v988_v16 }
  0x41   :  { %p998_p4 = pnand %p997_p3, %p991_p0 }
  0x42   :  { %916 = vmatpush3.bf16.msra.mxu1 %v989_v18 }
  0x43   :  { %707 = vmatmul.mubr.bf16.vlgmr.msra.gmra.mrb[4].mxu0 %v183_v17 }
  0x45   :  { %747 = vmatmul.mubr.bf16.vlgmr.msra.gmra.mrb[4].mxu1 %v199_v19 }
  0xf6   :  { %v851_v20 = vpop.f32.mrb[0].mxu0 }
  0xf7   :  { %v852_v22 = vpop.f32.mrb[1].mxu0  ;;  %v873_v23 = vpop.f32.mrb[0].mxu1 }
  0xf8   :  { %v853_v24 = vadd.f32 %v852_v22, %v851_v20  ;;  %v854_v25 = vpop.f32.mrb[2].mxu0  ;;  %v874_v26 = vpop.f32.mrb[1].mxu1 }
  0xf9   :  { %v855_v27 = vpop.f32.mrb[3].mxu0  ;;  %v875_v29 = vadd.f32 %v874_v26, %v873_v23  ;;  %v876_v30 = vpop.f32.mrb[2].mxu1 }
  0xfa   :  { %v629_v28 = vadd.f32 %v853_v24, %v770_v21  ;;  %v877_v31 = vpop.f32.mrb[3].mxu1 }
  0xfc   :  { %v669_v32 = vadd.f32 %v875_v29, %v629_v28 }
 0x116   :  { %v895_v33 = vpop.f32.mrb[4].mxu0 }
 0x117   :  { %v896_v34 = vpop.f32.mrb[5].mxu0 }
 0x118   :  { %v917_v35 = vpop.f32.mrb[4].mxu1  ;;  %v897_v36 = vadd.f32 %v896_v34, %v895_v33  ;;  %v898_v37 = vpop.f32.mrb[6].mxu0 }
 0x119   :  { %v918_v38 = vpop.f32.mrb[5].mxu1  ;;  %v899_v39 = vpop.f32.mrb[7].mxu0 }
 0x11a   :  { %v709_v40 = vadd.f32 %v897_v36, %v669_v32  ;;  %v919_v41 = vadd.f32 %v918_v38, %v917_v35  ;;  %v920_v42 = vpop.f32.mrb[6].mxu1 }
 0x11b   :  { %v921_v43 = vpop.f32.mrb[7].mxu1 }
 0x11c   :  { %v749_v44 = vadd.f32 %v919_v41, %v709_v40 }
 0x11e   :  { %755 = vst.msk [vmem:[#allocation2] sm:$0x3] %vm754_vm0, %v749_v44 }
 0x11f   :  { %1001 = shalt.err (!%p998_p4)
}
 0x120   :  { %s1002_s9 = scalar_lea.hbm %s1262_s3, 32 }
 0x121   :  { %p1003_p5 = scmp.ne.s32.totalorder %s1262_s3, %s1002_s9  ;;  %p1006_p6 = scmp.lt.u32.totalorder %s1002_s9, %s1262_s3 }
 0x123   :  { %p1008_p7 = pnand %p1006_p6, %p1003_p5 }
 0x125   :  { %1011 = shalt.err (!%p1008_p7)
}
 0x126   :  { %765 = dma.vmem_to_hbm [thread:$0]  %s763_s2, 32, %s1262_s3, [#allocation3]  }
 0x127   :  { %1012 = dma.done.wait [#allocation3], 32  }
 0x128   :  { %1013 = vsyncadd [#allocation3], 4294967264 }
 0x129   :  { %769 = vsyncpa [#allocation3], 1 }

</bundles_post_ra>
